<compile_context>
chip_gen: v6e
topology: v6e:2x2x1
jax: 0.10.0
libtpu: 0.0.40
codegen_flags: <defaults>
</compile_context>

<pallas_src>
import functools

import jax
import jax.numpy as jnp
from jax.experimental import pallas as pl
from jax.experimental.pallas import tpu as pltpu


# ------------------------------ fused kernel --------------------------------

def _vae_kernel(
    # inputs
    x_ref, eps_ref,
    ea_w, ea_b, e_ln1g, e_ln1b, e_w1, e_b1, e_w2t, e_b2, e_ln2g, e_ln2b,
    muvar_w, muvar_b,
    dsa_w, dsa_b, d_ln1g, d_ln1b, dca_w, dca_b, d_ln2g, d_ln2b,
    d_w1, d_b1, d_w2t, d_b2, d_ln3g, d_ln3b,
    out_w, out_b,
    # output: (B, F + 2L) = [x_recon | mu | logvar]
    out_ref,
    *, n_enc, n_dec, latent_dim):

    f32 = jnp.float32
    bf16 = jnp.bfloat16

    def layernorm(h, g, b):
        # post-LN, eps = 1e-5 (torch default); all-f32 elementwise math
        mean = jnp.mean(h, axis=-1, keepdims=True)
        c = h - mean
        var = jnp.mean(c * c, axis=-1, keepdims=True)
        return c * jax.lax.rsqrt(var + 1e-5) * g + b

    def mm(a, w):
        # (B, K) @ (K, N): bf16 MXU operands, f32 accumulation
        return jnp.dot(a.astype(bf16), w, preferred_element_type=f32)

    def mm_t(a, wt):
        # (B, K) x (N, K) contracted over K -- wt stored lane-dense (2048 last)
        return jax.lax.dot_general(
            a.astype(bf16), wt, (((1,), (1,)), ((), ())),
            preferred_element_type=f32)

    # ------------------------------ encoder --------------------------------
    h = x_ref[...]
    for l in range(n_enc):
        # self-attention: seq_len==1 => softmax==1 => fused  x @ (Wv@Wo) + b
        attn = mm(h, ea_w[l]) + ea_b[l]
        h = layernorm(h + attn, e_ln1g[l], e_ln1b[l])
        # fused feed-forward; (B, dff) intermediate stays on-chip
        ff = jnp.maximum(mm(h, e_w1[l]) + e_b1[l], 0.0)
        ff = mm_t(ff, e_w2t[l]) + e_b2[l]
        h = layernorm(h + ff, e_ln2g[l], e_ln2b[l])

    # ------------------- latent heads + reparameterize ---------------------
    mv = mm(h, muvar_w[...]) + muvar_b[...]          # (B, 2*latent)
    mu = mv[:, :latent_dim]
    lv = mv[:, latent_dim:]
    lvc = jnp.clip(lv, -20.0, 20.0)                  # torch.clamp in reference
    z = mu + eps_ref[...] * jnp.exp(0.5 * lvc)

    # all decoder cross-attention outputs in one matmul (memory z is constant)
    ca_all = mm(z, dca_w[...]) + dca_b[...]          # (B, n_dec*latent)

    # ------------------------------ decoder --------------------------------
    d = z
    for l in range(n_dec):
        # self-attention on tgt (seq_len==1)
        sa = mm(d, dsa_w[l]) + dsa_b[l]
        d = layernorm(d + sa, d_ln1g[l], d_ln1b[l])
        # cross-attention: precomputed slice of ca_all
        ca = ca_all[:, l * latent_dim:(l + 1) * latent_dim]
        d = layernorm(d + ca, d_ln2g[l], d_ln2b[l])
        # feed-forward
        ff = jnp.maximum(mm(d, d_w1[l]) + d_b1[l], 0.0)
        ff = mm_t(ff, d_w2t[l]) + d_b2[l]
        d = layernorm(d + ff, d_ln3g[l], d_ln3b[l])

    xr = mm(d, out_w[...]) + out_b[...]

    # single lane-dense output store: [x_recon | mu | logvar]
    out_ref[...] = jnp.concatenate([xr, mv], axis=-1)


# ------------------------------ JAX wrapper ----------------------------------

def vae_forward(params, x, eps):
    """x: (B, feature_size) f32, eps: (B, latent_dim) f32."""
    B, F = x.shape
    L = eps.shape[1]
    e, d = params["enc"], params["dec"]
    n_enc = e["attn_w"].shape[0]
    n_dec = d["sa_w"].shape[0]

    # pad batch to a multiple of 8 sublanes
    Bp = ((B + 7) // 8) * 8
    if Bp != B:
        x = jnp.pad(x, ((0, Bp - B), (0, 0)))
        eps = jnp.pad(eps, ((0, Bp - B), (0, 0)))

    kernel = functools.partial(_vae_kernel, n_enc=n_enc, n_dec=n_dec,
                               latent_dim=L)
    out = pl.pallas_call(
        kernel,
        out_shape=jax.ShapeDtypeStruct((Bp, F + 2 * L), jnp.float32),
        compiler_params=pltpu.CompilerParams(
            vmem_limit_bytes=32 * 1024 * 1024),
    )(
        x, eps,
        e["attn_w"], e["attn_b"], e["ln1_g"], e["ln1_b"],
        e["w1"], e["b1"], e["w2t"], e["b2"], e["ln2_g"], e["ln2_b"],
        params["muvar_w"], params["muvar_b"],
        d["sa_w"], d["sa_b"], d["ln1_g"], d["ln1_b"],
        d["ca_w"], d["ca_b"], d["ln2_g"], d["ln2_b"],
        d["w1"], d["b1"], d["w2t"], d["b2"], d["ln3_g"], d["ln3_b"],
        params["out_w"], params["out_b"],
    )
    out = out[:B]
    return out[:, :F], out[:, F:F + L], out[:, F + L:]


# --------------------------- pure-JAX reference ------------------------------
# Same bf16-operand / f32-accumulate matmul semantics as the kernel, so the
# comparison isolates kernel-structure correctness (not bf16 quantization).

def vae_forward_ref(params, x, eps):
    bf16, f32 = jnp.bfloat16, jnp.float32

    def mm(a, w):
        return jnp.dot(a.astype(bf16), w, preferred_element_type=f32)

    def mm_t(a, wt):
        return jax.lax.dot_general(a.astype(bf16), wt,
                                   (((1,), (1,)), ((), ())),
                                   preferred_element_type=f32)

    def layernorm(h, g, b):
        mean = jnp.mean(h, axis=-1, keepdims=True)
        c = h - mean
        var = jnp.mean(c * c, axis=-1, keepdims=True)
        return c * jax.lax.rsqrt(var + 1e-5) * g + b

    e, d = params["enc"], params["dec"]
    L = eps.shape[1]
    h = x
    for l in range(e["attn_w"].shape[0]):
        h = layernorm(h + mm(h, e["attn_w"][l]) + e["attn_b"][l],
                      e["ln1_g"][l], e["ln1_b"][l])
        ff = mm_t(jnp.maximum(mm(h, e["w1"][l]) + e["b1"][l], 0.0),
                  e["w2t"][l]) + e["b2"][l]
        h = layernorm(h + ff, e["ln2_g"][l], e["ln2_b"][l])
    mv = mm(h, params["muvar_w"]) + params["muvar_b"]
    mu, lv = mv[:, :L], mv[:, L:]
    z = mu + eps * jnp.exp(0.5 * jnp.clip(lv, -20.0, 20.0))
    ca_all = mm(z, d["ca_w"]) + d["ca_b"]
    t = z
    for l in range(d["sa_w"].shape[0]):
        t = layernorm(t + mm(t, d["sa_w"][l]) + d["sa_b"][l],
                      d["ln1_g"][l], d["ln1_b"][l])
        t = layernorm(t + ca_all[:, l * L:(l + 1) * L],
                      d["ln2_g"][l], d["ln2_b"][l])
        ff = mm_t(jnp.maximum(mm(t, d["w1"][l]) + d["b1"][l], 0.0),
                  d["w2t"][l]) + d["b2"][l]
        t = layernorm(t + ff, d["ln3_g"][l], d["ln3_b"][l])
    xr = mm(t, params["out_w"]) + params["out_b"]
    return xr, mu, lv


# ----------------------------- parameter init --------------------------------

def init_params(key, feature_size, latent_dim, dff=2048,
                num_encoder_layers=3, num_decoder_layers=3):
    keys = iter(jax.random.split(key, 512))
    bf16, f32 = jnp.bfloat16, jnp.float32

    def dense(d_in, d_out, scale=0.05):
        w = scale * jax.random.normal(next(keys), (d_in, d_out), f32)
        b = 0.01 * jax.random.normal(next(keys), (d_out,), f32)
        return w, b

    def fused_attn(dm):
        # out_proj(v_proj(x)) == x @ (Wv @ Wo) + (bv @ Wo + bo)
        wv, bv = dense(dm, dm)
        wo, bo = dense(dm, dm)
        return wv @ wo, bv @ wo + bo

    def enc_layer(dm):
        aw, ab = fused_attn(dm)
        w1, b1 = dense(dm, dff)
        w2, b2 = dense(dff, dm)
        return dict(
            attn_w=aw.astype(bf16), attn_b=ab.reshape(1, dm),
            ln1_g=jnp.ones((1, dm), f32), ln1_b=jnp.zeros((1, dm), f32),
            w1=w1.astype(bf16), b1=b1.reshape(1, dff),
            w2t=w2.T.astype(bf16),             # lane-dense: (dm, dff)
            b2=b2.reshape(1, dm),
            ln2_g=jnp.ones((1, dm), f32), ln2_b=jnp.zeros((1, dm), f32))

    def dec_layer(dm):
        saw, sab = fused_attn(dm)
        caw, cab = fused_attn(dm)
        w1, b1 = dense(dm, dff)
        w2, b2 = dense(dff, dm)
        return dict(
            sa_w=saw.astype(bf16), sa_b=sab.reshape(1, dm),
            ln1_g=jnp.ones((1, dm), f32), ln1_b=jnp.zeros((1, dm), f32),
            ca_w=caw, ca_b=cab,                # merged across layers below
            ln2_g=jnp.ones((1, dm), f32), ln2_b=jnp.zeros((1, dm), f32),
            w1=w1.astype(bf16), b1=b1.reshape(1, dff),
            w2t=w2.T.astype(bf16),             # lane-dense: (dm, dff)
            b2=b2.reshape(1, dm),
            ln3_g=jnp.ones((1, dm), f32), ln3_b=jnp.zeros((1, dm), f32))

    def stack(layers, exclude=()):
        return {k: jnp.stack([lyr[k] for lyr in layers])
                for k in layers[0] if k not in exclude}

    enc_layers = [enc_layer(feature_size) for _ in range(num_encoder_layers)]
    dec_layers = [dec_layer(latent_dim) for _ in range(num_decoder_layers)]

    enc = stack(enc_layers)
    dec = stack(dec_layers, exclude=("ca_w", "ca_b"))
    # all decoder cross-attn projections merged into one (L, n_dec*L) matmul
    dec["ca_w"] = jnp.concatenate(
        [lyr["ca_w"] for lyr in dec_layers], axis=1).astype(bf16)
    dec["ca_b"] = jnp.concatenate(
        [lyr["ca_b"] for lyr in dec_layers]).reshape(1, num_decoder_layers * latent_dim)

    w_mu, b_mu = dense(feature_size, latent_dim)
    w_lv, b_lv = dense(feature_size, latent_dim)
    out_w, out_b = dense(latent_dim, feature_size)

    return dict(
        enc=enc, dec=dec,
        # mu/logvar heads merged along N: one (F, 2L) matmul, split in wrapper
        muvar_w=jnp.concatenate([w_mu, w_lv], axis=1).astype(bf16),
        muvar_b=jnp.concatenate([b_mu, b_lv]).reshape(1, 2 * latent_dim),
        out_w=out_w.astype(bf16),
        out_b=out_b.reshape(1, feature_size),
    )


# --------------------------------- main --------------------------------------

if __name__ == "__main__":
    # feature_size=32, latent_dim=8, nhead=4  (latent_dim % nhead == 0)
    B, FEATURE_SIZE, LATENT_DIM = 8, 32, 8

    key = jax.random.PRNGKey(0)
    kp, kx, ke = jax.random.split(key, 3)

    params = init_params(kp, FEATURE_SIZE, LATENT_DIM)
    x = jax.random.normal(kx, (B, FEATURE_SIZE), jnp.float32)
    eps = jax.random.normal(ke, (B, LATENT_DIM), jnp.float32)

    fwd = jax.jit(vae_forward)
    x_recon, z_mu, z_logvar = fwd(params, x, eps)
    jax.block_until_ready((x_recon, z_mu, z_logvar))

    assert x_recon.shape == (B, FEATURE_SIZE)
    assert z_mu.shape == (B, LATENT_DIM)
    assert z_logvar.shape == (B, LATENT_DIM)
    assert bool(jnp.all(jnp.isfinite(x_recon)))

    # correctness vs pure-JAX reference with identical bf16/f32 matmul semantics
    xr_r, mu_r, lv_r = vae_forward_ref(params, x, eps)
    assert bool(jnp.allclose(x_recon, xr_r, atol=2e-2, rtol=2e-2))
    assert bool(jnp.allclose(z_mu, mu_r, atol=2e-2, rtol=2e-2))
    assert bool(jnp.allclose(z_logvar, lv_r, atol=2e-2, rtol=2e-2))

    print("KERNEL_OK")
</pallas_src>

<mosaic_0001>
module attributes {stable_mosaic.version = 11 : i64} {
  func.func @_vae_kernel(%arg0: memref<8x32xf32, #tpu.memory_space<vmem>>, %arg1: memref<8x8xf32, #tpu.memory_space<vmem>>, %arg2: memref<3x32x32xbf16, #tpu.memory_space<vmem>>, %arg3: memref<3x1x32xf32, #tpu.memory_space<vmem>>, %arg4: memref<3x1x32xf32, #tpu.memory_space<vmem>>, %arg5: memref<3x1x32xf32, #tpu.memory_space<vmem>>, %arg6: memref<3x32x2048xbf16, #tpu.memory_space<vmem>>, %arg7: memref<3x1x2048xf32, #tpu.memory_space<vmem>>, %arg8: memref<3x32x2048xbf16, #tpu.memory_space<vmem>>, %arg9: memref<3x1x32xf32, #tpu.memory_space<vmem>>, %arg10: memref<3x1x32xf32, #tpu.memory_space<vmem>>, %arg11: memref<3x1x32xf32, #tpu.memory_space<vmem>>, %arg12: memref<32x16xbf16, #tpu.memory_space<vmem>>, %arg13: memref<1x16xf32, #tpu.memory_space<vmem>>, %arg14: memref<3x8x8xbf16, #tpu.memory_space<vmem>>, %arg15: memref<3x1x8xf32, #tpu.memory_space<vmem>>, %arg16: memref<3x1x8xf32, #tpu.memory_space<vmem>>, %arg17: memref<3x1x8xf32, #tpu.memory_space<vmem>>, %arg18: memref<8x24xbf16, #tpu.memory_space<vmem>>, %arg19: memref<1x24xf32, #tpu.memory_space<vmem>>, %arg20: memref<3x1x8xf32, #tpu.memory_space<vmem>>, %arg21: memref<3x1x8xf32, #tpu.memory_space<vmem>>, %arg22: memref<3x8x2048xbf16, #tpu.memory_space<vmem>>, %arg23: memref<3x1x2048xf32, #tpu.memory_space<vmem>>, %arg24: memref<3x8x2048xbf16, #tpu.memory_space<vmem>>, %arg25: memref<3x1x8xf32, #tpu.memory_space<vmem>>, %arg26: memref<3x1x8xf32, #tpu.memory_space<vmem>>, %arg27: memref<3x1x8xf32, #tpu.memory_space<vmem>>, %arg28: memref<8x32xbf16, #tpu.memory_space<vmem>>, %arg29: memref<1x32xf32, #tpu.memory_space<vmem>>, %arg30: memref<8x48xf32, #tpu.memory_space<vmem>>) attributes {dimension_semantics = [], scalar_prefetch = 0 : i64, scratch_operands = 0 : i64, tpu.core_type = #tpu.core_type<tc>} {
    %c0 = arith.constant 0 : index
    %c0_0 = arith.constant 0 : index
    %0 = vector.load %arg0[%c0, %c0_0] : memref<8x32xf32, #tpu.memory_space<vmem>>, vector<8x32xf32>
    %c0_1 = arith.constant 0 : index
    %c0_2 = arith.constant 0 : index
    %c0_3 = arith.constant 0 : index
    %1 = vector.load %arg2[%c0_1, %c0_2, %c0_3] : memref<3x32x32xbf16, #tpu.memory_space<vmem>>, vector<1x32x32xbf16>
    %2 = vector.shape_cast %1 : vector<1x32x32xbf16> to vector<32x32xbf16>
    %3 = arith.truncf %0 : vector<8x32xf32> to vector<8x32xbf16>
    %cst = arith.constant dense<0.000000e+00> : vector<8x32xf32>
    %4 = tpu.matmul %3, %2, %cst {dimension_numbers = #tpu.dot_dimension_numbers<[1], [0], [0], [1], [0, 0, 1, 1], [], []>} : vector<8x32xbf16>, vector<32x32xbf16>, vector<8x32xf32> -> vector<8x32xf32>
    %c0_4 = arith.constant 0 : index
    %c0_5 = arith.constant 0 : index
    %c0_6 = arith.constant 0 : index
    %5 = vector.load %arg3[%c0_4, %c0_5, %c0_6] : memref<3x1x32xf32, #tpu.memory_space<vmem>>, vector<1x1x32xf32>
    %6 = vector.shape_cast %5 : vector<1x1x32xf32> to vector<1x32xf32>
    %7 = vector.broadcast %6 : vector<1x32xf32> to vector<8x32xf32>
    %8 = arith.addf %4, %7 : vector<8x32xf32>
    %9 = arith.addf %0, %8 : vector<8x32xf32>
    %c0_7 = arith.constant 0 : index
    %c0_8 = arith.constant 0 : index
    %c0_9 = arith.constant 0 : index
    %10 = vector.load %arg4[%c0_7, %c0_8, %c0_9] : memref<3x1x32xf32, #tpu.memory_space<vmem>>, vector<1x1x32xf32>
    %11 = vector.shape_cast %10 : vector<1x1x32xf32> to vector<1x32xf32>
    %c0_10 = arith.constant 0 : index
    %c0_11 = arith.constant 0 : index
    %c0_12 = arith.constant 0 : index
    %12 = vector.load %arg5[%c0_10, %c0_11, %c0_12] : memref<3x1x32xf32, #tpu.memory_space<vmem>>, vector<1x1x32xf32>
    %13 = vector.shape_cast %12 : vector<1x1x32xf32> to vector<1x32xf32>
    %cst_13 = arith.constant dense<0.000000e+00> : vector<8xf32>
    %14 = vector.multi_reduction <add>, %9, %cst_13 [1] : vector<8x32xf32> to vector<8xf32>
    %15 = vector.shape_cast %14 : vector<8xf32> to vector<8x1xf32>
    %cst_14 = arith.constant 3.200000e+01 : f32
    %16 = vector.broadcast %cst_14 : f32 to vector<8x1xf32>
    %17 = arith.divf %15, %16 : vector<8x1xf32>
    %18 = vector.broadcast %17 : vector<8x1xf32> to vector<8x32xf32>
    %19 = arith.subf %9, %18 : vector<8x32xf32>
    %20 = arith.mulf %19, %19 : vector<8x32xf32>
    %cst_15 = arith.constant dense<0.000000e+00> : vector<8xf32>
    %21 = vector.multi_reduction <add>, %20, %cst_15 [1] : vector<8x32xf32> to vector<8xf32>
    %22 = vector.shape_cast %21 : vector<8xf32> to vector<8x1xf32>
    %cst_16 = arith.constant 3.200000e+01 : f32
    %23 = vector.broadcast %cst_16 : f32 to vector<8x1xf32>
    %24 = arith.divf %22, %23 : vector<8x1xf32>
    %cst_17 = arith.constant 9.99999974E-6 : f32
    %25 = vector.broadcast %cst_17 : f32 to vector<8x1xf32>
    %26 = arith.addf %24, %25 : vector<8x1xf32>
    %27 = math.rsqrt %26 : vector<8x1xf32>
    %28 = vector.broadcast %27 : vector<8x1xf32> to vector<8x32xf32>
    %29 = arith.mulf %19, %28 : vector<8x32xf32>
    %30 = vector.broadcast %11 : vector<1x32xf32> to vector<8x32xf32>
    %31 = arith.mulf %29, %30 : vector<8x32xf32>
    %32 = vector.broadcast %13 : vector<1x32xf32> to vector<8x32xf32>
    %33 = arith.addf %31, %32 : vector<8x32xf32>
    %c0_18 = arith.constant 0 : index
    %c0_19 = arith.constant 0 : index
    %c0_20 = arith.constant 0 : index
    %34 = vector.load %arg6[%c0_18, %c0_19, %c0_20] : memref<3x32x2048xbf16, #tpu.memory_space<vmem>>, vector<1x32x2048xbf16>
    %35 = vector.shape_cast %34 : vector<1x32x2048xbf16> to vector<32x2048xbf16>
    %36 = arith.truncf %33 : vector<8x32xf32> to vector<8x32xbf16>
    %cst_21 = arith.constant dense<0.000000e+00> : vector<8x2048xf32>
    %37 = tpu.matmul %36, %35, %cst_21 {dimension_numbers = #tpu.dot_dimension_numbers<[1], [0], [0], [1], [0, 0, 1, 1], [], []>} : vector<8x32xbf16>, vector<32x2048xbf16>, vector<8x2048xf32> -> vector<8x2048xf32>
    %c0_22 = arith.constant 0 : index
    %c0_23 = arith.constant 0 : index
    %c0_24 = arith.constant 0 : index
    %38 = vector.load %arg7[%c0_22, %c0_23, %c0_24] : memref<3x1x2048xf32, #tpu.memory_space<vmem>>, vector<1x1x2048xf32>
    %39 = vector.shape_cast %38 : vector<1x1x2048xf32> to vector<1x2048xf32>
    %40 = vector.broadcast %39 : vector<1x2048xf32> to vector<8x2048xf32>
    %41 = arith.addf %37, %40 : vector<8x2048xf32>
    %cst_25 = arith.constant 0.000000e+00 : f32
    %42 = vector.broadcast %cst_25 : f32 to vector<8x2048xf32>
    %43 = arith.maximumf %41, %42 : vector<8x2048xf32>
    %c0_26 = arith.constant 0 : index
    %c0_27 = arith.constant 0 : index
    %c0_28 = arith.constant 0 : index
    %44 = vector.load %arg8[%c0_26, %c0_27, %c0_28] : memref<3x32x2048xbf16, #tpu.memory_space<vmem>>, vector<1x32x2048xbf16>
    %45 = vector.shape_cast %44 : vector<1x32x2048xbf16> to vector<32x2048xbf16>
    %46 = arith.truncf %43 : vector<8x2048xf32> to vector<8x2048xbf16>
    %cst_29 = arith.constant dense<0.000000e+00> : vector<8x32xf32>
    %47 = tpu.matmul %46, %45, %cst_29 {dimension_numbers = #tpu.dot_dimension_numbers<[1], [1], [0], [0], [0, 0, 1, 0], [], []>} : vector<8x2048xbf16>, vector<32x2048xbf16>, vector<8x32xf32> -> vector<8x32xf32>
    %c0_30 = arith.constant 0 : index
    %c0_31 = arith.constant 0 : index
    %c0_32 = arith.constant 0 : index
    %48 = vector.load %arg9[%c0_30, %c0_31, %c0_32] : memref<3x1x32xf32, #tpu.memory_space<vmem>>, vector<1x1x32xf32>
    %49 = vector.shape_cast %48 : vector<1x1x32xf32> to vector<1x32xf32>
    %50 = vector.broadcast %49 : vector<1x32xf32> to vector<8x32xf32>
    %51 = arith.addf %47, %50 : vector<8x32xf32>
    %52 = arith.addf %33, %51 : vector<8x32xf32>
    %c0_33 = arith.constant 0 : index
    %c0_34 = arith.constant 0 : index
    %c0_35 = arith.constant 0 : index
    %53 = vector.load %arg10[%c0_33, %c0_34, %c0_35] : memref<3x1x32xf32, #tpu.memory_space<vmem>>, vector<1x1x32xf32>
    %54 = vector.shape_cast %53 : vector<1x1x32xf32> to vector<1x32xf32>
    %c0_36 = arith.constant 0 : index
    %c0_37 = arith.constant 0 : index
    %c0_38 = arith.constant 0 : index
    %55 = vector.load %arg11[%c0_36, %c0_37, %c0_38] : memref<3x1x32xf32, #tpu.memory_space<vmem>>, vector<1x1x32xf32>
    %56 = vector.shape_cast %55 : vector<1x1x32xf32> to vector<1x32xf32>
    %cst_39 = arith.constant dense<0.000000e+00> : vector<8xf32>
    %57 = vector.multi_reduction <add>, %52, %cst_39 [1] : vector<8x32xf32> to vector<8xf32>
    %58 = vector.shape_cast %57 : vector<8xf32> to vector<8x1xf32>
    %cst_40 = arith.constant 3.200000e+01 : f32
    %59 = vector.broadcast %cst_40 : f32 to vector<8x1xf32>
    %60 = arith.divf %58, %59 : vector<8x1xf32>
    %61 = vector.broadcast %60 : vector<8x1xf32> to vector<8x32xf32>
    %62 = arith.subf %52, %61 : vector<8x32xf32>
    %63 = arith.mulf %62, %62 : vector<8x32xf32>
    %cst_41 = arith.constant dense<0.000000e+00> : vector<8xf32>
    %64 = vector.multi_reduction <add>, %63, %cst_41 [1] : vector<8x32xf32> to vector<8xf32>
    %65 = vector.shape_cast %64 : vector<8xf32> to vector<8x1xf32>
    %cst_42 = arith.constant 3.200000e+01 : f32
    %66 = vector.broadcast %cst_42 : f32 to vector<8x1xf32>
    %67 = arith.divf %65, %66 : vector<8x1xf32>
    %cst_43 = arith.constant 9.99999974E-6 : f32
    %68 = vector.broadcast %cst_43 : f32 to vector<8x1xf32>
    %69 = arith.addf %67, %68 : vector<8x1xf32>
    %70 = math.rsqrt %69 : vector<8x1xf32>
    %71 = vector.broadcast %70 : vector<8x1xf32> to vector<8x32xf32>
    %72 = arith.mulf %62, %71 : vector<8x32xf32>
    %73 = vector.broadcast %54 : vector<1x32xf32> to vector<8x32xf32>
    %74 = arith.mulf %72, %73 : vector<8x32xf32>
    %75 = vector.broadcast %56 : vector<1x32xf32> to vector<8x32xf32>
    %76 = arith.addf %74, %75 : vector<8x32xf32>
    %c1 = arith.constant 1 : index
    %c0_44 = arith.constant 0 : index
    %c0_45 = arith.constant 0 : index
    %77 = vector.load %arg2[%c1, %c0_44, %c0_45] : memref<3x32x32xbf16, #tpu.memory_space<vmem>>, vector<1x32x32xbf16>
    %78 = vector.shape_cast %77 : vector<1x32x32xbf16> to vector<32x32xbf16>
    %79 = arith.truncf %76 : vector<8x32xf32> to vector<8x32xbf16>
    %cst_46 = arith.constant dense<0.000000e+00> : vector<8x32xf32>
    %80 = tpu.matmul %79, %78, %cst_46 {dimension_numbers = #tpu.dot_dimension_numbers<[1], [0], [0], [1], [0, 0, 1, 1], [], []>} : vector<8x32xbf16>, vector<32x32xbf16>, vector<8x32xf32> -> vector<8x32xf32>
    %c1_47 = arith.constant 1 : index
    %c0_48 = arith.constant 0 : index
    %c0_49 = arith.constant 0 : index
    %81 = vector.load %arg3[%c1_47, %c0_48, %c0_49] : memref<3x1x32xf32, #tpu.memory_space<vmem>>, vector<1x1x32xf32>
    %82 = vector.shape_cast %81 : vector<1x1x32xf32> to vector<1x32xf32>
    %83 = vector.broadcast %82 : vector<1x32xf32> to vector<8x32xf32>
    %84 = arith.addf %80, %83 : vector<8x32xf32>
    %85 = arith.addf %76, %84 : vector<8x32xf32>
    %c1_50 = arith.constant 1 : index
    %c0_51 = arith.constant 0 : index
    %c0_52 = arith.constant 0 : index
    %86 = vector.load %arg4[%c1_50, %c0_51, %c0_52] : memref<3x1x32xf32, #tpu.memory_space<vmem>>, vector<1x1x32xf32>
    %87 = vector.shape_cast %86 : vector<1x1x32xf32> to vector<1x32xf32>
    %c1_53 = arith.constant 1 : index
    %c0_54 = arith.constant 0 : index
    %c0_55 = arith.constant 0 : index
    %88 = vector.load %arg5[%c1_53, %c0_54, %c0_55] : memref<3x1x32xf32, #tpu.memory_space<vmem>>, vector<1x1x32xf32>
    %89 = vector.shape_cast %88 : vector<1x1x32xf32> to vector<1x32xf32>
    %cst_56 = arith.constant dense<0.000000e+00> : vector<8xf32>
    %90 = vector.multi_reduction <add>, %85, %cst_56 [1] : vector<8x32xf32> to vector<8xf32>
    %91 = vector.shape_cast %90 : vector<8xf32> to vector<8x1xf32>
    %cst_57 = arith.constant 3.200000e+01 : f32
    %92 = vector.broadcast %cst_57 : f32 to vector<8x1xf32>
    %93 = arith.divf %91, %92 : vector<8x1xf32>
    %94 = vector.broadcast %93 : vector<8x1xf32> to vector<8x32xf32>
    %95 = arith.subf %85, %94 : vector<8x32xf32>
    %96 = arith.mulf %95, %95 : vector<8x32xf32>
    %cst_58 = arith.constant dense<0.000000e+00> : vector<8xf32>
    %97 = vector.multi_reduction <add>, %96, %cst_58 [1] : vector<8x32xf32> to vector<8xf32>
    %98 = vector.shape_cast %97 : vector<8xf32> to vector<8x1xf32>
    %cst_59 = arith.constant 3.200000e+01 : f32
    %99 = vector.broadcast %cst_59 : f32 to vector<8x1xf32>
    %100 = arith.divf %98, %99 : vector<8x1xf32>
    %cst_60 = arith.constant 9.99999974E-6 : f32
    %101 = vector.broadcast %cst_60 : f32 to vector<8x1xf32>
    %102 = arith.addf %100, %101 : vector<8x1xf32>
    %103 = math.rsqrt %102 : vector<8x1xf32>
    %104 = vector.broadcast %103 : vector<8x1xf32> to vector<8x32xf32>
    %105 = arith.mulf %95, %104 : vector<8x32xf32>
    %106 = vector.broadcast %87 : vector<1x32xf32> to vector<8x32xf32>
    %107 = arith.mulf %105, %106 : vector<8x32xf32>
    %108 = vector.broadcast %89 : vector<1x32xf32> to vector<8x32xf32>
    %109 = arith.addf %107, %108 : vector<8x32xf32>
    %c1_61 = arith.constant 1 : index
    %c0_62 = arith.constant 0 : index
    %c0_63 = arith.constant 0 : index
    %110 = vector.load %arg6[%c1_61, %c0_62, %c0_63] : memref<3x32x2048xbf16, #tpu.memory_space<vmem>>, vector<1x32x2048xbf16>
    %111 = vector.shape_cast %110 : vector<1x32x2048xbf16> to vector<32x2048xbf16>
    %112 = arith.truncf %109 : vector<8x32xf32> to vector<8x32xbf16>
    %cst_64 = arith.constant dense<0.000000e+00> : vector<8x2048xf32>
    %113 = tpu.matmul %112, %111, %cst_64 {dimension_numbers = #tpu.dot_dimension_numbers<[1], [0], [0], [1], [0, 0, 1, 1], [], []>} : vector<8x32xbf16>, vector<32x2048xbf16>, vector<8x2048xf32> -> vector<8x2048xf32>
    %c1_65 = arith.constant 1 : index
    %c0_66 = arith.constant 0 : index
    %c0_67 = arith.constant 0 : index
    %114 = vector.load %arg7[%c1_65, %c0_66, %c0_67] : memref<3x1x2048xf32, #tpu.memory_space<vmem>>, vector<1x1x2048xf32>
    %115 = vector.shape_cast %114 : vector<1x1x2048xf32> to vector<1x2048xf32>
    %116 = vector.broadcast %115 : vector<1x2048xf32> to vector<8x2048xf32>
    %117 = arith.addf %113, %116 : vector<8x2048xf32>
    %cst_68 = arith.constant 0.000000e+00 : f32
    %118 = vector.broadcast %cst_68 : f32 to vector<8x2048xf32>
    %119 = arith.maximumf %117, %118 : vector<8x2048xf32>
    %c1_69 = arith.constant 1 : index
    %c0_70 = arith.constant 0 : index
    %c0_71 = arith.constant 0 : index
    %120 = vector.load %arg8[%c1_69, %c0_70, %c0_71] : memref<3x32x2048xbf16, #tpu.memory_space<vmem>>, vector<1x32x2048xbf16>
    %121 = vector.shape_cast %120 : vector<1x32x2048xbf16> to vector<32x2048xbf16>
    %122 = arith.truncf %119 : vector<8x2048xf32> to vector<8x2048xbf16>
    %cst_72 = arith.constant dense<0.000000e+00> : vector<8x32xf32>
    %123 = tpu.matmul %122, %121, %cst_72 {dimension_numbers = #tpu.dot_dimension_numbers<[1], [1], [0], [0], [0, 0, 1, 0], [], []>} : vector<8x2048xbf16>, vector<32x2048xbf16>, vector<8x32xf32> -> vector<8x32xf32>
    %c1_73 = arith.constant 1 : index
    %c0_74 = arith.constant 0 : index
    %c0_75 = arith.constant 0 : index
    %124 = vector.load %arg9[%c1_73, %c0_74, %c0_75] : memref<3x1x32xf32, #tpu.memory_space<vmem>>, vector<1x1x32xf32>
    %125 = vector.shape_cast %124 : vector<1x1x32xf32> to vector<1x32xf32>
    %126 = vector.broadcast %125 : vector<1x32xf32> to vector<8x32xf32>
    %127 = arith.addf %123, %126 : vector<8x32xf32>
    %128 = arith.addf %109, %127 : vector<8x32xf32>
    %c1_76 = arith.constant 1 : index
    %c0_77 = arith.constant 0 : index
    %c0_78 = arith.constant 0 : index
    %129 = vector.load %arg10[%c1_76, %c0_77, %c0_78] : memref<3x1x32xf32, #tpu.memory_space<vmem>>, vector<1x1x32xf32>
    %130 = vector.shape_cast %129 : vector<1x1x32xf32> to vector<1x32xf32>
    %c1_79 = arith.constant 1 : index
    %c0_80 = arith.constant 0 : index
    %c0_81 = arith.constant 0 : index
    %131 = vector.load %arg11[%c1_79, %c0_80, %c0_81] : memref<3x1x32xf32, #tpu.memory_space<vmem>>, vector<1x1x32xf32>
    %132 = vector.shape_cast %131 : vector<1x1x32xf32> to vector<1x32xf32>
    %cst_82 = arith.constant dense<0.000000e+00> : vector<8xf32>
    %133 = vector.multi_reduction <add>, %128, %cst_82 [1] : vector<8x32xf32> to vector<8xf32>
    %134 = vector.shape_cast %133 : vector<8xf32> to vector<8x1xf32>
    %cst_83 = arith.constant 3.200000e+01 : f32
    %135 = vector.broadcast %cst_83 : f32 to vector<8x1xf32>
    %136 = arith.divf %134, %135 : vector<8x1xf32>
    %137 = vector.broadcast %136 : vector<8x1xf32> to vector<8x32xf32>
    %138 = arith.subf %128, %137 : vector<8x32xf32>
    %139 = arith.mulf %138, %138 : vector<8x32xf32>
    %cst_84 = arith.constant dense<0.000000e+00> : vector<8xf32>
    %140 = vector.multi_reduction <add>, %139, %cst_84 [1] : vector<8x32xf32> to vector<8xf32>
    %141 = vector.shape_cast %140 : vector<8xf32> to vector<8x1xf32>
    %cst_85 = arith.constant 3.200000e+01 : f32
    %142 = vector.broadcast %cst_85 : f32 to vector<8x1xf32>
    %143 = arith.divf %141, %142 : vector<8x1xf32>
    %cst_86 = arith.constant 9.99999974E-6 : f32
    %144 = vector.broadcast %cst_86 : f32 to vector<8x1xf32>
    %145 = arith.addf %143, %144 : vector<8x1xf32>
    %146 = math.rsqrt %145 : vector<8x1xf32>
    %147 = vector.broadcast %146 : vector<8x1xf32> to vector<8x32xf32>
    %148 = arith.mulf %138, %147 : vector<8x32xf32>
    %149 = vector.broadcast %130 : vector<1x32xf32> to vector<8x32xf32>
    %150 = arith.mulf %148, %149 : vector<8x32xf32>
    %151 = vector.broadcast %132 : vector<1x32xf32> to vector<8x32xf32>
    %152 = arith.addf %150, %151 : vector<8x32xf32>
    %c2 = arith.constant 2 : index
    %c0_87 = arith.constant 0 : index
    %c0_88 = arith.constant 0 : index
    %153 = vector.load %arg2[%c2, %c0_87, %c0_88] : memref<3x32x32xbf16, #tpu.memory_space<vmem>>, vector<1x32x32xbf16>
    %154 = vector.shape_cast %153 : vector<1x32x32xbf16> to vector<32x32xbf16>
    %155 = arith.truncf %152 : vector<8x32xf32> to vector<8x32xbf16>
    %cst_89 = arith.constant dense<0.000000e+00> : vector<8x32xf32>
    %156 = tpu.matmul %155, %154, %cst_89 {dimension_numbers = #tpu.dot_dimension_numbers<[1], [0], [0], [1], [0, 0, 1, 1], [], []>} : vector<8x32xbf16>, vector<32x32xbf16>, vector<8x32xf32> -> vector<8x32xf32>
    %c2_90 = arith.constant 2 : index
    %c0_91 = arith.constant 0 : index
    %c0_92 = arith.constant 0 : index
    %157 = vector.load %arg3[%c2_90, %c0_91, %c0_92] : memref<3x1x32xf32, #tpu.memory_space<vmem>>, vector<1x1x32xf32>
    %158 = vector.shape_cast %157 : vector<1x1x32xf32> to vector<1x32xf32>
    %159 = vector.broadcast %158 : vector<1x32xf32> to vector<8x32xf32>
    %160 = arith.addf %156, %159 : vector<8x32xf32>
    %161 = arith.addf %152, %160 : vector<8x32xf32>
    %c2_93 = arith.constant 2 : index
    %c0_94 = arith.constant 0 : index
    %c0_95 = arith.constant 0 : index
    %162 = vector.load %arg4[%c2_93, %c0_94, %c0_95] : memref<3x1x32xf32, #tpu.memory_space<vmem>>, vector<1x1x32xf32>
    %163 = vector.shape_cast %162 : vector<1x1x32xf32> to vector<1x32xf32>
    %c2_96 = arith.constant 2 : index
    %c0_97 = arith.constant 0 : index
    %c0_98 = arith.constant 0 : index
    %164 = vector.load %arg5[%c2_96, %c0_97, %c0_98] : memref<3x1x32xf32, #tpu.memory_space<vmem>>, vector<1x1x32xf32>
    %165 = vector.shape_cast %164 : vector<1x1x32xf32> to vector<1x32xf32>
    %cst_99 = arith.constant dense<0.000000e+00> : vector<8xf32>
    %166 = vector.multi_reduction <add>, %161, %cst_99 [1] : vector<8x32xf32> to vector<8xf32>
    %167 = vector.shape_cast %166 : vector<8xf32> to vector<8x1xf32>
    %cst_100 = arith.constant 3.200000e+01 : f32
    %168 = vector.broadcast %cst_100 : f32 to vector<8x1xf32>
    %169 = arith.divf %167, %168 : vector<8x1xf32>
    %170 = vector.broadcast %169 : vector<8x1xf32> to vector<8x32xf32>
    %171 = arith.subf %161, %170 : vector<8x32xf32>
    %172 = arith.mulf %171, %171 : vector<8x32xf32>
    %cst_101 = arith.constant dense<0.000000e+00> : vector<8xf32>
    %173 = vector.multi_reduction <add>, %172, %cst_101 [1] : vector<8x32xf32> to vector<8xf32>
    %174 = vector.shape_cast %173 : vector<8xf32> to vector<8x1xf32>
    %cst_102 = arith.constant 3.200000e+01 : f32
    %175 = vector.broadcast %cst_102 : f32 to vector<8x1xf32>
    %176 = arith.divf %174, %175 : vector<8x1xf32>
    %cst_103 = arith.constant 9.99999974E-6 : f32
    %177 = vector.broadcast %cst_103 : f32 to vector<8x1xf32>
    %178 = arith.addf %176, %177 : vector<8x1xf32>
    %179 = math.rsqrt %178 : vector<8x1xf32>
    %180 = vector.broadcast %179 : vector<8x1xf32> to vector<8x32xf32>
    %181 = arith.mulf %171, %180 : vector<8x32xf32>
    %182 = vector.broadcast %163 : vector<1x32xf32> to vector<8x32xf32>
    %183 = arith.mulf %181, %182 : vector<8x32xf32>
    %184 = vector.broadcast %165 : vector<1x32xf32> to vector<8x32xf32>
    %185 = arith.addf %183, %184 : vector<8x32xf32>
    %c2_104 = arith.constant 2 : index
    %c0_105 = arith.constant 0 : index
    %c0_106 = arith.constant 0 : index
    %186 = vector.load %arg6[%c2_104, %c0_105, %c0_106] : memref<3x32x2048xbf16, #tpu.memory_space<vmem>>, vector<1x32x2048xbf16>
    %187 = vector.shape_cast %186 : vector<1x32x2048xbf16> to vector<32x2048xbf16>
    %188 = arith.truncf %185 : vector<8x32xf32> to vector<8x32xbf16>
    %cst_107 = arith.constant dense<0.000000e+00> : vector<8x2048xf32>
    %189 = tpu.matmul %188, %187, %cst_107 {dimension_numbers = #tpu.dot_dimension_numbers<[1], [0], [0], [1], [0, 0, 1, 1], [], []>} : vector<8x32xbf16>, vector<32x2048xbf16>, vector<8x2048xf32> -> vector<8x2048xf32>
    %c2_108 = arith.constant 2 : index
    %c0_109 = arith.constant 0 : index
    %c0_110 = arith.constant 0 : index
    %190 = vector.load %arg7[%c2_108, %c0_109, %c0_110] : memref<3x1x2048xf32, #tpu.memory_space<vmem>>, vector<1x1x2048xf32>
    %191 = vector.shape_cast %190 : vector<1x1x2048xf32> to vector<1x2048xf32>
    %192 = vector.broadcast %191 : vector<1x2048xf32> to vector<8x2048xf32>
    %193 = arith.addf %189, %192 : vector<8x2048xf32>
    %cst_111 = arith.constant 0.000000e+00 : f32
    %194 = vector.broadcast %cst_111 : f32 to vector<8x2048xf32>
    %195 = arith.maximumf %193, %194 : vector<8x2048xf32>
    %c2_112 = arith.constant 2 : index
    %c0_113 = arith.constant 0 : index
    %c0_114 = arith.constant 0 : index
    %196 = vector.load %arg8[%c2_112, %c0_113, %c0_114] : memref<3x32x2048xbf16, #tpu.memory_space<vmem>>, vector<1x32x2048xbf16>
    %197 = vector.shape_cast %196 : vector<1x32x2048xbf16> to vector<32x2048xbf16>
    %198 = arith.truncf %195 : vector<8x2048xf32> to vector<8x2048xbf16>
    %cst_115 = arith.constant dense<0.000000e+00> : vector<8x32xf32>
    %199 = tpu.matmul %198, %197, %cst_115 {dimension_numbers = #tpu.dot_dimension_numbers<[1], [1], [0], [0], [0, 0, 1, 0], [], []>} : vector<8x2048xbf16>, vector<32x2048xbf16>, vector<8x32xf32> -> vector<8x32xf32>
    %c2_116 = arith.constant 2 : index
    %c0_117 = arith.constant 0 : index
    %c0_118 = arith.constant 0 : index
    %200 = vector.load %arg9[%c2_116, %c0_117, %c0_118] : memref<3x1x32xf32, #tpu.memory_space<vmem>>, vector<1x1x32xf32>
    %201 = vector.shape_cast %200 : vector<1x1x32xf32> to vector<1x32xf32>
    %202 = vector.broadcast %201 : vector<1x32xf32> to vector<8x32xf32>
    %203 = arith.addf %199, %202 : vector<8x32xf32>
    %204 = arith.addf %185, %203 : vector<8x32xf32>
    %c2_119 = arith.constant 2 : index
    %c0_120 = arith.constant 0 : index
    %c0_121 = arith.constant 0 : index
    %205 = vector.load %arg10[%c2_119, %c0_120, %c0_121] : memref<3x1x32xf32, #tpu.memory_space<vmem>>, vector<1x1x32xf32>
    %206 = vector.shape_cast %205 : vector<1x1x32xf32> to vector<1x32xf32>
    %c2_122 = arith.constant 2 : index
    %c0_123 = arith.constant 0 : index
    %c0_124 = arith.constant 0 : index
    %207 = vector.load %arg11[%c2_122, %c0_123, %c0_124] : memref<3x1x32xf32, #tpu.memory_space<vmem>>, vector<1x1x32xf32>
    %208 = vector.shape_cast %207 : vector<1x1x32xf32> to vector<1x32xf32>
    %cst_125 = arith.constant dense<0.000000e+00> : vector<8xf32>
    %209 = vector.multi_reduction <add>, %204, %cst_125 [1] : vector<8x32xf32> to vector<8xf32>
    %210 = vector.shape_cast %209 : vector<8xf32> to vector<8x1xf32>
    %cst_126 = arith.constant 3.200000e+01 : f32
    %211 = vector.broadcast %cst_126 : f32 to vector<8x1xf32>
    %212 = arith.divf %210, %211 : vector<8x1xf32>
    %213 = vector.broadcast %212 : vector<8x1xf32> to vector<8x32xf32>
    %214 = arith.subf %204, %213 : vector<8x32xf32>
    %215 = arith.mulf %214, %214 : vector<8x32xf32>
    %cst_127 = arith.constant dense<0.000000e+00> : vector<8xf32>
    %216 = vector.multi_reduction <add>, %215, %cst_127 [1] : vector<8x32xf32> to vector<8xf32>
    %217 = vector.shape_cast %216 : vector<8xf32> to vector<8x1xf32>
    %cst_128 = arith.constant 3.200000e+01 : f32
    %218 = vector.broadcast %cst_128 : f32 to vector<8x1xf32>
    %219 = arith.divf %217, %218 : vector<8x1xf32>
    %cst_129 = arith.constant 9.99999974E-6 : f32
    %220 = vector.broadcast %cst_129 : f32 to vector<8x1xf32>
    %221 = arith.addf %219, %220 : vector<8x1xf32>
    %222 = math.rsqrt %221 : vector<8x1xf32>
    %223 = vector.broadcast %222 : vector<8x1xf32> to vector<8x32xf32>
    %224 = arith.mulf %214, %223 : vector<8x32xf32>
    %225 = vector.broadcast %206 : vector<1x32xf32> to vector<8x32xf32>
    %226 = arith.mulf %224, %225 : vector<8x32xf32>
    %227 = vector.broadcast %208 : vector<1x32xf32> to vector<8x32xf32>
    %228 = arith.addf %226, %227 : vector<8x32xf32>
    %c0_130 = arith.constant 0 : index
    %c0_131 = arith.constant 0 : index
    %229 = vector.load %arg12[%c0_130, %c0_131] : memref<32x16xbf16, #tpu.memory_space<vmem>>, vector<32x16xbf16>
    %230 = arith.truncf %228 : vector<8x32xf32> to vector<8x32xbf16>
    %cst_132 = arith.constant dense<0.000000e+00> : vector<8x16xf32>
    %231 = tpu.matmul %230, %229, %cst_132 {dimension_numbers = #tpu.dot_dimension_numbers<[1], [0], [0], [1], [0, 0, 1, 1], [], []>} : vector<8x32xbf16>, vector<32x16xbf16>, vector<8x16xf32> -> vector<8x16xf32>
    %c0_133 = arith.constant 0 : index
    %c0_134 = arith.constant 0 : index
    %232 = vector.load %arg13[%c0_133, %c0_134] : memref<1x16xf32, #tpu.memory_space<vmem>>, vector<1x16xf32>
    %233 = vector.broadcast %232 : vector<1x16xf32> to vector<8x16xf32>
    %234 = arith.addf %231, %233 : vector<8x16xf32>
    %235 = vector.extract_strided_slice %234 {offsets = [0, 0], sizes = [8, 8], strides = [1, 1]} : vector<8x16xf32> to vector<8x8xf32>
    %236 = vector.extract_strided_slice %234 {offsets = [0, 8], sizes = [8, 8], strides = [1, 1]} : vector<8x16xf32> to vector<8x8xf32>
    %cst_135 = arith.constant -2.000000e+01 : f32
    %cst_136 = arith.constant 2.000000e+01 : f32
    %237 = vector.broadcast %cst_135 : f32 to vector<8x8xf32>
    %238 = arith.maximumf %237, %236 : vector<8x8xf32>
    %239 = vector.broadcast %cst_136 : f32 to vector<8x8xf32>
    %240 = arith.minimumf %239, %238 : vector<8x8xf32>
    %c0_137 = arith.constant 0 : index
    %c0_138 = arith.constant 0 : index
    %241 = vector.load %arg1[%c0_137, %c0_138] : memref<8x8xf32, #tpu.memory_space<vmem>>, vector<8x8xf32>
    %cst_139 = arith.constant 5.000000e-01 : f32
    %242 = vector.broadcast %cst_139 : f32 to vector<8x8xf32>
    %243 = arith.mulf %242, %240 : vector<8x8xf32>
    %244 = math.exp %243 : vector<8x8xf32>
    %245 = arith.mulf %241, %244 : vector<8x8xf32>
    %246 = arith.addf %235, %245 : vector<8x8xf32>
    %c0_140 = arith.constant 0 : index
    %c0_141 = arith.constant 0 : index
    %247 = vector.load %arg18[%c0_140, %c0_141] : memref<8x24xbf16, #tpu.memory_space<vmem>>, vector<8x24xbf16>
    %248 = arith.truncf %246 : vector<8x8xf32> to vector<8x8xbf16>
    %cst_142 = arith.constant dense<0.000000e+00> : vector<8x24xf32>
    %249 = tpu.matmul %248, %247, %cst_142 {dimension_numbers = #tpu.dot_dimension_numbers<[1], [0], [0], [1], [0, 0, 1, 1], [], []>} : vector<8x8xbf16>, vector<8x24xbf16>, vector<8x24xf32> -> vector<8x24xf32>
    %c0_143 = arith.constant 0 : index
    %c0_144 = arith.constant 0 : index
    %250 = vector.load %arg19[%c0_143, %c0_144] : memref<1x24xf32, #tpu.memory_space<vmem>>, vector<1x24xf32>
    %251 = vector.broadcast %250 : vector<1x24xf32> to vector<8x24xf32>
    %252 = arith.addf %249, %251 : vector<8x24xf32>
    %c0_145 = arith.constant 0 : index
    %c0_146 = arith.constant 0 : index
    %c0_147 = arith.constant 0 : index
    %253 = vector.load %arg14[%c0_145, %c0_146, %c0_147] : memref<3x8x8xbf16, #tpu.memory_space<vmem>>, vector<1x8x8xbf16>
    %254 = vector.shape_cast %253 : vector<1x8x8xbf16> to vector<8x8xbf16>
    %255 = arith.truncf %246 : vector<8x8xf32> to vector<8x8xbf16>
    %cst_148 = arith.constant dense<0.000000e+00> : vector<8x8xf32>
    %256 = tpu.matmul %255, %254, %cst_148 {dimension_numbers = #tpu.dot_dimension_numbers<[1], [0], [0], [1], [0, 0, 1, 1], [], []>} : vector<8x8xbf16>, vector<8x8xbf16>, vector<8x8xf32> -> vector<8x8xf32>
    %c0_149 = arith.constant 0 : index
    %c0_150 = arith.constant 0 : index
    %c0_151 = arith.constant 0 : index
    %257 = vector.load %arg15[%c0_149, %c0_150, %c0_151] : memref<3x1x8xf32, #tpu.memory_space<vmem>>, vector<1x1x8xf32>
    %258 = vector.shape_cast %257 : vector<1x1x8xf32> to vector<1x8xf32>
    %259 = vector.broadcast %258 : vector<1x8xf32> to vector<8x8xf32>
    %260 = arith.addf %256, %259 : vector<8x8xf32>
    %261 = arith.addf %246, %260 : vector<8x8xf32>
    %c0_152 = arith.constant 0 : index
    %c0_153 = arith.constant 0 : index
    %c0_154 = arith.constant 0 : index
    %262 = vector.load %arg16[%c0_152, %c0_153, %c0_154] : memref<3x1x8xf32, #tpu.memory_space<vmem>>, vector<1x1x8xf32>
    %263 = vector.shape_cast %262 : vector<1x1x8xf32> to vector<1x8xf32>
    %c0_155 = arith.constant 0 : index
    %c0_156 = arith.constant 0 : index
    %c0_157 = arith.constant 0 : index
    %264 = vector.load %arg17[%c0_155, %c0_156, %c0_157] : memref<3x1x8xf32, #tpu.memory_space<vmem>>, vector<1x1x8xf32>
    %265 = vector.shape_cast %264 : vector<1x1x8xf32> to vector<1x8xf32>
    %cst_158 = arith.constant dense<0.000000e+00> : vector<8xf32>
    %266 = vector.multi_reduction <add>, %261, %cst_158 [1] : vector<8x8xf32> to vector<8xf32>
    %267 = vector.shape_cast %266 : vector<8xf32> to vector<8x1xf32>
    %cst_159 = arith.constant 8.000000e+00 : f32
    %268 = vector.broadcast %cst_159 : f32 to vector<8x1xf32>
    %269 = arith.divf %267, %268 : vector<8x1xf32>
    %270 = vector.broadcast %269 : vector<8x1xf32> to vector<8x8xf32>
    %271 = arith.subf %261, %270 : vector<8x8xf32>
    %272 = arith.mulf %271, %271 : vector<8x8xf32>
    %cst_160 = arith.constant dense<0.000000e+00> : vector<8xf32>
    %273 = vector.multi_reduction <add>, %272, %cst_160 [1] : vector<8x8xf32> to vector<8xf32>
    %274 = vector.shape_cast %273 : vector<8xf32> to vector<8x1xf32>
    %cst_161 = arith.constant 8.000000e+00 : f32
    %275 = vector.broadcast %cst_161 : f32 to vector<8x1xf32>
    %276 = arith.divf %274, %275 : vector<8x1xf32>
    %cst_162 = arith.constant 9.99999974E-6 : f32
    %277 = vector.broadcast %cst_162 : f32 to vector<8x1xf32>
    %278 = arith.addf %276, %277 : vector<8x1xf32>
    %279 = math.rsqrt %278 : vector<8x1xf32>
    %280 = vector.broadcast %279 : vector<8x1xf32> to vector<8x8xf32>
    %281 = arith.mulf %271, %280 : vector<8x8xf32>
    %282 = vector.broadcast %263 : vector<1x8xf32> to vector<8x8xf32>
    %283 = arith.mulf %281, %282 : vector<8x8xf32>
    %284 = vector.broadcast %265 : vector<1x8xf32> to vector<8x8xf32>
    %285 = arith.addf %283, %284 : vector<8x8xf32>
    %286 = vector.extract_strided_slice %252 {offsets = [0, 0], sizes = [8, 8], strides = [1, 1]} : vector<8x24xf32> to vector<8x8xf32>
    %287 = arith.addf %285, %286 : vector<8x8xf32>
    %c0_163 = arith.constant 0 : index
    %c0_164 = arith.constant 0 : index
    %c0_165 = arith.constant 0 : index
    %288 = vector.load %arg20[%c0_163, %c0_164, %c0_165] : memref<3x1x8xf32, #tpu.memory_space<vmem>>, vector<1x1x8xf32>
    %289 = vector.shape_cast %288 : vector<1x1x8xf32> to vector<1x8xf32>
    %c0_166 = arith.constant 0 : index
    %c0_167 = arith.constant 0 : index
    %c0_168 = arith.constant 0 : index
    %290 = vector.load %arg21[%c0_166, %c0_167, %c0_168] : memref<3x1x8xf32, #tpu.memory_space<vmem>>, vector<1x1x8xf32>
    %291 = vector.shape_cast %290 : vector<1x1x8xf32> to vector<1x8xf32>
    %cst_169 = arith.constant dense<0.000000e+00> : vector<8xf32>
    %292 = vector.multi_reduction <add>, %287, %cst_169 [1] : vector<8x8xf32> to vector<8xf32>
    %293 = vector.shape_cast %292 : vector<8xf32> to vector<8x1xf32>
    %cst_170 = arith.constant 8.000000e+00 : f32
    %294 = vector.broadcast %cst_170 : f32 to vector<8x1xf32>
    %295 = arith.divf %293, %294 : vector<8x1xf32>
    %296 = vector.broadcast %295 : vector<8x1xf32> to vector<8x8xf32>
    %297 = arith.subf %287, %296 : vector<8x8xf32>
    %298 = arith.mulf %297, %297 : vector<8x8xf32>
    %cst_171 = arith.constant dense<0.000000e+00> : vector<8xf32>
    %299 = vector.multi_reduction <add>, %298, %cst_171 [1] : vector<8x8xf32> to vector<8xf32>
    %300 = vector.shape_cast %299 : vector<8xf32> to vector<8x1xf32>
    %cst_172 = arith.constant 8.000000e+00 : f32
    %301 = vector.broadcast %cst_172 : f32 to vector<8x1xf32>
    %302 = arith.divf %300, %301 : vector<8x1xf32>
    %cst_173 = arith.constant 9.99999974E-6 : f32
    %303 = vector.broadcast %cst_173 : f32 to vector<8x1xf32>
    %304 = arith.addf %302, %303 : vector<8x1xf32>
    %305 = math.rsqrt %304 : vector<8x1xf32>
    %306 = vector.broadcast %305 : vector<8x1xf32> to vector<8x8xf32>
    %307 = arith.mulf %297, %306 : vector<8x8xf32>
    %308 = vector.broadcast %289 : vector<1x8xf32> to vector<8x8xf32>
    %309 = arith.mulf %307, %308 : vector<8x8xf32>
    %310 = vector.broadcast %291 : vector<1x8xf32> to vector<8x8xf32>
    %311 = arith.addf %309, %310 : vector<8x8xf32>
    %c0_174 = arith.constant 0 : index
    %c0_175 = arith.constant 0 : index
    %c0_176 = arith.constant 0 : index
    %312 = vector.load %arg22[%c0_174, %c0_175, %c0_176] : memref<3x8x2048xbf16, #tpu.memory_space<vmem>>, vector<1x8x2048xbf16>
    %313 = vector.shape_cast %312 : vector<1x8x2048xbf16> to vector<8x2048xbf16>
    %314 = arith.truncf %311 : vector<8x8xf32> to vector<8x8xbf16>
    %cst_177 = arith.constant dense<0.000000e+00> : vector<8x2048xf32>
    %315 = tpu.matmul %314, %313, %cst_177 {dimension_numbers = #tpu.dot_dimension_numbers<[1], [0], [0], [1], [0, 0, 1, 1], [], []>} : vector<8x8xbf16>, vector<8x2048xbf16>, vector<8x2048xf32> -> vector<8x2048xf32>
    %c0_178 = arith.constant 0 : index
    %c0_179 = arith.constant 0 : index
    %c0_180 = arith.constant 0 : index
    %316 = vector.load %arg23[%c0_178, %c0_179, %c0_180] : memref<3x1x2048xf32, #tpu.memory_space<vmem>>, vector<1x1x2048xf32>
    %317 = vector.shape_cast %316 : vector<1x1x2048xf32> to vector<1x2048xf32>
    %318 = vector.broadcast %317 : vector<1x2048xf32> to vector<8x2048xf32>
    %319 = arith.addf %315, %318 : vector<8x2048xf32>
    %cst_181 = arith.constant 0.000000e+00 : f32
    %320 = vector.broadcast %cst_181 : f32 to vector<8x2048xf32>
    %321 = arith.maximumf %319, %320 : vector<8x2048xf32>
    %c0_182 = arith.constant 0 : index
    %c0_183 = arith.constant 0 : index
    %c0_184 = arith.constant 0 : index
    %322 = vector.load %arg24[%c0_182, %c0_183, %c0_184] : memref<3x8x2048xbf16, #tpu.memory_space<vmem>>, vector<1x8x2048xbf16>
    %323 = vector.shape_cast %322 : vector<1x8x2048xbf16> to vector<8x2048xbf16>
    %324 = arith.truncf %321 : vector<8x2048xf32> to vector<8x2048xbf16>
    %cst_185 = arith.constant dense<0.000000e+00> : vector<8x8xf32>
    %325 = tpu.matmul %324, %323, %cst_185 {dimension_numbers = #tpu.dot_dimension_numbers<[1], [1], [0], [0], [0, 0, 1, 0], [], []>} : vector<8x2048xbf16>, vector<8x2048xbf16>, vector<8x8xf32> -> vector<8x8xf32>
    %c0_186 = arith.constant 0 : index
    %c0_187 = arith.constant 0 : index
    %c0_188 = arith.constant 0 : index
    %326 = vector.load %arg25[%c0_186, %c0_187, %c0_188] : memref<3x1x8xf32, #tpu.memory_space<vmem>>, vector<1x1x8xf32>
    %327 = vector.shape_cast %326 : vector<1x1x8xf32> to vector<1x8xf32>
    %328 = vector.broadcast %327 : vector<1x8xf32> to vector<8x8xf32>
    %329 = arith.addf %325, %328 : vector<8x8xf32>
    %330 = arith.addf %311, %329 : vector<8x8xf32>
    %c0_189 = arith.constant 0 : index
    %c0_190 = arith.constant 0 : index
    %c0_191 = arith.constant 0 : index
    %331 = vector.load %arg26[%c0_189, %c0_190, %c0_191] : memref<3x1x8xf32, #tpu.memory_space<vmem>>, vector<1x1x8xf32>
    %332 = vector.shape_cast %331 : vector<1x1x8xf32> to vector<1x8xf32>
    %c0_192 = arith.constant 0 : index
    %c0_193 = arith.constant 0 : index
    %c0_194 = arith.constant 0 : index
    %333 = vector.load %arg27[%c0_192, %c0_193, %c0_194] : memref<3x1x8xf32, #tpu.memory_space<vmem>>, vector<1x1x8xf32>
    %334 = vector.shape_cast %333 : vector<1x1x8xf32> to vector<1x8xf32>
    %cst_195 = arith.constant dense<0.000000e+00> : vector<8xf32>
    %335 = vector.multi_reduction <add>, %330, %cst_195 [1] : vector<8x8xf32> to vector<8xf32>
    %336 = vector.shape_cast %335 : vector<8xf32> to vector<8x1xf32>
    %cst_196 = arith.constant 8.000000e+00 : f32
    %337 = vector.broadcast %cst_196 : f32 to vector<8x1xf32>
    %338 = arith.divf %336, %337 : vector<8x1xf32>
    %339 = vector.broadcast %338 : vector<8x1xf32> to vector<8x8xf32>
    %340 = arith.subf %330, %339 : vector<8x8xf32>
    %341 = arith.mulf %340, %340 : vector<8x8xf32>
    %cst_197 = arith.constant dense<0.000000e+00> : vector<8xf32>
    %342 = vector.multi_reduction <add>, %341, %cst_197 [1] : vector<8x8xf32> to vector<8xf32>
    %343 = vector.shape_cast %342 : vector<8xf32> to vector<8x1xf32>
    %cst_198 = arith.constant 8.000000e+00 : f32
    %344 = vector.broadcast %cst_198 : f32 to vector<8x1xf32>
    %345 = arith.divf %343, %344 : vector<8x1xf32>
    %cst_199 = arith.constant 9.99999974E-6 : f32
    %346 = vector.broadcast %cst_199 : f32 to vector<8x1xf32>
    %347 = arith.addf %345, %346 : vector<8x1xf32>
    %348 = math.rsqrt %347 : vector<8x1xf32>
    %349 = vector.broadcast %348 : vector<8x1xf32> to vector<8x8xf32>
    %350 = arith.mulf %340, %349 : vector<8x8xf32>
    %351 = vector.broadcast %332 : vector<1x8xf32> to vector<8x8xf32>
    %352 = arith.mulf %350, %351 : vector<8x8xf32>
    %353 = vector.broadcast %334 : vector<1x8xf32> to vector<8x8xf32>
    %354 = arith.addf %352, %353 : vector<8x8xf32>
    %c1_200 = arith.constant 1 : index
    %c0_201 = arith.constant 0 : index
    %c0_202 = arith.constant 0 : index
    %355 = vector.load %arg14[%c1_200, %c0_201, %c0_202] : memref<3x8x8xbf16, #tpu.memory_space<vmem>>, vector<1x8x8xbf16>
    %356 = vector.shape_cast %355 : vector<1x8x8xbf16> to vector<8x8xbf16>
    %357 = arith.truncf %354 : vector<8x8xf32> to vector<8x8xbf16>
    %cst_203 = arith.constant dense<0.000000e+00> : vector<8x8xf32>
    %358 = tpu.matmul %357, %356, %cst_203 {dimension_numbers = #tpu.dot_dimension_numbers<[1], [0], [0], [1], [0, 0, 1, 1], [], []>} : vector<8x8xbf16>, vector<8x8xbf16>, vector<8x8xf32> -> vector<8x8xf32>
    %c1_204 = arith.constant 1 : index
    %c0_205 = arith.constant 0 : index
    %c0_206 = arith.constant 0 : index
    %359 = vector.load %arg15[%c1_204, %c0_205, %c0_206] : memref<3x1x8xf32, #tpu.memory_space<vmem>>, vector<1x1x8xf32>
    %360 = vector.shape_cast %359 : vector<1x1x8xf32> to vector<1x8xf32>
    %361 = vector.broadcast %360 : vector<1x8xf32> to vector<8x8xf32>
    %362 = arith.addf %358, %361 : vector<8x8xf32>
    %363 = arith.addf %354, %362 : vector<8x8xf32>
    %c1_207 = arith.constant 1 : index
    %c0_208 = arith.constant 0 : index
    %c0_209 = arith.constant 0 : index
    %364 = vector.load %arg16[%c1_207, %c0_208, %c0_209] : memref<3x1x8xf32, #tpu.memory_space<vmem>>, vector<1x1x8xf32>
    %365 = vector.shape_cast %364 : vector<1x1x8xf32> to vector<1x8xf32>
    %c1_210 = arith.constant 1 : index
    %c0_211 = arith.constant 0 : index
    %c0_212 = arith.constant 0 : index
    %366 = vector.load %arg17[%c1_210, %c0_211, %c0_212] : memref<3x1x8xf32, #tpu.memory_space<vmem>>, vector<1x1x8xf32>
    %367 = vector.shape_cast %366 : vector<1x1x8xf32> to vector<1x8xf32>
    %cst_213 = arith.constant dense<0.000000e+00> : vector<8xf32>
    %368 = vector.multi_reduction <add>, %363, %cst_213 [1] : vector<8x8xf32> to vector<8xf32>
    %369 = vector.shape_cast %368 : vector<8xf32> to vector<8x1xf32>
    %cst_214 = arith.constant 8.000000e+00 : f32
    %370 = vector.broadcast %cst_214 : f32 to vector<8x1xf32>
    %371 = arith.divf %369, %370 : vector<8x1xf32>
    %372 = vector.broadcast %371 : vector<8x1xf32> to vector<8x8xf32>
    %373 = arith.subf %363, %372 : vector<8x8xf32>
    %374 = arith.mulf %373, %373 : vector<8x8xf32>
    %cst_215 = arith.constant dense<0.000000e+00> : vector<8xf32>
    %375 = vector.multi_reduction <add>, %374, %cst_215 [1] : vector<8x8xf32> to vector<8xf32>
    %376 = vector.shape_cast %375 : vector<8xf32> to vector<8x1xf32>
    %cst_216 = arith.constant 8.000000e+00 : f32
    %377 = vector.broadcast %cst_216 : f32 to vector<8x1xf32>
    %378 = arith.divf %376, %377 : vector<8x1xf32>
    %cst_217 = arith.constant 9.99999974E-6 : f32
    %379 = vector.broadcast %cst_217 : f32 to vector<8x1xf32>
    %380 = arith.addf %378, %379 : vector<8x1xf32>
    %381 = math.rsqrt %380 : vector<8x1xf32>
    %382 = vector.broadcast %381 : vector<8x1xf32> to vector<8x8xf32>
    %383 = arith.mulf %373, %382 : vector<8x8xf32>
    %384 = vector.broadcast %365 : vector<1x8xf32> to vector<8x8xf32>
    %385 = arith.mulf %383, %384 : vector<8x8xf32>
    %386 = vector.broadcast %367 : vector<1x8xf32> to vector<8x8xf32>
    %387 = arith.addf %385, %386 : vector<8x8xf32>
    %388 = vector.extract_strided_slice %252 {offsets = [0, 8], sizes = [8, 8], strides = [1, 1]} : vector<8x24xf32> to vector<8x8xf32>
    %389 = arith.addf %387, %388 : vector<8x8xf32>
    %c1_218 = arith.constant 1 : index
    %c0_219 = arith.constant 0 : index
    %c0_220 = arith.constant 0 : index
    %390 = vector.load %arg20[%c1_218, %c0_219, %c0_220] : memref<3x1x8xf32, #tpu.memory_space<vmem>>, vector<1x1x8xf32>
    %391 = vector.shape_cast %390 : vector<1x1x8xf32> to vector<1x8xf32>
    %c1_221 = arith.constant 1 : index
    %c0_222 = arith.constant 0 : index
    %c0_223 = arith.constant 0 : index
    %392 = vector.load %arg21[%c1_221, %c0_222, %c0_223] : memref<3x1x8xf32, #tpu.memory_space<vmem>>, vector<1x1x8xf32>
    %393 = vector.shape_cast %392 : vector<1x1x8xf32> to vector<1x8xf32>
    %cst_224 = arith.constant dense<0.000000e+00> : vector<8xf32>
    %394 = vector.multi_reduction <add>, %389, %cst_224 [1] : vector<8x8xf32> to vector<8xf32>
    %395 = vector.shape_cast %394 : vector<8xf32> to vector<8x1xf32>
    %cst_225 = arith.constant 8.000000e+00 : f32
    %396 = vector.broadcast %cst_225 : f32 to vector<8x1xf32>
    %397 = arith.divf %395, %396 : vector<8x1xf32>
    %398 = vector.broadcast %397 : vector<8x1xf32> to vector<8x8xf32>
    %399 = arith.subf %389, %398 : vector<8x8xf32>
    %400 = arith.mulf %399, %399 : vector<8x8xf32>
    %cst_226 = arith.constant dense<0.000000e+00> : vector<8xf32>
    %401 = vector.multi_reduction <add>, %400, %cst_226 [1] : vector<8x8xf32> to vector<8xf32>
    %402 = vector.shape_cast %401 : vector<8xf32> to vector<8x1xf32>
    %cst_227 = arith.constant 8.000000e+00 : f32
    %403 = vector.broadcast %cst_227 : f32 to vector<8x1xf32>
    %404 = arith.divf %402, %403 : vector<8x1xf32>
    %cst_228 = arith.constant 9.99999974E-6 : f32
    %405 = vector.broadcast %cst_228 : f32 to vector<8x1xf32>
    %406 = arith.addf %404, %405 : vector<8x1xf32>
    %407 = math.rsqrt %406 : vector<8x1xf32>
    %408 = vector.broadcast %407 : vector<8x1xf32> to vector<8x8xf32>
    %409 = arith.mulf %399, %408 : vector<8x8xf32>
    %410 = vector.broadcast %391 : vector<1x8xf32> to vector<8x8xf32>
    %411 = arith.mulf %409, %410 : vector<8x8xf32>
    %412 = vector.broadcast %393 : vector<1x8xf32> to vector<8x8xf32>
    %413 = arith.addf %411, %412 : vector<8x8xf32>
    %c1_229 = arith.constant 1 : index
    %c0_230 = arith.constant 0 : index
    %c0_231 = arith.constant 0 : index
    %414 = vector.load %arg22[%c1_229, %c0_230, %c0_231] : memref<3x8x2048xbf16, #tpu.memory_space<vmem>>, vector<1x8x2048xbf16>
    %415 = vector.shape_cast %414 : vector<1x8x2048xbf16> to vector<8x2048xbf16>
    %416 = arith.truncf %413 : vector<8x8xf32> to vector<8x8xbf16>
    %cst_232 = arith.constant dense<0.000000e+00> : vector<8x2048xf32>
    %417 = tpu.matmul %416, %415, %cst_232 {dimension_numbers = #tpu.dot_dimension_numbers<[1], [0], [0], [1], [0, 0, 1, 1], [], []>} : vector<8x8xbf16>, vector<8x2048xbf16>, vector<8x2048xf32> -> vector<8x2048xf32>
    %c1_233 = arith.constant 1 : index
    %c0_234 = arith.constant 0 : index
    %c0_235 = arith.constant 0 : index
    %418 = vector.load %arg23[%c1_233, %c0_234, %c0_235] : memref<3x1x2048xf32, #tpu.memory_space<vmem>>, vector<1x1x2048xf32>
    %419 = vector.shape_cast %418 : vector<1x1x2048xf32> to vector<1x2048xf32>
    %420 = vector.broadcast %419 : vector<1x2048xf32> to vector<8x2048xf32>
    %421 = arith.addf %417, %420 : vector<8x2048xf32>
    %cst_236 = arith.constant 0.000000e+00 : f32
    %422 = vector.broadcast %cst_236 : f32 to vector<8x2048xf32>
    %423 = arith.maximumf %421, %422 : vector<8x2048xf32>
    %c1_237 = arith.constant 1 : index
    %c0_238 = arith.constant 0 : index
    %c0_239 = arith.constant 0 : index
    %424 = vector.load %arg24[%c1_237, %c0_238, %c0_239] : memref<3x8x2048xbf16, #tpu.memory_space<vmem>>, vector<1x8x2048xbf16>
    %425 = vector.shape_cast %424 : vector<1x8x2048xbf16> to vector<8x2048xbf16>
    %426 = arith.truncf %423 : vector<8x2048xf32> to vector<8x2048xbf16>
    %cst_240 = arith.constant dense<0.000000e+00> : vector<8x8xf32>
    %427 = tpu.matmul %426, %425, %cst_240 {dimension_numbers = #tpu.dot_dimension_numbers<[1], [1], [0], [0], [0, 0, 1, 0], [], []>} : vector<8x2048xbf16>, vector<8x2048xbf16>, vector<8x8xf32> -> vector<8x8xf32>
    %c1_241 = arith.constant 1 : index
    %c0_242 = arith.constant 0 : index
    %c0_243 = arith.constant 0 : index
    %428 = vector.load %arg25[%c1_241, %c0_242, %c0_243] : memref<3x1x8xf32, #tpu.memory_space<vmem>>, vector<1x1x8xf32>
    %429 = vector.shape_cast %428 : vector<1x1x8xf32> to vector<1x8xf32>
    %430 = vector.broadcast %429 : vector<1x8xf32> to vector<8x8xf32>
    %431 = arith.addf %427, %430 : vector<8x8xf32>
    %432 = arith.addf %413, %431 : vector<8x8xf32>
    %c1_244 = arith.constant 1 : index
    %c0_245 = arith.constant 0 : index
    %c0_246 = arith.constant 0 : index
    %433 = vector.load %arg26[%c1_244, %c0_245, %c0_246] : memref<3x1x8xf32, #tpu.memory_space<vmem>>, vector<1x1x8xf32>
    %434 = vector.shape_cast %433 : vector<1x1x8xf32> to vector<1x8xf32>
    %c1_247 = arith.constant 1 : index
    %c0_248 = arith.constant 0 : index
    %c0_249 = arith.constant 0 : index
    %435 = vector.load %arg27[%c1_247, %c0_248, %c0_249] : memref<3x1x8xf32, #tpu.memory_space<vmem>>, vector<1x1x8xf32>
    %436 = vector.shape_cast %435 : vector<1x1x8xf32> to vector<1x8xf32>
    %cst_250 = arith.constant dense<0.000000e+00> : vector<8xf32>
    %437 = vector.multi_reduction <add>, %432, %cst_250 [1] : vector<8x8xf32> to vector<8xf32>
    %438 = vector.shape_cast %437 : vector<8xf32> to vector<8x1xf32>
    %cst_251 = arith.constant 8.000000e+00 : f32
    %439 = vector.broadcast %cst_251 : f32 to vector<8x1xf32>
    %440 = arith.divf %438, %439 : vector<8x1xf32>
    %441 = vector.broadcast %440 : vector<8x1xf32> to vector<8x8xf32>
    %442 = arith.subf %432, %441 : vector<8x8xf32>
    %443 = arith.mulf %442, %442 : vector<8x8xf32>
    %cst_252 = arith.constant dense<0.000000e+00> : vector<8xf32>
    %444 = vector.multi_reduction <add>, %443, %cst_252 [1] : vector<8x8xf32> to vector<8xf32>
    %445 = vector.shape_cast %444 : vector<8xf32> to vector<8x1xf32>
    %cst_253 = arith.constant 8.000000e+00 : f32
    %446 = vector.broadcast %cst_253 : f32 to vector<8x1xf32>
    %447 = arith.divf %445, %446 : vector<8x1xf32>
    %cst_254 = arith.constant 9.99999974E-6 : f32
    %448 = vector.broadcast %cst_254 : f32 to vector<8x1xf32>
    %449 = arith.addf %447, %448 : vector<8x1xf32>
    %450 = math.rsqrt %449 : vector<8x1xf32>
    %451 = vector.broadcast %450 : vector<8x1xf32> to vector<8x8xf32>
    %452 = arith.mulf %442, %451 : vector<8x8xf32>
    %453 = vector.broadcast %434 : vector<1x8xf32> to vector<8x8xf32>
    %454 = arith.mulf %452, %453 : vector<8x8xf32>
    %455 = vector.broadcast %436 : vector<1x8xf32> to vector<8x8xf32>
    %456 = arith.addf %454, %455 : vector<8x8xf32>
    %c2_255 = arith.constant 2 : index
    %c0_256 = arith.constant 0 : index
    %c0_257 = arith.constant 0 : index
    %457 = vector.load %arg14[%c2_255, %c0_256, %c0_257] : memref<3x8x8xbf16, #tpu.memory_space<vmem>>, vector<1x8x8xbf16>
    %458 = vector.shape_cast %457 : vector<1x8x8xbf16> to vector<8x8xbf16>
    %459 = arith.truncf %456 : vector<8x8xf32> to vector<8x8xbf16>
    %cst_258 = arith.constant dense<0.000000e+00> : vector<8x8xf32>
    %460 = tpu.matmul %459, %458, %cst_258 {dimension_numbers = #tpu.dot_dimension_numbers<[1], [0], [0], [1], [0, 0, 1, 1], [], []>} : vector<8x8xbf16>, vector<8x8xbf16>, vector<8x8xf32> -> vector<8x8xf32>
    %c2_259 = arith.constant 2 : index
    %c0_260 = arith.constant 0 : index
    %c0_261 = arith.constant 0 : index
    %461 = vector.load %arg15[%c2_259, %c0_260, %c0_261] : memref<3x1x8xf32, #tpu.memory_space<vmem>>, vector<1x1x8xf32>
    %462 = vector.shape_cast %461 : vector<1x1x8xf32> to vector<1x8xf32>
    %463 = vector.broadcast %462 : vector<1x8xf32> to vector<8x8xf32>
    %464 = arith.addf %460, %463 : vector<8x8xf32>
    %465 = arith.addf %456, %464 : vector<8x8xf32>
    %c2_262 = arith.constant 2 : index
    %c0_263 = arith.constant 0 : index
    %c0_264 = arith.constant 0 : index
    %466 = vector.load %arg16[%c2_262, %c0_263, %c0_264] : memref<3x1x8xf32, #tpu.memory_space<vmem>>, vector<1x1x8xf32>
    %467 = vector.shape_cast %466 : vector<1x1x8xf32> to vector<1x8xf32>
    %c2_265 = arith.constant 2 : index
    %c0_266 = arith.constant 0 : index
    %c0_267 = arith.constant 0 : index
    %468 = vector.load %arg17[%c2_265, %c0_266, %c0_267] : memref<3x1x8xf32, #tpu.memory_space<vmem>>, vector<1x1x8xf32>
    %469 = vector.shape_cast %468 : vector<1x1x8xf32> to vector<1x8xf32>
    %cst_268 = arith.constant dense<0.000000e+00> : vector<8xf32>
    %470 = vector.multi_reduction <add>, %465, %cst_268 [1] : vector<8x8xf32> to vector<8xf32>
    %471 = vector.shape_cast %470 : vector<8xf32> to vector<8x1xf32>
    %cst_269 = arith.constant 8.000000e+00 : f32
    %472 = vector.broadcast %cst_269 : f32 to vector<8x1xf32>
    %473 = arith.divf %471, %472 : vector<8x1xf32>
    %474 = vector.broadcast %473 : vector<8x1xf32> to vector<8x8xf32>
    %475 = arith.subf %465, %474 : vector<8x8xf32>
    %476 = arith.mulf %475, %475 : vector<8x8xf32>
    %cst_270 = arith.constant dense<0.000000e+00> : vector<8xf32>
    %477 = vector.multi_reduction <add>, %476, %cst_270 [1] : vector<8x8xf32> to vector<8xf32>
    %478 = vector.shape_cast %477 : vector<8xf32> to vector<8x1xf32>
    %cst_271 = arith.constant 8.000000e+00 : f32
    %479 = vector.broadcast %cst_271 : f32 to vector<8x1xf32>
    %480 = arith.divf %478, %479 : vector<8x1xf32>
    %cst_272 = arith.constant 9.99999974E-6 : f32
    %481 = vector.broadcast %cst_272 : f32 to vector<8x1xf32>
    %482 = arith.addf %480, %481 : vector<8x1xf32>
    %483 = math.rsqrt %482 : vector<8x1xf32>
    %484 = vector.broadcast %483 : vector<8x1xf32> to vector<8x8xf32>
    %485 = arith.mulf %475, %484 : vector<8x8xf32>
    %486 = vector.broadcast %467 : vector<1x8xf32> to vector<8x8xf32>
    %487 = arith.mulf %485, %486 : vector<8x8xf32>
    %488 = vector.broadcast %469 : vector<1x8xf32> to vector<8x8xf32>
    %489 = arith.addf %487, %488 : vector<8x8xf32>
    %490 = vector.extract_strided_slice %252 {offsets = [0, 16], sizes = [8, 8], strides = [1, 1]} : vector<8x24xf32> to vector<8x8xf32>
    %491 = arith.addf %489, %490 : vector<8x8xf32>
    %c2_273 = arith.constant 2 : index
    %c0_274 = arith.constant 0 : index
    %c0_275 = arith.constant 0 : index
    %492 = vector.load %arg20[%c2_273, %c0_274, %c0_275] : memref<3x1x8xf32, #tpu.memory_space<vmem>>, vector<1x1x8xf32>
    %493 = vector.shape_cast %492 : vector<1x1x8xf32> to vector<1x8xf32>
    %c2_276 = arith.constant 2 : index
    %c0_277 = arith.constant 0 : index
    %c0_278 = arith.constant 0 : index
    %494 = vector.load %arg21[%c2_276, %c0_277, %c0_278] : memref<3x1x8xf32, #tpu.memory_space<vmem>>, vector<1x1x8xf32>
    %495 = vector.shape_cast %494 : vector<1x1x8xf32> to vector<1x8xf32>
    %cst_279 = arith.constant dense<0.000000e+00> : vector<8xf32>
    %496 = vector.multi_reduction <add>, %491, %cst_279 [1] : vector<8x8xf32> to vector<8xf32>
    %497 = vector.shape_cast %496 : vector<8xf32> to vector<8x1xf32>
    %cst_280 = arith.constant 8.000000e+00 : f32
    %498 = vector.broadcast %cst_280 : f32 to vector<8x1xf32>
    %499 = arith.divf %497, %498 : vector<8x1xf32>
    %500 = vector.broadcast %499 : vector<8x1xf32> to vector<8x8xf32>
    %501 = arith.subf %491, %500 : vector<8x8xf32>
    %502 = arith.mulf %501, %501 : vector<8x8xf32>
    %cst_281 = arith.constant dense<0.000000e+00> : vector<8xf32>
    %503 = vector.multi_reduction <add>, %502, %cst_281 [1] : vector<8x8xf32> to vector<8xf32>
    %504 = vector.shape_cast %503 : vector<8xf32> to vector<8x1xf32>
    %cst_282 = arith.constant 8.000000e+00 : f32
    %505 = vector.broadcast %cst_282 : f32 to vector<8x1xf32>
    %506 = arith.divf %504, %505 : vector<8x1xf32>
    %cst_283 = arith.constant 9.99999974E-6 : f32
    %507 = vector.broadcast %cst_283 : f32 to vector<8x1xf32>
    %508 = arith.addf %506, %507 : vector<8x1xf32>
    %509 = math.rsqrt %508 : vector<8x1xf32>
    %510 = vector.broadcast %509 : vector<8x1xf32> to vector<8x8xf32>
    %511 = arith.mulf %501, %510 : vector<8x8xf32>
    %512 = vector.broadcast %493 : vector<1x8xf32> to vector<8x8xf32>
    %513 = arith.mulf %511, %512 : vector<8x8xf32>
    %514 = vector.broadcast %495 : vector<1x8xf32> to vector<8x8xf32>
    %515 = arith.addf %513, %514 : vector<8x8xf32>
    %c2_284 = arith.constant 2 : index
    %c0_285 = arith.constant 0 : index
    %c0_286 = arith.constant 0 : index
    %516 = vector.load %arg22[%c2_284, %c0_285, %c0_286] : memref<3x8x2048xbf16, #tpu.memory_space<vmem>>, vector<1x8x2048xbf16>
    %517 = vector.shape_cast %516 : vector<1x8x2048xbf16> to vector<8x2048xbf16>
    %518 = arith.truncf %515 : vector<8x8xf32> to vector<8x8xbf16>
    %cst_287 = arith.constant dense<0.000000e+00> : vector<8x2048xf32>
    %519 = tpu.matmul %518, %517, %cst_287 {dimension_numbers = #tpu.dot_dimension_numbers<[1], [0], [0], [1], [0, 0, 1, 1], [], []>} : vector<8x8xbf16>, vector<8x2048xbf16>, vector<8x2048xf32> -> vector<8x2048xf32>
    %c2_288 = arith.constant 2 : index
    %c0_289 = arith.constant 0 : index
    %c0_290 = arith.constant 0 : index
    %520 = vector.load %arg23[%c2_288, %c0_289, %c0_290] : memref<3x1x2048xf32, #tpu.memory_space<vmem>>, vector<1x1x2048xf32>
    %521 = vector.shape_cast %520 : vector<1x1x2048xf32> to vector<1x2048xf32>
    %522 = vector.broadcast %521 : vector<1x2048xf32> to vector<8x2048xf32>
    %523 = arith.addf %519, %522 : vector<8x2048xf32>
    %cst_291 = arith.constant 0.000000e+00 : f32
    %524 = vector.broadcast %cst_291 : f32 to vector<8x2048xf32>
    %525 = arith.maximumf %523, %524 : vector<8x2048xf32>
    %c2_292 = arith.constant 2 : index
    %c0_293 = arith.constant 0 : index
    %c0_294 = arith.constant 0 : index
    %526 = vector.load %arg24[%c2_292, %c0_293, %c0_294] : memref<3x8x2048xbf16, #tpu.memory_space<vmem>>, vector<1x8x2048xbf16>
    %527 = vector.shape_cast %526 : vector<1x8x2048xbf16> to vector<8x2048xbf16>
    %528 = arith.truncf %525 : vector<8x2048xf32> to vector<8x2048xbf16>
    %cst_295 = arith.constant dense<0.000000e+00> : vector<8x8xf32>
    %529 = tpu.matmul %528, %527, %cst_295 {dimension_numbers = #tpu.dot_dimension_numbers<[1], [1], [0], [0], [0, 0, 1, 0], [], []>} : vector<8x2048xbf16>, vector<8x2048xbf16>, vector<8x8xf32> -> vector<8x8xf32>
    %c2_296 = arith.constant 2 : index
    %c0_297 = arith.constant 0 : index
    %c0_298 = arith.constant 0 : index
    %530 = vector.load %arg25[%c2_296, %c0_297, %c0_298] : memref<3x1x8xf32, #tpu.memory_space<vmem>>, vector<1x1x8xf32>
    %531 = vector.shape_cast %530 : vector<1x1x8xf32> to vector<1x8xf32>
    %532 = vector.broadcast %531 : vector<1x8xf32> to vector<8x8xf32>
    %533 = arith.addf %529, %532 : vector<8x8xf32>
    %534 = arith.addf %515, %533 : vector<8x8xf32>
    %c2_299 = arith.constant 2 : index
    %c0_300 = arith.constant 0 : index
    %c0_301 = arith.constant 0 : index
    %535 = vector.load %arg26[%c2_299, %c0_300, %c0_301] : memref<3x1x8xf32, #tpu.memory_space<vmem>>, vector<1x1x8xf32>
    %536 = vector.shape_cast %535 : vector<1x1x8xf32> to vector<1x8xf32>
    %c2_302 = arith.constant 2 : index
    %c0_303 = arith.constant 0 : index
    %c0_304 = arith.constant 0 : index
    %537 = vector.load %arg27[%c2_302, %c0_303, %c0_304] : memref<3x1x8xf32, #tpu.memory_space<vmem>>, vector<1x1x8xf32>
    %538 = vector.shape_cast %537 : vector<1x1x8xf32> to vector<1x8xf32>
    %cst_305 = arith.constant dense<0.000000e+00> : vector<8xf32>
    %539 = vector.multi_reduction <add>, %534, %cst_305 [1] : vector<8x8xf32> to vector<8xf32>
    %540 = vector.shape_cast %539 : vector<8xf32> to vector<8x1xf32>
    %cst_306 = arith.constant 8.000000e+00 : f32
    %541 = vector.broadcast %cst_306 : f32 to vector<8x1xf32>
    %542 = arith.divf %540, %541 : vector<8x1xf32>
    %543 = vector.broadcast %542 : vector<8x1xf32> to vector<8x8xf32>
    %544 = arith.subf %534, %543 : vector<8x8xf32>
    %545 = arith.mulf %544, %544 : vector<8x8xf32>
    %cst_307 = arith.constant dense<0.000000e+00> : vector<8xf32>
    %546 = vector.multi_reduction <add>, %545, %cst_307 [1] : vector<8x8xf32> to vector<8xf32>
    %547 = vector.shape_cast %546 : vector<8xf32> to vector<8x1xf32>
    %cst_308 = arith.constant 8.000000e+00 : f32
    %548 = vector.broadcast %cst_308 : f32 to vector<8x1xf32>
    %549 = arith.divf %547, %548 : vector<8x1xf32>
    %cst_309 = arith.constant 9.99999974E-6 : f32
    %550 = vector.broadcast %cst_309 : f32 to vector<8x1xf32>
    %551 = arith.addf %549, %550 : vector<8x1xf32>
    %552 = math.rsqrt %551 : vector<8x1xf32>
    %553 = vector.broadcast %552 : vector<8x1xf32> to vector<8x8xf32>
    %554 = arith.mulf %544, %553 : vector<8x8xf32>
    %555 = vector.broadcast %536 : vector<1x8xf32> to vector<8x8xf32>
    %556 = arith.mulf %554, %555 : vector<8x8xf32>
    %557 = vector.broadcast %538 : vector<1x8xf32> to vector<8x8xf32>
    %558 = arith.addf %556, %557 : vector<8x8xf32>
    %c0_310 = arith.constant 0 : index
    %c0_311 = arith.constant 0 : index
    %559 = vector.load %arg28[%c0_310, %c0_311] : memref<8x32xbf16, #tpu.memory_space<vmem>>, vector<8x32xbf16>
    %560 = arith.truncf %558 : vector<8x8xf32> to vector<8x8xbf16>
    %cst_312 = arith.constant dense<0.000000e+00> : vector<8x32xf32>
    %561 = tpu.matmul %560, %559, %cst_312 {dimension_numbers = #tpu.dot_dimension_numbers<[1], [0], [0], [1], [0, 0, 1, 1], [], []>} : vector<8x8xbf16>, vector<8x32xbf16>, vector<8x32xf32> -> vector<8x32xf32>
    %c0_313 = arith.constant 0 : index
    %c0_314 = arith.constant 0 : index
    %562 = vector.load %arg29[%c0_313, %c0_314] : memref<1x32xf32, #tpu.memory_space<vmem>>, vector<1x32xf32>
    %563 = vector.broadcast %562 : vector<1x32xf32> to vector<8x32xf32>
    %564 = arith.addf %561, %563 : vector<8x32xf32>
    %565 = tpu.concatenate %564, %234 in 1 : vector<8x32xf32>, vector<8x16xf32> -> vector<8x48xf32>
    %c0_315 = arith.constant 0 : index
    %c0_316 = arith.constant 0 : index
    %566 = vector.load %arg30[%c0_315, %c0_316] : memref<8x48xf32, #tpu.memory_space<vmem>>, vector<8x48xf32>
    tpu.vector_store %arg30[%c0_315, %c0_316], %565 {strides = array<i32>} : memref<8x48xf32, #tpu.memory_space<vmem>>, vector<8x48xf32>,
    return
  }
}

</mosaic_0001>

<bundles_post_ra>
// kernel: vae_forward.1
= control target key start
LH: loop header
LB: loop body
LE: loop exit
PB: predicated region body
PF: predicated region fallthrough
CT: control target
= control target key end

     0   :  { %s9095_s6 = smov 1   ;;  %s9096_s10 = smov 2   ;;  %s9977_s0 = inlined_call_operand.smem [shape: u32[31], index: -1, kind: input, shape index: {}] }
   0x1   :  { %s9170_s5 = sld [smem:[%s9977_s0]]   ;;  %s9097_s14 = smov 3  }
   0x2   :  { %s9175_s9 = sld [smem:[%s9977_s0 + %s9095_s6]]   ;;  %s9098_s18 = smov 4  }
   0x3   :  { %s9180_s13 = sld [smem:[%s9977_s0 + %s9096_s10]]   ;;  %s9099_s22 = smov 5  }
   0x4   :  { %s9185_s17 = sld [smem:[%s9977_s0 + %s9097_s14]]   ;;  %s9100_s26 = smov 6  }
   0x5   :  { %s9190_s21 = sld [smem:[%s9977_s0 + %s9098_s18]]   ;;  %s9101_s30 = smov 7  }
   0x6   :  { %s9195_s25 = sld [smem:[%s9977_s0 + %s9099_s22]]   ;;  %s9102_s4 = smov 8  }
   0x7   :  { %9980 = sst [smem:[#allocation53_spill]] %s9170_s5  ;;  %s9103_s10 = smov 9  }
   0x8   :  { %9981 = sst [smem:[#allocation54_spill]] %s9175_s9  ;;  %s9104_s15 = smov 10  }
   0x9   :  { %9982 = sst [smem:[#allocation55_spill]] %s9180_s13  ;;  %s9105_s20 = smov 11  }
   0xa   :  { %s9200_s29 = sld [smem:[%s9977_s0 + %s9100_s26]]   ;;  %s9106_s26 = smov 12  }
   0xb   :  { %s9205_s3 = sld [smem:[%s9977_s0 + %s9101_s30]]   ;;  %s9107_s1 = smov 13  }
   0xc   :  { %s9210_s8 = sld [smem:[%s9977_s0 + %s9102_s4]]   ;;  %s9108_s7 = smov 14  }
   0xd   :  { %s9215_s14 = sld [smem:[%s9977_s0 + %s9103_s10]]   ;;  %s9110_s22 = smov 16  }
   0xe   :  { %s9220_s19 = sld [smem:[%s9977_s0 + %s9104_s15]]   ;;  %s9109_s15 = smov 15  }
   0xf   :  { %s9225_s24 = sld [smem:[%s9977_s0 + %s9105_s20]]   ;;  %s9111_s28 = smov 17  }
  0x10   :  { %s9230_s30 = sld [smem:[%s9977_s0 + %s9106_s26]]  }
  0x11   :  { %s9235_s6 = sld [smem:[%s9977_s0 + %s9107_s1]]  }
  0x12   :  { %s9240_s12 = sld [smem:[%s9977_s0 + %s9108_s7]]   ;;  %s9112_s7 = smov 18  }
  0x13   :  { %9983 = sst [smem:[#allocation56_spill]] %s9215_s14 }
  0x14   :  { %s9245_s20 = sld [smem:[%s9977_s0 + %s9109_s15]]   ;;  %s9113_s15 = smov 19  }
  0x15   :  { %9984 = sst [smem:[#allocation57_spill]] %s9225_s24 }
  0x16   :  { %9985 = sst [smem:[#allocation58_spill]] %s9230_s30 }
  0x17   :  { %9986 = sst [smem:[#allocation59_spill]] %s9235_s6 }
  0x18   :  { %s9250_s27 = sld [smem:[%s9977_s0 + %s9110_s22]]   ;;  %s9114_s22 = smov 20  }
  0x19   :  { %s9255_s4 = sld [smem:[%s9977_s0 + %s9111_s28]]   ;;  %s9115_s28 = smov 21  }
  0x1a   :  { %9987 = sst [smem:[#allocation60_spill]] %s9245_s20 }
  0x1b   :  { %s9260_s9 = sld [smem:[%s9977_s0 + %s9112_s7]]   ;;  %s9116_s7 = smov 22  }
  0x1c   :  { %s9265_s6 = sld [smem:[%s9977_s0 + %s9113_s15]]   ;;  %s9117_s15 = smov 23  }
  0x1d   :  { %s9270_s30 = sld [smem:[%s9977_s0 + %s9114_s22]]   ;;  %s9118_s22 = smov 24  }
  0x1e   :  { %s9275_s5 = sld [smem:[%s9977_s0 + %s9115_s28]]   ;;  %s9119_s28 = smov 25  }
  0x1f   :  { %9988 = sst [smem:[#allocation61_spill]] %s9255_s4 }
  0x20   :  { %s9280_s13 = sld [smem:[%s9977_s0 + %s9116_s7]]   ;;  %s9120_s7 = smov 26  }
  0x21   :  { %s9290_s4 = sld [smem:[%s9977_s0 + %s9118_s22]]   ;;  %s9122_s22 = smov 28  }
  0x22   :  { %9989 = sst [smem:[#allocation62_spill]] %s9265_s6 }
  0x23   :  { %s9285_s6 = sld [smem:[%s9977_s0 + %s9117_s15]]   ;;  %s9121_s15 = smov 27  }
  0x24   :  { %9990 = sst [smem:[#allocation63_spill]] %s9275_s5 }
  0x25   :  { %s9295_s5 = sld [smem:[%s9977_s0 + %s9119_s28]]   ;;  %s9123_s28 = smov 29  }
  0x26   :  { %s9300_s20 = sld [smem:[%s9977_s0 + %s9120_s7]]   ;;  %s9124_s7 = smov 30  }
  0x27   :  { %s9310_s24 = sld [smem:[%s9977_s0 + %s9122_s22]]  }
  0x28   :  { %s9320_s14 = sld [smem:[%s9977_s0 + %s9124_s7]]  }
  0x29   :  { %9991 = sst [smem:[#allocation64_spill]] %s9285_s6 }
  0x2a   :  { %s9305_s6 = sld [smem:[%s9977_s0 + %s9121_s15]]  }
  0x2b   :  { %9992 = sst [smem:[#allocation65_spill]] %s9295_s5 }
  0x2c   :  { %s9315_s5 = sld [smem:[%s9977_s0 + %s9123_s28]]  }
  0x2d   :  { %66 = vsyncpa [#allocation3], 0 }
  0x2e   :  { %67 = vsyncpa [#allocation5], 0 }
  0x2f   :  { %68 = vsyncpa [#allocation8], 0 }
  0x30   :  { %69 = vsyncpa [#allocation11], 0 }
  0x31   :  { %70 = vsyncpa [#allocation14], 0 }
  0x32   :  { %71 = vsyncpa [#allocation17], 0 }
  0x33   :  { %72 = vsyncpa [#allocation20], 0 }
  0x34   :  { %73 = vsyncpa [#allocation23], 0 }
  0x35   :  { %74 = vsyncpa [#allocation26], 0 }
  0x36   :  { %75 = vsyncpa [#allocation29], 0 }
  0x37   :  { %76 = vsyncpa [#allocation32], 0 }
  0x38   :  { %77 = vsyncpa [#allocation35], 0 }
  0x39   :  { %78 = vsyncpa [#allocation38], 0  ;;  %s9125_s15 = smov [#allocation4]   ;;  %s9126_s18 = smov [#allocation7]  }
  0x3a   :  { %s102_s16 = sshll.u32 %s9125_s15, 4  ;;  %s126_s22 = sshll.u32 %s9126_s18, 4  ;;  %s103_s16 = int_to_ptr.vmem [resolvable:$true] %s102_s16  ;;  %s127_s22 = int_to_ptr.vmem [resolvable:$true] %s126_s22 }
  0x3b   :  { %s8577_s0 = scalar_lea.vmem %s103_s16, 48  ;;  %s8581_s23 = scalar_lea.vmem %s103_s16, 64 }
  0x3c   :  { %p8578_p0 = scmp.ne.s32.totalorder %s103_s16, %s8577_s0  ;;  %p8582_p1 = scmp.lt.s32.totalorder %s103_s16, %s103_s16 }
  0x3d   :  { %p8583_p2 = scmp.lt.s32.totalorder %s8581_s23, %s8577_s0 }
  0x3f   :  { %p8584_p3 = por %p8583_p2, %p8582_p1 }
  0x41   :  { %p8585_p4 = pnand %p8584_p3, %p8578_p0 }
  0x43   :  { %8588 = shalt.err (!%p8585_p4)
}
  0x44   :  { %s9127_s26 = smov 16   ;;  %s9128_s28 = smov 1  }
  0x45   :  { %108 = dma.hbm_to_vmem [thread:$0]  %s9190_s21, 48, %s103_s16, [#allocation5], %s9127_s26, %s9127_s26, %s9128_s28  }
  0x46   :  { %s8597_s1 = scalar_lea.vmem %s127_s22, 12288  ;;  %p8602_p6 = scmp.lt.s32.totalorder %s127_s22, %s127_s22 }
  0x47   :  { %p8598_p5 = scmp.ne.s32.totalorder %s127_s22, %s8597_s1  ;;  %p8603_p7 = scmp.lt.s32.totalorder %s8597_s1, %s8597_s1 }
  0x49   :  { %p8604_p8 = por %p8603_p7, %p8602_p6 }
  0x4b   :  { %p8605_p9 = pnand %p8604_p8, %p8598_p5 }
  0x4d   :  { %8608 = shalt.err (!%p8605_p9)
}
  0x4e   :  { %s9129_s2 = smov 1024   ;;  %s9130_s7 = smov 64  }
  0x4f   :  { %132 = dma.hbm_to_vmem [thread:$0]  %s9200_s29, 12288, %s127_s22, [#allocation8], %s9129_s2, %s9129_s2, %s9130_s7  }
  0x50   :  { %s9131_s10 = smov [#allocation10]   ;;  %s9132_s15 = smov [#allocation13]  }
  0x51   :  { %s150_s11 = sshll.u32 %s9131_s10, 4  ;;  %s174_s18 = sshll.u32 %s9132_s15, 4  ;;  %s151_s11 = int_to_ptr.vmem [resolvable:$true] %s150_s11  ;;  %s175_s18 = int_to_ptr.vmem [resolvable:$true] %s174_s18 }
  0x52   :  { %s8617_s21 = scalar_lea.vmem %s151_s11, 12288  ;;  %p8622_p11 = scmp.lt.s32.totalorder %s151_s11, %s151_s11 }
  0x53   :  { %p8618_p10 = scmp.ne.s32.totalorder %s151_s11, %s8617_s21  ;;  %p8623_p12 = scmp.lt.s32.totalorder %s8617_s21, %s8617_s21 }
  0x55   :  { %p8624_p13 = por %p8623_p12, %p8622_p11 }
  0x57   :  { %p8625_p0 = pnand %p8624_p13, %p8618_p10 }
  0x59   :  { %8628 = shalt.err (!%p8625_p0)
}
  0x5a   :  { %156 = dma.hbm_to_vmem [thread:$0]  %s9210_s8, 12288, %s151_s11, [#allocation11], %s9129_s2, %s9129_s2, %s9130_s7  }
  0x5b   :  { %s8637_s16 = scalar_lea.vmem %s175_s18, 48  ;;  %s8641_s29 = scalar_lea.vmem %s175_s18, 64 }
  0x5c   :  { %p8638_p1 = scmp.ne.s32.totalorder %s175_s18, %s8637_s16  ;;  %p8642_p2 = scmp.lt.s32.totalorder %s175_s18, %s175_s18 }
  0x5d   :  { %p8643_p3 = scmp.lt.s32.totalorder %s8641_s29, %s8637_s16 }
  0x5f   :  { %p8644_p4 = por %p8643_p3, %p8642_p2 }
  0x61   :  { %p8645_p5 = pnand %p8644_p4, %p8638_p1 }
  0x63   :  { %8648 = shalt.err (!%p8645_p5)
}
  0x64   :  { %180 = dma.hbm_to_vmem [thread:$0]  %s9220_s19, 48, %s175_s18, [#allocation14], %s9127_s26, %s9127_s26, %s9128_s28  }
  0x65   :  { %s9133_s22 = smov [#allocation16]   ;;  %s9134_s23 = smov [#allocation19]  }
  0x66   :  { %s202_s0 = sshll.u32 %s9133_s22, 4  ;;  %s226_s1 = sshll.u32 %s9134_s23, 4  ;;  %s203_s0 = int_to_ptr.vmem [resolvable:$true] %s202_s0  ;;  %s227_s1 = int_to_ptr.vmem [resolvable:$true] %s226_s1 }
  0x67   :  { %s8657_s10 = scalar_lea.vmem %s203_s0, 192  ;;  %p8662_p7 = scmp.lt.s32.totalorder %s203_s0, %s203_s0 }
  0x68   :  { %p8658_p6 = scmp.ne.s32.totalorder %s203_s0, %s8657_s10  ;;  %p8663_p8 = scmp.lt.s32.totalorder %s8657_s10, %s8657_s10 }
  0x6a   :  { %p8664_p9 = por %p8663_p8, %p8662_p7 }
  0x6c   :  { %p8665_p10 = pnand %p8664_p9, %p8658_p6 }
  0x6e   :  { %8668 = shalt.err (!%p8665_p10)
}
  0x6f   :  { %s9135_s8 = smov 4   ;;  %s8677_s11 = scalar_lea.vmem %s227_s1, 48 }
  0x70   :  { %208 = dma.hbm_to_vmem [thread:$0]  %s9240_s12, 192, %s203_s0, [#allocation17], %s9130_s7, %s9130_s7, %s9135_s8  }
  0x71   :  { %p8678_p11 = scmp.ne.s32.totalorder %s227_s1, %s8677_s11  ;;  %s8681_s19 = scalar_lea.vmem %s227_s1, 64 }
  0x72   :  { %p8682_p12 = scmp.lt.s32.totalorder %s227_s1, %s227_s1  ;;  %p8683_p13 = scmp.lt.s32.totalorder %s8681_s19, %s8677_s11 }
  0x74   :  { %p8684_p0 = por %p8683_p13, %p8682_p12 }
  0x76   :  { %p8685_p1 = pnand %p8684_p0, %p8678_p11 }
  0x78   :  { %8688 = shalt.err (!%p8685_p1)
}
  0x79   :  { %232 = dma.hbm_to_vmem [thread:$0]  %s9250_s27, 48, %s227_s1, [#allocation20], %s9127_s26, %s9127_s26, %s9128_s28  }
  0x7a   :  { %s9136_s15 = smov [#allocation22]   ;;  %s9137_s21 = smov [#allocation25]  }
  0x7b   :  { %s251_s18 = sshll.u32 %s9136_s15, 4  ;;  %s270_s16 = sshll.u32 %s9137_s21, 4  ;;  %s252_s18 = int_to_ptr.vmem [resolvable:$true] %s251_s18  ;;  %s271_s16 = int_to_ptr.vmem [resolvable:$true] %s270_s16 }
  0x7c   :  { %s8697_s12 = scalar_lea.vmem %s252_s18, 64  ;;  %p8702_p3 = scmp.lt.s32.totalorder %s252_s18, %s252_s18 }
  0x7d   :  { %p8698_p2 = scmp.ne.s32.totalorder %s252_s18, %s8697_s12  ;;  %p8703_p4 = scmp.lt.s32.totalorder %s8697_s12, %s8697_s12 }
  0x7f   :  { %p8704_p5 = por %p8703_p4, %p8702_p3 }
  0x81   :  { %p8705_p6 = pnand %p8704_p5, %p8698_p2 }
  0x83   :  { %8708 = shalt.err (!%p8705_p6)
}
  0x84   :  { %254 = dma.hbm_to_vmem [thread:$0]  %s9260_s9, 64, %s252_s18, [#allocation23]  }
  0x85   :  { %s8717_s29 = scalar_lea.vmem %s271_s16, 48  ;;  %s8721_s22 = scalar_lea.vmem %s271_s16, 64 }
  0x86   :  { %p8718_p7 = scmp.ne.s32.totalorder %s271_s16, %s8717_s29  ;;  %p8722_p8 = scmp.lt.s32.totalorder %s271_s16, %s271_s16 }
  0x87   :  { %p8723_p9 = scmp.lt.s32.totalorder %s8721_s22, %s8717_s29 }
  0x89   :  { %p8724_p10 = por %p8723_p9, %p8722_p8 }
  0x8b   :  { %p8725_p11 = pnand %p8724_p10, %p8718_p7 }
  0x8d   :  { %8728 = shalt.err (!%p8725_p11)
}
  0x8e   :  { %276 = dma.hbm_to_vmem [thread:$0]  %s9270_s30, 48, %s271_s16, [#allocation26], %s9127_s26, %s9127_s26, %s9128_s28  }
  0x8f   :  { %s9138_s27 = smov [#allocation28]   ;;  %s9139_s23 = smov [#allocation31]  }
  0x90   :  { %s294_s0 = sshll.u32 %s9138_s27, 4  ;;  %s318_s1 = sshll.u32 %s9139_s23, 4  ;;  %s295_s0 = int_to_ptr.vmem [resolvable:$true] %s294_s0  ;;  %s319_s1 = int_to_ptr.vmem [resolvable:$true] %s318_s1 }
  0x91   :  { %s8737_s9 = scalar_lea.vmem %s295_s0, 3072  ;;  %p8742_p13 = scmp.lt.s32.totalorder %s295_s0, %s295_s0 }
  0x92   :  { %p8738_p12 = scmp.ne.s32.totalorder %s295_s0, %s8737_s9  ;;  %p8743_p0 = scmp.lt.s32.totalorder %s8737_s9, %s8737_s9 }
  0x94   :  { %p8744_p1 = por %p8743_p0, %p8742_p13 }
  0x96   :  { %p8745_p2 = pnand %p8744_p1, %p8738_p12 }
  0x98   :  { %8748 = shalt.err (!%p8745_p2)
}
  0x99   :  { %300 = dma.hbm_to_vmem [thread:$0]  %s9280_s13, 3072, %s295_s0, [#allocation29], %s9129_s2, %s9129_s2, %s9130_s7  }
  0x9a   :  { %s8757_s10 = scalar_lea.vmem %s319_s1, 3072  ;;  %p8762_p4 = scmp.lt.s32.totalorder %s319_s1, %s319_s1 }
  0x9b   :  { %p8758_p3 = scmp.ne.s32.totalorder %s319_s1, %s8757_s10  ;;  %p8763_p5 = scmp.lt.s32.totalorder %s8757_s10, %s8757_s10 }
  0x9d   :  { %p8764_p6 = por %p8763_p5, %p8762_p4 }
  0x9f   :  { %p8765_p7 = pnand %p8764_p6, %p8758_p3 }
  0xa1   :  { %8768 = shalt.err (!%p8765_p7)
}
  0xa2   :  { %324 = dma.hbm_to_vmem [thread:$0]  %s9290_s4, 3072, %s319_s1, [#allocation32], %s9129_s2, %s9129_s2, %s9130_s7  }
  0xa3   :  { %s9140_s30 = smov [#allocation34]   ;;  %s9141_s11 = smov [#allocation37]  }
  0xa4   :  { %s342_s8 = sshll.u32 %s9140_s30, 4  ;;  %s367_s19 = sshll.u32 %s9141_s11, 4  ;;  %s343_s8 = int_to_ptr.vmem [resolvable:$true] %s342_s8  ;;  %s368_s19 = int_to_ptr.vmem [resolvable:$true] %s367_s19 }
  0xa5   :  { %s8777_s15 = scalar_lea.vmem %s343_s8, 48  ;;  %s8781_s13 = scalar_lea.vmem %s343_s8, 64 }
  0xa6   :  { %p8778_p8 = scmp.ne.s32.totalorder %s343_s8, %s8777_s15  ;;  %p8782_p9 = scmp.lt.s32.totalorder %s343_s8, %s343_s8 }
  0xa7   :  { %p8783_p10 = scmp.lt.s32.totalorder %s8781_s13, %s8777_s15 }
  0xa9   :  { %p8784_p11 = por %p8783_p10, %p8782_p9 }
  0xab   :  { %p8785_p12 = pnand %p8784_p11, %p8778_p8 }
  0xad   :  { %8788 = shalt.err (!%p8785_p12)
}
  0xae   :  { %348 = dma.hbm_to_vmem [thread:$0]  %s9300_s20, 48, %s343_s8, [#allocation35], %s9127_s26, %s9127_s26, %s9128_s28  }
  0xaf   :  { %s8797_s4 = scalar_lea.vmem %s368_s19, 64  ;;  %p8802_p0 = scmp.lt.s32.totalorder %s368_s19, %s368_s19 }
  0xb0   :  { %p8798_p13 = scmp.ne.s32.totalorder %s368_s19, %s8797_s4  ;;  %p8803_p1 = scmp.lt.s32.totalorder %s8797_s4, %s8797_s4 }
  0xb2   :  { %p8804_p2 = por %p8803_p1, %p8802_p0 }
  0xb4   :  { %p8805_p3 = pnand %p8804_p2, %p8798_p13 }
  0xb6   :  { %8808 = shalt.err (!%p8805_p3)
}
  0xb7   :  { %370 = dma.hbm_to_vmem [thread:$0]  %s9310_s24, 64, %s368_s19, [#allocation38]  }
  0xb8   :  { %s9142_s2 = smov [#allocation2]   ;;  %s9143_s18 = smov [#allocation6]  }
  0xb9   :  { %s90_s7 = sshll.u32 %s9142_s2, 4  ;;  %s114_s21 = sshll.u32 %s9143_s18, 4  ;;  %s91_s7 = int_to_ptr.vmem [resolvable:$true] %s90_s7  ;;  %s115_s21 = int_to_ptr.vmem [resolvable:$true] %s114_s21 }
  0xba   :  { %s8817_s16 = scalar_lea.vmem %s91_s7, 48  ;;  %s8821_s12 = scalar_lea.vmem %s91_s7, 64 }
  0xbb   :  { %p8818_p4 = scmp.ne.s32.totalorder %s91_s7, %s8817_s16  ;;  %p8822_p5 = scmp.lt.s32.totalorder %s91_s7, %s91_s7 }
  0xbc   :  { %p8823_p6 = scmp.lt.s32.totalorder %s8821_s12, %s8817_s16 }
  0xbe   :  { %p8824_p7 = por %p8823_p6, %p8822_p5 }
  0xc0   :  { %p8825_p8 = pnand %p8824_p7, %p8818_p4 }
  0xc2   :  { %8828 = shalt.err (!%p8825_p8)
}
  0xc3   :  { %96 = dma.hbm_to_vmem [thread:$0]  %s9185_s17, 48, %s91_s7, [#allocation3], %s9127_s26, %s9127_s26, %s9128_s28  }
  0xc4   :  { %s8837_s24 = scalar_lea.vmem %s115_s21, 48  ;;  %s8841_s20 = scalar_lea.vmem %s115_s21, 64 }
  0xc5   :  { %p8838_p9 = scmp.ne.s32.totalorder %s115_s21, %s8837_s24  ;;  %p8842_p10 = scmp.lt.s32.totalorder %s115_s21, %s115_s21 }
  0xc6   :  { %p8843_p11 = scmp.lt.s32.totalorder %s8841_s20, %s8837_s24 }
  0xc8   :  { %p8844_p12 = por %p8843_p11, %p8842_p10 }
  0xca   :  { %p8845_p13 = pnand %p8844_p12, %p8838_p9 }
  0xcc   :  { %8848 = shalt.err (!%p8845_p13)
}
  0xcd   :  { %120 = dma.hbm_to_vmem [thread:$0]  %s9195_s25, 48, %s115_s21, [#allocation5], %s9127_s26, %s9127_s26, %s9128_s28  }
  0xce   :  { %s9144_s29 = smov [#allocation9]  }
  0xcf   :  { %s138_s22 = sshll.u32 %s9144_s29, 4  ;;  %s139_s22 = int_to_ptr.vmem [resolvable:$true] %s138_s22 }
  0xd0   :  { %s8857_s27 = scalar_lea.vmem %s139_s22, 768  ;;  %p8862_p1 = scmp.lt.s32.totalorder %s139_s22, %s139_s22 }
  0xd1   :  { %p8858_p0 = scmp.ne.s32.totalorder %s139_s22, %s8857_s27  ;;  %p8863_p2 = scmp.lt.s32.totalorder %s8857_s27, %s8857_s27 }
  0xd3   :  { %p8864_p3 = por %p8863_p2, %p8862_p1 }
  0xd5   :  { %p8865_p4 = pnand %p8864_p3, %p8858_p0 }
  0xd7   :  { %8868 = shalt.err (!%p8865_p4)
}
  0xd8   :  { %s9145_s17 = smov 256   ;;  %s9146_s0 = smov [#allocation12]  }
  0xd9   :  { %144 = dma.hbm_to_vmem [thread:$0]  %s9205_s3, 768, %s139_s22, [#allocation8], %s9145_s17, %s9145_s17, %s9127_s26  }
  0xda   :  { %s162_s23 = sshll.u32 %s9146_s0, 4  ;;  %s9147_s25 = smov [#allocation15]   ;;  %s163_s23 = int_to_ptr.vmem [resolvable:$true] %s162_s23 }
  0xdb   :  { %s186_s1 = sshll.u32 %s9147_s25, 4  ;;  %s8877_s9 = scalar_lea.vmem %s163_s23, 48  ;;  %s187_s1 = int_to_ptr.vmem [resolvable:$true] %s186_s1 }
  0xdc   :  { %p8878_p5 = scmp.ne.s32.totalorder %s163_s23, %s8877_s9  ;;  %s8881_s10 = scalar_lea.vmem %s163_s23, 64 }
  0xdd   :  { %p8882_p6 = scmp.lt.s32.totalorder %s163_s23, %s163_s23  ;;  %p8883_p7 = scmp.lt.s32.totalorder %s8881_s10, %s8877_s9 }
  0xdf   :  { %p8884_p8 = por %p8883_p7, %p8882_p6 }
  0xe1   :  { %p8885_p9 = pnand %p8884_p8, %p8878_p5 }
  0xe3   :  { %8888 = shalt.err (!%p8885_p9)
}
  0xe4   :  { %s9993_s30 = sld [smem:[#allocation56_spill]]  ;;  %s8897_s3 = scalar_lea.vmem %s187_s1, 48 }
  0xe5   :  { %p8898_p10 = scmp.ne.s32.totalorder %s187_s1, %s8897_s3  ;;  %s8901_s8 = scalar_lea.vmem %s187_s1, 64 }
  0xe6   :  { %p8902_p11 = scmp.lt.s32.totalorder %s187_s1, %s187_s1  ;;  %p8903_p12 = scmp.lt.s32.totalorder %s8901_s8, %s8897_s3 }
  0xe8   :  { %p8904_p13 = por %p8903_p12, %p8902_p11 }
  0xea   :  { %168 = dma.hbm_to_vmem [thread:$0]  %s9993_s30, 48, %s163_s23, [#allocation11], %s9127_s26, %s9127_s26, %s9128_s28  }
  0xeb   :  { %p8905_p0 = pnand %p8904_p13, %p8898_p10 }
  0xed   :  { %8908 = shalt.err (!%p8905_p0)
}
  0xee   :  { %s9994_s11 = sld [smem:[#allocation57_spill]]  ;;  %s9148_s19 = smov [#allocation18]  }
  0xef   :  { %s214_s15 = sshll.u32 %s9148_s19, 4  ;;  %s9149_s13 = smov [#allocation21]   ;;  %s215_s15 = int_to_ptr.vmem [resolvable:$true] %s214_s15 }
  0xf0   :  { %s238_s4 = sshll.u32 %s9149_s13, 4  ;;  %s8917_s2 = scalar_lea.vmem %s215_s15, 48  ;;  %s239_s4 = int_to_ptr.vmem [resolvable:$true] %s238_s4 }
  0xf1   :  { %p8918_p1 = scmp.ne.s32.totalorder %s215_s15, %s8917_s2  ;;  %s8921_s7 = scalar_lea.vmem %s215_s15, 64 }
  0xf2   :  { %p8922_p2 = scmp.lt.s32.totalorder %s215_s15, %s215_s15  ;;  %p8923_p3 = scmp.lt.s32.totalorder %s8921_s7, %s8917_s2 }
  0xf4   :  { %192 = dma.hbm_to_vmem [thread:$0]  %s9994_s11, 48, %s187_s1, [#allocation14], %s9127_s26, %s9127_s26, %s9128_s28  }
  0xf5   :  { %p8924_p4 = por %p8923_p3, %p8922_p2 }
  0xf7   :  { %p8925_p5 = pnand %p8924_p4, %p8918_p1 }
  0xf9   :  { %8928 = shalt.err (!%p8925_p5)
}
  0xfa   :  { %s9995_s18 = sld [smem:[#allocation60_spill]]  ;;  %s8937_s21 = scalar_lea.vmem %s239_s4, 48 }
  0xfb   :  { %p8938_p6 = scmp.ne.s32.totalorder %s239_s4, %s8937_s21  ;;  %s8941_s16 = scalar_lea.vmem %s239_s4, 64 }
  0xfc   :  { %p8942_p7 = scmp.lt.s32.totalorder %s239_s4, %s239_s4  ;;  %p8943_p8 = scmp.lt.s32.totalorder %s8941_s16, %s8937_s21 }
  0xfe   :  { %p8944_p9 = por %p8943_p8, %p8942_p7 }
 0x100   :  { %220 = dma.hbm_to_vmem [thread:$0]  %s9995_s18, 48, %s215_s15, [#allocation17], %s9127_s26, %s9127_s26, %s9128_s28  }
 0x101   :  { %p8945_p10 = pnand %p8944_p9, %p8938_p6 }
 0x103   :  { %8948 = shalt.err (!%p8945_p10)
}
 0x104   :  { %s9996_s12 = sld [smem:[#allocation61_spill]]  ;;  %s9150_s24 = smov [#allocation24]  }
 0x105   :  { %s261_s20 = sshll.u32 %s9150_s24, 4  ;;  %s9151_s29 = smov [#allocation27]   ;;  %s262_s20 = int_to_ptr.vmem [resolvable:$true] %s261_s20 }
 0x106   :  { %s282_s22 = sshll.u32 %s9151_s29, 4  ;;  %s8957_s27 = scalar_lea.vmem %s262_s20, 16  ;;  %s283_s22 = int_to_ptr.vmem [resolvable:$true] %s282_s22 }
 0x107   :  { %p8958_p11 = scmp.ne.s32.totalorder %s262_s20, %s8957_s27  ;;  %s8961_s0 = scalar_lea.vmem %s262_s20, 32 }
 0x108   :  { %p8962_p12 = scmp.lt.s32.totalorder %s262_s20, %s262_s20  ;;  %p8963_p13 = scmp.lt.s32.totalorder %s8961_s0, %s8957_s27 }
 0x10a   :  { %244 = dma.hbm_to_vmem [thread:$0]  %s9996_s12, 48, %s239_s4, [#allocation20], %s9127_s26, %s9127_s26, %s9128_s28  }
 0x10b   :  { %p8964_p0 = por %p8963_p13, %p8962_p12 }
 0x10d   :  { %p8965_p1 = pnand %p8964_p0, %p8958_p11 }
 0x10f   :  { %8968 = shalt.err (!%p8965_p1)
}
 0x110   :  { %s9997_s23 = sld [smem:[#allocation62_spill]]  ;;  %s8977_s25 = scalar_lea.vmem %s283_s22, 48 }
 0x111   :  { %p8978_p2 = scmp.ne.s32.totalorder %s283_s22, %s8977_s25  ;;  %s8981_s1 = scalar_lea.vmem %s283_s22, 64 }
 0x112   :  { %p8982_p3 = scmp.lt.s32.totalorder %s283_s22, %s283_s22  ;;  %p8983_p4 = scmp.lt.s32.totalorder %s8981_s1, %s8977_s25 }
 0x114   :  { %p8984_p5 = por %p8983_p4, %p8982_p3 }
 0x116   :  { %264 = dma.hbm_to_vmem [thread:$0]  %s9997_s23, 16, %s262_s20, [#allocation23]  }
 0x117   :  { %p8985_p6 = pnand %p8984_p5, %p8978_p2 }
 0x119   :  { %8988 = shalt.err (!%p8985_p6)
}
 0x11a   :  { %s9998_s9 = sld [smem:[#allocation63_spill]]  ;;  %s9152_s10 = smov [#allocation30]  }
 0x11b   :  { %s306_s30 = sshll.u32 %s9152_s10, 4  ;;  %s9153_s3 = smov [#allocation33]   ;;  %s307_s30 = int_to_ptr.vmem [resolvable:$true] %s306_s30 }
 0x11c   :  { %s330_s8 = sshll.u32 %s9153_s3, 4  ;;  %s8997_s11 = scalar_lea.vmem %s307_s30, 768  ;;  %s331_s8 = int_to_ptr.vmem [resolvable:$true] %s330_s8 }
 0x11d   :  { %p8998_p7 = scmp.ne.s32.totalorder %s307_s30, %s8997_s11  ;;  %p9002_p8 = scmp.lt.s32.totalorder %s307_s30, %s307_s30 }
 0x11e   :  { %p9003_p9 = scmp.lt.s32.totalorder %s8997_s11, %s8997_s11 }
 0x120   :  { %288 = dma.hbm_to_vmem [thread:$0]  %s9998_s9, 48, %s283_s22, [#allocation26], %s9127_s26, %s9127_s26, %s9128_s28  }
 0x121   :  { %p9004_p10 = por %p9003_p9, %p9002_p8 }
 0x123   :  { %p9005_p11 = pnand %p9004_p10, %p8998_p7 }
 0x125   :  { %9008 = shalt.err (!%p9005_p11)
}
 0x126   :  { %s9999_s19 = sld [smem:[#allocation64_spill]]  ;;  %s9017_s15 = scalar_lea.vmem %s331_s8, 48 }
 0x127   :  { %p9018_p12 = scmp.ne.s32.totalorder %s331_s8, %s9017_s15  ;;  %s9021_s13 = scalar_lea.vmem %s331_s8, 64 }
 0x128   :  { %p9022_p13 = scmp.lt.s32.totalorder %s331_s8, %s331_s8  ;;  %p9023_p0 = scmp.lt.s32.totalorder %s9021_s13, %s9017_s15 }
 0x12a   :  { %p9024_p1 = por %p9023_p0, %p9022_p13 }
 0x12c   :  { %312 = dma.hbm_to_vmem [thread:$0]  %s9999_s19, 768, %s307_s30, [#allocation29], %s9145_s17, %s9145_s17, %s9127_s26  }
 0x12d   :  { %p9025_p2 = pnand %p9024_p1, %p9018_p12 }
 0x12f   :  { %9028 = shalt.err (!%p9025_p2)
}
 0x130   :  { %s10000_s4 = sld [smem:[#allocation65_spill]]  ;;  %s9154_s2 = smov [#allocation36]  }
 0x131   :  { %s354_s7 = sshll.u32 %s9154_s2, 4  ;;  %s9155_s18 = smov [#allocation39]   ;;  %s355_s7 = int_to_ptr.vmem [resolvable:$true] %s354_s7 }
 0x132   :  { %s377_s21 = sshll.u32 %s9155_s18, 4  ;;  %s9037_s17 = scalar_lea.vmem %s355_s7, 48  ;;  %s378_s21 = int_to_ptr.vmem [resolvable:$true] %s377_s21 }
 0x133   :  { %p9038_p3 = scmp.ne.s32.totalorder %s355_s7, %s9037_s17  ;;  %s9041_s16 = scalar_lea.vmem %s355_s7, 64 }
 0x134   :  { %p9042_p4 = scmp.lt.s32.totalorder %s355_s7, %s355_s7  ;;  %p9043_p5 = scmp.lt.s32.totalorder %s9041_s16, %s9037_s17 }
 0x136   :  { %336 = dma.hbm_to_vmem [thread:$0]  %s10000_s4, 48, %s331_s8, [#allocation32], %s9127_s26, %s9127_s26, %s9128_s28  }
 0x137   :  { %p9044_p6 = por %p9043_p5, %p9042_p4 }
 0x139   :  { %p9045_p7 = pnand %p9044_p6, %p9038_p3 }
 0x13b   :  { %9048 = shalt.err (!%p9045_p7)
}
 0x13c   :  { %360 = dma.hbm_to_vmem [thread:$0]  %s9305_s6, 48, %s355_s7, [#allocation35], %s9127_s26, %s9127_s26, %s9128_s28  }
 0x13d   :  { %s9057_s12 = scalar_lea.vmem %s378_s21, 16  ;;  %s9061_s24 = scalar_lea.vmem %s378_s21, 32 }
 0x13e   :  { %p9058_p8 = scmp.ne.s32.totalorder %s378_s21, %s9057_s12  ;;  %p9062_p9 = scmp.lt.s32.totalorder %s378_s21, %s378_s21 }
 0x13f   :  { %p9063_p10 = scmp.lt.s32.totalorder %s9061_s24, %s9057_s12 }
 0x141   :  { %p9064_p11 = por %p9063_p10, %p9062_p9 }
 0x143   :  { %p9065_p12 = pnand %p9064_p11, %p9058_p8 }
 0x145   :  { %9068 = shalt.err (!%p9065_p12)
}
 0x146   :  { %380 = dma.hbm_to_vmem [thread:$0]  %s9315_s5, 16, %s378_s21, [#allocation38]  }
 0x147   :  { %9069 = dma.done.wait [#allocation3], 48  }
 0x148   :  { %9070 = vsyncadd [#allocation3], 4294967248 }
 0x149   :  { %9071 = dma.done.wait [#allocation5], 96  }
 0x14a   :  { %9072 = vsyncadd [#allocation5], 4294967200 }
 0x14b   :  { %9073 = dma.done.wait [#allocation8], 13056  }
 0x14c   :  { %9074 = vsyncadd [#allocation8], 4294954240 }
 0x14d   :  { %9075 = dma.done.wait [#allocation11], 12336  }
 0x14e   :  { %9076 = vsyncadd [#allocation11], 4294954960 }
 0x14f   :  { %9077 = dma.done.wait [#allocation14], 96  }
 0x150   :  { %9078 = vsyncadd [#allocation14], 4294967200 }
 0x151   :  { %9079 = dma.done.wait [#allocation17], 240  }
 0x152   :  { %9080 = vsyncadd [#allocation17], 4294967056 }
 0x153   :  { %9081 = dma.done.wait [#allocation20], 96  }
 0x154   :  { %9082 = vsyncadd [#allocation20], 4294967200 }
 0x155   :  { %9083 = dma.done.wait [#allocation23], 80  }
 0x156   :  { %9084 = vsyncadd [#allocation23], 4294967216 }
 0x157   :  { %9085 = dma.done.wait [#allocation26], 96  }
 0x158   :  { %9086 = vsyncadd [#allocation26], 4294967200 }
 0x159   :  { %9087 = dma.done.wait [#allocation29], 3840  }
 0x15a   :  { %9088 = vsyncadd [#allocation29], 4294963456 }
 0x15b   :  { %9089 = dma.done.wait [#allocation32], 3120  }
 0x15c   :  { %9090 = vsyncadd [#allocation32], 4294964176 }
 0x15d   :  { %9091 = dma.done.wait [#allocation35], 96  }
 0x15e   :  { %9092 = vsyncadd [#allocation35], 4294967200 }
 0x15f   :  { %9093 = dma.done.wait [#allocation38], 80  }
 0x160   :  { %9094 = vsyncadd [#allocation38], 4294967216  ;;  %s10001_s5 = sld [smem:[#allocation55_spill]]  ;;  %v9156_v0 = vmov 0.0   ;;  %vm9157_vm0 = vmmov 0   ;;  %vm482_vm1 = vcmask 261120  }
 0x161   :  { %s10002_s6 = sld [smem:[#allocation53_spill]]  ;;  %8304 = vmatprep.subr.bf16.mxu0 %v9156_v0  ;;  %8308 = vmatprep.mubr.msk.bf16.mxu0 %vm9157_vm0, %v9156_v0  ;;  %v7851_v5 = vld [vmem:[#allocation2] ss:$0 sm:$0xff]  ;;  %v573_v18 = vld [vmem:[#allocation7 + $0x80] sm:$0xff]  ;;  %v574_v20 = vld [vmem:[#allocation7 + $0x88] sm:$0xff]  ;;  %v9158_v39 = vmov 0  }
 0x162   :  { %v581_v19 = vld [vmem:[#allocation7 + $0xc0] sm:$0xff]  ;;  %v582_v22 = vld [vmem:[#allocation7 + $0xc8] sm:$0xff]  ;;  %v575_v34 = vld [vmem:[#allocation7 + $0x90] sm:$0xff]  ;;  %869 = vmatprep.mubr.bf16.mxu1 %v9158_v39  ;;  %s10003_s26 = sld [smem:[#allocation58_spill]]  ;;  %vm4430_vm2 = vcmask 1043456   ;;  %s9159_s29 = smov 120  }
 0x163   :  { %v7874_v21 = vcombine.high %v573_v18, %v581_v19  ;;  %v7875_v23 = vcombine.low %v574_v20, %v582_v22  ;;  %v7876_v24 = vcombine.high %v574_v20, %v582_v22  ;;  %v7873_v25 = vcombine.low %v573_v18, %v581_v19  ;;  %v557_v26 = vld [vmem:[#allocation7] sm:$0xff]  ;;  %v558_v28 = vld [vmem:[#allocation7 + $0x8] sm:$0xff]  ;;  %v583_v35 = vld [vmem:[#allocation7 + $0xd0] sm:$0xff]  ;;  %s10004_s28 = sld [smem:[#allocation59_spill]]  ;;  %s9160_s22 = smov 112  }
 0x164   :  { %v565_v27 = vld [vmem:[#allocation7 + $0x40] sm:$0xff]  ;;  %v566_v30 = vld [vmem:[#allocation7 + $0x48] sm:$0xff]  ;;  %v576_v36 = vld [vmem:[#allocation7 + $0x98] sm:$0xff]  ;;  %v7878_v37 = vcombine.high %v575_v34, %v583_v35  ;;  %v7877_v40 = vcombine.low %v575_v34, %v583_v35  ;;  %s10005_s20 = sld [smem:[#allocation54_spill]]  ;;  %vm4426_vm3 = vcmask 64512   ;;  %s9161_s27 = smov 32  }
 0x165   :  { %849 = vmatprep.subr.bf16.mxu1 %v7874_v21  ;;  %v7858_v29 = vcombine.high %v557_v26, %v565_v27  ;;  %v7859_v31 = vcombine.low %v558_v28, %v566_v30  ;;  %v7860_v32 = vcombine.high %v558_v28, %v566_v30  ;;  %v7857_v33 = vcombine.low %v557_v26, %v565_v27  ;;  %v584_v38 = vld [vmem:[#allocation7 + $0xd8] sm:$0xff]  ;;  %v559_v51 = vld [vmem:[#allocation7 + $0x10] sm:$0xff]  ;;  %v577_v59 = vld [vmem:[#allocation7 + $0xa0] sm:$0xff] }
 0x166   :  { %v8433_v1 = vld [vmem:[%s10001_s5 + $0x8] sm:$0xff]   ;;  %v8434_v2 = vld [vmem:[%s10001_s5] sm:$0xff]   ;;  %850 = vmatpush1.bf16.msra.mxu1 %v7873_v25  ;;  %v7879_v41 = vcombine.low %v576_v36, %v584_v38  ;;  %v7880_v42 = vcombine.high %v576_v36, %v584_v38  ;;  %v578_v61 = vld [vmem:[#allocation7 + $0xa8] sm:$0xff]  ;;  %vm7802_vm4 = vcmask 392192  }
 0x167   :  { %8305 = vmatpush3.bf16.msra.mxu0 %v8433_v1  ;;  %v457_v3 = vld [vmem:[%s10002_s6] sm:$0xff]  ;;  %851 = vmatprep.subr.bf16.mxu1 %v7858_v29  ;;  %v7856_v49 = vld [vmem:[#allocation6] ss:$0 sm:$0xff]  ;;  %v585_v60 = vld [vmem:[#allocation7 + $0xe0] sm:$0xff] }
 0x168   :  { %8306 = vmatprep.subr.bf16.mxu0 %v9156_v0  ;;  %v462_v4 = vpack.c.bf16 %v457_v3, %v457_v3  ;;  %v7855_v47 = vld [vmem:[#allocation4] ss:$0 sm:$0xff]  ;;  %v567_v52 = vld [vmem:[#allocation7 + $0x50] sm:$0xff]  ;;  %v586_v62 = vld [vmem:[#allocation7 + $0xe8] sm:$0xff] }
 0x169   :  { %v560_v53 = vld [vmem:[#allocation7 + $0x18] sm:$0xff]  ;;  %v7862_v57 = vcombine.high %v559_v51, %v567_v52  ;;  %v7861_v63 = vcombine.low %v559_v51, %v567_v52  ;;  %v563_v20 = vld [vmem:[#allocation7 + $0x30] sm:$0xff]  ;;  %v1208_v51 = vld [vmem:[#allocation10 + $0xd8] sm:$0xff] }
 0x16a   :  { %852 = vmatpush1.bf16.msra.mxu1 %v7857_v33  ;;  %v568_v54 = vld [vmem:[#allocation7 + $0x58] sm:$0xff]  ;;  %v571_v21 = vld [vmem:[#allocation7 + $0x70] sm:$0xff] }
 0x16b   :  { %8307 = vmatpush3.bf16.msra.mxu0 %v8434_v2  ;;  %931 = vmatprep.subr.bf16.mxu1 %v7878_v37  ;;  %v7864_v58 = vcombine.high %v560_v53, %v568_v54  ;;  %v7863_v1 = vcombine.low %v560_v53, %v568_v54  ;;  %v7882_v2 = vcombine.high %v577_v59, %v585_v60  ;;  %v564_v22 = vld [vmem:[#allocation7 + $0x38] sm:$0xff]  ;;  %v1197_v28 = vld [vmem:[#allocation10 + $0x80] sm:$0xff] }
 0x16c   :  { %890 = vmatprep.subr.bf16.mxu0 %v7876_v24  ;;  %v7870_v26 = vcombine.high %v563_v20, %v571_v21  ;;  %v1205_v29 = vld [vmem:[#allocation10 + $0xc0] sm:$0xff]  ;;  %v1198_v30 = vld [vmem:[#allocation10 + $0x88] sm:$0xff] }
 0x16d   :  { %v7915_v34 = vcombine.high %v1197_v28, %v1205_v29  ;;  %v7914_v36 = vcombine.low %v1197_v28, %v1205_v29  ;;  %v1181_v38 = vld [vmem:[#allocation10] sm:$0xff] }
 0x16e   :  { %8309 = vmatmul.mubr.msk.bf16.vlgmr.msra.gmra.mxu0 %vm482_vm1, %v462_v4  ;;  %v561_v4 = vld [vmem:[#allocation7 + $0x20] sm:$0xff] }
 0x16f   :  { %891 = vmatpush1.bf16.msra.mxu0 %v7875_v23  ;;  %910 = vmatprep.mubr.bf16.mxu0 %v9158_v39  ;;  %v572_v23 = vld [vmem:[#allocation7 + $0x78] sm:$0xff] }
 0x170   :  { %892 = vmatprep.subr.bf16.mxu0 %v7860_v32  ;;  %v7872_v27 = vcombine.high %v564_v22, %v572_v23  ;;  %v7869_v32 = vcombine.low %v563_v20, %v571_v21  ;;  %v7871_v33 = vcombine.low %v564_v22, %v572_v23  ;;  %v1191_v21 = vld [vmem:[#allocation10 + $0x50] sm:$0xff]  ;;  %v1184_v22 = vld [vmem:[#allocation10 + $0x18] sm:$0xff] }
 0x171   :  { %v1192_v23 = vld [vmem:[#allocation10 + $0x58] sm:$0xff] }
 0x173   :  { %893 = vmatpush1.bf16.msra.mxu0 %v7859_v31  ;;  %v1206_v31 = vld [vmem:[#allocation10 + $0xc8] sm:$0xff] }
 0x174   :  { %972 = vmatprep.subr.bf16.mxu0 %v7880_v42  ;;  %v7917_v35 = vcombine.high %v1198_v30, %v1206_v31  ;;  %v7916_v37 = vcombine.low %v1198_v30, %v1206_v31 }
 0x22e   :  { %v520_v6 = vpop.f32.mrf.mxu0 }
 0x22f   :  { %v521_v7 = vadd.f32 %v7851_v5, %v520_v6  ;;  %v569_v5 = vld [vmem:[#allocation7 + $0x60] sm:$0xff]  ;;  %v562_v6 = vld [vmem:[#allocation7 + $0x28] sm:$0xff] }
 0x230   :  { %v8310_v8 = vpop.f32.mrf.mxu0 }
 0x231   :  { %v526_v9 = vadd.f32 %v521_v7, %v457_v3  ;;  %v7884_v3 = vcombine.high %v578_v61, %v586_v62  ;;  %v570_v7 = vld [vmem:[#allocation7 + $0x68] sm:$0xff]  ;;  %v7881_v8 = vcombine.low %v577_v59, %v585_v60  ;;  %v9457_v60 = vld [vmem:[#allocation9] sm:$0xff] }
 0x232   :  { %v523_v10 = vpop.f32.mrf.mxu0 }
 0x233   :  { %v529_v11 = vsel %vm482_vm1, %v526_v9, 0.0  ;;  %v7866_v10 = vcombine.high %v561_v4, %v569_v5 }
 0x234   :  { %530 = vadd.xlane.f32.xlu0 %v529_v11  ;;  %v8311_v12 = vpop.f32.mrf.mxu0  ;;  %v7868_v11 = vcombine.high %v562_v6, %v570_v7 }
 0x235   :  { %v579_v12 = vld [vmem:[#allocation7 + $0xb0] sm:$0xff] }
 0x2bd   :  { %v531_v13 = vpop.xlane.xlu0 %530 }
 0x2be   :  { %v533_v14 = vmul.f32 0.03125, %v531_v13  ;;  %v587_v13 = vld [vmem:[#allocation7 + $0xf0] sm:$0xff] }
 0x2bf   :  { %v7886_v18 = vcombine.high %v579_v12, %v587_v13  ;;  %v7885_v24 = vcombine.low %v579_v12, %v587_v13 }
 0x2c0   :  { %v534_v15 = vsub.f32 %v526_v9, %v533_v14  ;;  %v7883_v9 = vcombine.low %v578_v61, %v586_v62  ;;  %v580_v14 = vld [vmem:[#allocation7 + $0xb8] sm:$0xff] }
 0x2c2   :  { %v535_v16 = vmul.f32 %v534_v15, %v534_v15 }
 0x2c4   :  { %v536_v17 = vsel %vm482_vm1, %v535_v16, 0.0  ;;  %v7865_v16 = vcombine.low %v561_v4, %v569_v5 }
 0x2c5   :  { %537 = vadd.xlane.f32.xlu0 %v536_v17  ;;  %v7867_v17 = vcombine.low %v562_v6, %v570_v7 }
 0x34e   :  { %v538_v43 = vpop.xlane.xlu0 %537 }
 0x34f   :  { %v539_v44 = vmul.f32 0.03125, %v538_v43  ;;  %v1190_v43 = vld [vmem:[#allocation10 + $0x48] sm:$0xff] }
 0x351   :  { %v540_v45 = vadd.f32 1e-05, %v539_v44 }
 0x353   :  { %8537 = vrsqrt.f32 %v540_v45 }
 0x360   :  { %v8538_v46 = vpop.eup %8537 }
 0x361   :  { %v542_v48 = vmul.f32 %v8538_v46, %v534_v15  ;;  %v588_v15 = vld [vmem:[#allocation7 + $0xf8] sm:$0xff] }
 0x362   :  { %v7888_v19 = vcombine.high %v580_v14, %v588_v15  ;;  %v7887_v25 = vcombine.low %v580_v14, %v588_v15 }
 0x363   :  { %v549_v50 = vmul.f32 %v7855_v47, %v542_v48  ;;  %v9449_v47 = vld [vmem:[#allocation10 + $0x90] sm:$0xff] }
 0x364   :  { %v1207_v48 = vld [vmem:[#allocation10 + $0xd0] sm:$0xff] }
 0x365   :  { %v9421_v55 = vadd.f32 %v7856_v49, %v549_v50  ;;  %v1200_v49 = vld [vmem:[#allocation10 + $0x98] sm:$0xff]  ;;  %v7919_v50 = vcombine.high %v9449_v47, %v1207_v48  ;;  %v7918_v52 = vcombine.low %v9449_v47, %v1207_v48  ;;  %v1201_v47 = vld [vmem:[#allocation10 + $0xa0] sm:$0xff] }
 0x366   :  { %v7920_v53 = vcombine.low %v1200_v49, %v1208_v51  ;;  %v7921_v54 = vcombine.high %v1200_v49, %v1208_v51  ;;  %v1202_v51 = vld [vmem:[#allocation10 + $0xa8] sm:$0xff] }
 0x367   :  { %v9425_v56 = vpack.c.bf16 %v9421_v55, %v9421_v55 }
 0x369   :  { %7889 = vmatmul.mubr.msk.bf16.vlgmr.msra.gmra.mxu1 %vm482_vm1, %v9425_v56  ;;  %7890 = vmatmul.mubr.msk.bf16.vlgmr.msra.gmra.mxu0 %vm482_vm1, %v9425_v56 }
 0x36a   :  { %932 = vmatpush1.bf16.msra.mxu1 %v7877_v40  ;;  %973 = vmatpush1.bf16.msra.mxu0 %v7879_v41  ;;  %v1189_v40 = vld [vmem:[#allocation10 + $0x40] sm:$0xff]  ;;  %v1182_v41 = vld [vmem:[#allocation10 + $0x8] sm:$0xff] }
 0x36b   :  { %933 = vmatprep.subr.bf16.mxu1 %v7862_v57  ;;  %974 = vmatprep.subr.bf16.mxu0 %v7864_v58  ;;  %v7899_v42 = vcombine.high %v1181_v38, %v1189_v40  ;;  %v7898_v44 = vcombine.low %v1181_v38, %v1189_v40  ;;  %v7900_v45 = vcombine.low %v1182_v41, %v1190_v43 }
 0x36c   :  { %951 = vmatprep.mubr.bf16.mxu1 %v9158_v39  ;;  %992 = vmatprep.mubr.bf16.mxu0 %v9158_v39  ;;  %v7901_v46 = vcombine.high %v1182_v41, %v1190_v43 }
 0x36e   :  { %934 = vmatpush1.bf16.msra.mxu1 %v7861_v63  ;;  %975 = vmatpush1.bf16.msra.mxu0 %v7863_v1 }
 0x36f   :  { %1013 = vmatprep.subr.bf16.mxu1 %v7882_v2  ;;  %1054 = vmatprep.subr.bf16.mxu0 %v7884_v3 }
 0x371   :  { %7891 = vmatmul.mubr.msk.bf16.vlgmr.msra.gmra.mxu1 %vm482_vm1, %v9425_v56  ;;  %7892 = vmatmul.mubr.msk.bf16.vlgmr.msra.gmra.mxu0 %vm482_vm1, %v9425_v56 }
 0x372   :  { %1014 = vmatpush1.bf16.msra.mxu1 %v7881_v8  ;;  %1055 = vmatpush1.bf16.msra.mxu0 %v7883_v9 }
 0x373   :  { %1015 = vmatprep.subr.bf16.mxu1 %v7866_v10  ;;  %1056 = vmatprep.subr.bf16.mxu0 %v7868_v11 }
 0x374   :  { %1033 = vmatprep.mubr.bf16.mxu1 %v9158_v39  ;;  %1074 = vmatprep.mubr.bf16.mxu0 %v9158_v39 }
 0x376   :  { %1016 = vmatpush1.bf16.msra.mxu1 %v7865_v16  ;;  %1057 = vmatpush1.bf16.msra.mxu0 %v7867_v17 }
 0x377   :  { %1095 = vmatprep.subr.bf16.mxu1 %v7886_v18  ;;  %1136 = vmatprep.subr.bf16.mxu0 %v7888_v19  ;;  %v9475_v18 = vld [vmem:[#allocation10 + $0x10] sm:$0xff] }
 0x379   :  { %7893 = vmatmul.mubr.msk.bf16.vlgmr.msra.gmra.mxu1 %vm482_vm1, %v9425_v56  ;;  %7894 = vmatmul.mubr.msk.bf16.vlgmr.msra.gmra.mxu0 %vm482_vm1, %v9425_v56 }
 0x37a   :  { %1096 = vmatpush1.bf16.msra.mxu1 %v7885_v24  ;;  %1137 = vmatpush1.bf16.msra.mxu0 %v7887_v25 }
 0x37b   :  { %1097 = vmatprep.subr.bf16.mxu1 %v7870_v26  ;;  %1138 = vmatprep.subr.bf16.mxu0 %v7872_v27 }
 0x37c   :  { %1115 = vmatprep.mubr.bf16.mxu1 %v9158_v39  ;;  %1156 = vmatprep.mubr.bf16.mxu0 %v9158_v39 }
 0x37e   :  { %1098 = vmatpush1.bf16.msra.mxu1 %v7869_v32  ;;  %1139 = vmatpush1.bf16.msra.mxu0 %v7871_v33 }
 0x37f   :  { %1408 = vmatprep.subr.bf16.mxu1 %v7915_v34  ;;  %1448 = vmatprep.subr.bf16.mxu0 %v7917_v35 }
 0x381   :  { %7895 = vmatmul.mubr.msk.bf16.vlgmr.msra.gmra.mxu1 %vm482_vm1, %v9425_v56  ;;  %7896 = vmatmul.mubr.msk.bf16.vlgmr.msra.gmra.mxu0 %vm482_vm1, %v9425_v56  ;;  %v594_v56 = vlaneseq }
 0x382   :  { %1409 = vmatpush1.bf16.xpose.msra.mxu1 %v7914_v36  ;;  %1449 = vmatpush1.bf16.xpose.msra.mxu0 %v7916_v37  ;;  %v7903_v36 = vcombine.high %v9475_v18, %v1191_v21  ;;  %v7905_v37 = vcombine.high %v1184_v22, %v1192_v23 }
 0x383   :  { %1410 = vmatprep.subr.bf16.mxu1 %v7899_v42  ;;  %1450 = vmatprep.subr.bf16.mxu0 %v7901_v46  ;;  %v595_v57 = vshrl.u32 %v594_v56, 7 }
 0x385   :  { %v9453_v58 = vsub.s32 0, %v595_v57  ;;  %v9455_v59 = vsub.s32 2, %v595_v57  ;;  %v9459_v61 = vsub.s32 1, %v595_v57  ;;  %v9461_v62 = vsub.s32 3, %v595_v57 }
 0x386   :  { %v9471_v12 = vsub.s32 5, %v595_v57  ;;  %v9473_v13 = vsub.s32 7, %v595_v57  ;;  %v9477_v26 = vsub.s32 4, %v595_v57  ;;  %v9479_v27 = vsub.s32 6, %v595_v57 }
 0x387   :  { %v597_v63 = vrot.slane %v9457_v60, %v9453_v58  ;;  %v605_v1 = vrot.slane %v9457_v60, %v9455_v59  ;;  %v601_v2 = vrot.slane %v9457_v60, %v9459_v61  ;;  %v609_v3 = vrot.slane %v9457_v60, %v9461_v62 }
 0x388   :  { %v617_v30 = vrot.slane %v9457_v60, %v9471_v12  ;;  %v625_v31 = vrot.slane %v9457_v60, %v9473_v13  ;;  %v613_v43 = vrot.slane %v9457_v60, %v9477_v26 }
 0x38a   :  { %1411 = vmatpush1.bf16.xpose.msra.mxu1 %v7898_v44  ;;  %1451 = vmatpush1.bf16.xpose.msra.mxu0 %v7900_v45  ;;  %v621_v44 = vrot.slane %v9457_v60, %v9479_v27 }
 0x38b   :  { %1488 = vmatprep.subr.bf16.mxu1 %v7919_v50  ;;  %1528 = vmatprep.subr.bf16.mxu0 %v7921_v54  ;;  %v1209_v50 = vld [vmem:[#allocation10 + $0xe0] sm:$0xff]  ;;  %v1210_v54 = vld [vmem:[#allocation10 + $0xe8] sm:$0xff] }
 0x429   :  { %v871_v4 = vpop.f32.mrf.mxu1  ;;  %v912_v5 = vpop.f32.mrf.mxu0 }
 0x42a   :  { %v872_v6 = vadd.f32 %v871_v4, %v597_v63  ;;  %v913_v7 = vadd.f32 %v912_v5, %v605_v1  ;;  %v7904_v63 = vcombine.low %v1184_v22, %v1192_v23  ;;  %v1185_v22 = vld [vmem:[#allocation10 + $0x20] sm:$0xff] }
 0x42b   :  { %v873_v8 = vpop.f32.mrf.mxu1  ;;  %v914_v9 = vpop.f32.mrf.mxu0 }
 0x42c   :  { %v874_v10 = vadd.f32 %v873_v8, %v601_v2  ;;  %v915_v11 = vadd.f32 %v914_v9, %v609_v3  ;;  %v1165_v14 = vmax.f32 %v872_v6, 0.0  ;;  %v1167_v15 = vmax.f32 %v913_v7, 0.0 }
 0x42d   :  { %v875_v16 = vpop.f32.mrf.mxu1  ;;  %v916_v17 = vpop.f32.mrf.mxu0  ;;  %v7923_v8 = vcombine.high %v1201_v47, %v1209_v50  ;;  %v7925_v9 = vcombine.high %v1202_v51, %v1210_v54 }
 0x42e   :  { %v1166_v19 = vmax.f32 %v874_v10, 0.0  ;;  %v1168_v20 = vmax.f32 %v915_v11, 0.0  ;;  %v1213_v32 = vpack.c.bf16 %v1165_v14, %v1165_v14  ;;  %v1215_v33 = vpack.c.bf16 %v1167_v15, %v1167_v15 }
 0x42f   :  { %v876_v24 = vpop.f32.mrf.mxu1  ;;  %v917_v25 = vpop.f32.mrf.mxu0 }
 0x430   :  { %v1214_v28 = vpack.c.bf16 %v1166_v19, %v1166_v19  ;;  %v1216_v29 = vpack.c.bf16 %v1168_v20, %v1168_v20  ;;  %v1193_v25 = vld [vmem:[#allocation10 + $0x60] sm:$0xff] }
 0x431   :  { %v953_v34 = vpop.f32.mrf.mxu1  ;;  %v994_v35 = vpop.f32.mrf.mxu0 }
 0x432   :  { %1428 = vmatprep.mubr.bf16.mxu1 %v1214_v28  ;;  %1468 = vmatprep.mubr.bf16.mxu0 %v1216_v29  ;;  %v954_v4 = vadd.f32 %v953_v34, %v613_v43  ;;  %v995_v5 = vadd.f32 %v994_v35, %v621_v44  ;;  %v1186_v28 = vld [vmem:[#allocation10 + $0x28] sm:$0xff] }
 0x433   :  { %v955_v38 = vpop.f32.mrf.mxu1  ;;  %v996_v40 = vpop.f32.mrf.mxu0  ;;  %1429 = vmatmul.mubr.bf16.vlgmr.msra.gmra.mxu1 %v1213_v32  ;;  %1469 = vmatmul.mubr.bf16.vlgmr.msra.gmra.mxu0 %v1215_v33  ;;  %v1194_v29 = vld [vmem:[#allocation10 + $0x68] sm:$0xff] }
 0x434   :  { %v956_v41 = vadd.f32 %v955_v38, %v617_v30  ;;  %v997_v42 = vadd.f32 %v996_v40, %v625_v31  ;;  %1489 = vmatpush1.bf16.xpose.msra.mxu1 %v7918_v52  ;;  %1529 = vmatpush1.bf16.xpose.msra.mxu0 %v7920_v53  ;;  %v9490_v52 = vld [vmem:[#allocation9 + $0x8] sm:$0xff]  ;;  %v7902_v53 = vcombine.low %v9475_v18, %v1191_v21  ;;  %v1169_v16 = vmax.f32 %v954_v4, 0.0 }
 0x435   :  { %v957_v45 = vpop.f32.mrf.mxu1  ;;  %v998_v46 = vpop.f32.mrf.mxu0  ;;  %1490 = vmatprep.subr.bf16.mxu1 %v7903_v36  ;;  %1530 = vmatprep.subr.bf16.mxu0 %v7905_v37  ;;  %v633_v60 = vrot.slane %v9490_v52, %v9459_v61  ;;  %v641_v3 = vrot.slane %v9490_v52, %v9461_v62  ;;  %v1171_v17 = vmax.f32 %v995_v5, 0.0  ;;  %v7922_v31 = vcombine.low %v1201_v47, %v1209_v50  ;;  %v1203_v47 = vld [vmem:[#allocation10 + $0xb0] sm:$0xff] }
 0x436   :  { %v1170_v48 = vmax.f32 %v956_v41, 0.0  ;;  %v1172_v49 = vmax.f32 %v997_v42, 0.0  ;;  %v1217_v32 = vpack.c.bf16 %v1169_v16, %v1169_v16  ;;  %v7924_v37 = vcombine.low %v1202_v51, %v1210_v54  ;;  %v1204_v54 = vld [vmem:[#allocation10 + $0xb8] sm:$0xff] }
 0x437   :  { %v958_v56 = vpop.f32.mrf.mxu1  ;;  %v999_v57 = vpop.f32.mrf.mxu0  ;;  %v1219_v33 = vpack.c.bf16 %v1171_v17, %v1171_v17  ;;  %v7907_v38 = vcombine.high %v1185_v22, %v1193_v25  ;;  %v7909_v40 = vcombine.high %v1186_v28, %v1194_v29  ;;  %v629_v43 = vrot.slane %v9490_v52, %v9453_v58  ;;  %v1188_v17 = vld [vmem:[#allocation10 + $0x38] sm:$0xff] }
 0x438   :  { %v1218_v1 = vpack.c.bf16 %v1170_v48, %v1170_v48  ;;  %v1220_v2 = vpack.c.bf16 %v1172_v49, %v1172_v49  ;;  %v637_v46 = vrot.slane %v9490_v52, %v9455_v59  ;;  %v1211_v48 = vld [vmem:[#allocation10 + $0xf0] sm:$0xff]  ;;  %v649_v49 = vrot.slane %v9490_v52, %v9471_v12  ;;  %v1212_v56 = vld [vmem:[#allocation10 + $0xf8] sm:$0xff] }
 0x439   :  { %v1035_v6 = vpop.f32.mrf.mxu1  ;;  %v1076_v7 = vpop.f32.mrf.mxu0  ;;  %v657_v57 = vrot.slane %v9490_v52, %v9473_v13  ;;  %v7926_v16 = vcombine.low %v1203_v47, %v1211_v48 }
 0x43a   :  { %1508 = vmatprep.mubr.bf16.mxu1 %v1218_v1  ;;  %1548 = vmatprep.mubr.bf16.mxu0 %v1220_v2  ;;  %v7908_v1 = vcombine.low %v1186_v28, %v1194_v29  ;;  %v7927_v2 = vcombine.high %v1203_v47, %v1211_v48 }
 0x43b   :  { %v1037_v10 = vpop.f32.mrf.mxu1  ;;  %v1078_v11 = vpop.f32.mrf.mxu0 }
 0x43c   :  { %v1038_v14 = vadd.f32 %v1037_v10, %v633_v60  ;;  %v1079_v15 = vadd.f32 %v1078_v11, %v641_v3  ;;  %1491 = vmatpush1.bf16.xpose.msra.mxu1 %v7902_v53  ;;  %1531 = vmatpush1.bf16.xpose.msra.mxu0 %v7904_v63  ;;  %v7906_v53 = vcombine.low %v1185_v22, %v1193_v25  ;;  %v1187_v11 = vld [vmem:[#allocation10 + $0x30] sm:$0xff] }
 0x43d   :  { %v1039_v18 = vpop.f32.mrf.mxu1  ;;  %v1080_v19 = vpop.f32.mrf.mxu0  ;;  %1568 = vmatprep.subr.bf16.mxu1 %v7923_v8  ;;  %1608 = vmatprep.subr.bf16.mxu0 %v7925_v9  ;;  %v1036_v63 = vadd.f32 %v1035_v6, %v629_v43  ;;  %v1077_v60 = vadd.f32 %v1076_v7, %v637_v46  ;;  %v7929_v3 = vcombine.high %v1204_v54, %v1212_v56 }
 0x43e   :  { %v1174_v20 = vmax.f32 %v1038_v14, 0.0  ;;  %v1176_v21 = vmax.f32 %v1079_v15, 0.0  ;;  %v1195_v14 = vld [vmem:[#allocation10 + $0x70] sm:$0xff]  ;;  %v1196_v18 = vld [vmem:[#allocation10 + $0x78] sm:$0xff]  ;;  %v7928_v19 = vcombine.low %v1204_v54, %v1212_v56  ;;  %v653_v25 = vrot.slane %v9490_v52, %v9479_v27  ;;  %v7897_v54 = vld [vmem:[#allocation12] ss:$0 sm:$0xff] }
 0x43f   :  { %v1040_v23 = vpop.f32.mrf.mxu1  ;;  %v1081_v24 = vpop.f32.mrf.mxu0  ;;  %v1173_v8 = vmax.f32 %v1036_v63, 0.0  ;;  %v1175_v9 = vmax.f32 %v1077_v60, 0.0  ;;  %v7911_v7 = vcombine.high %v1187_v11, %v1195_v14  ;;  %v7913_v22 = vcombine.high %v1188_v17, %v1196_v18 }
 0x440   :  { %v1222_v30 = vpack.c.bf16 %v1174_v20, %v1174_v20  ;;  %v1224_v34 = vpack.c.bf16 %v1176_v21, %v1176_v21  ;;  %v645_v24 = vrot.slane %v9490_v52, %v9477_v26  ;;  %v7910_v28 = vcombine.low %v1187_v11, %v1195_v14 }
 0x441   :  { %v9497_v35 = vpop.f32.mrf.mxu1  ;;  %v9499_v36 = vpop.f32.mrf.mxu0  ;;  %v1221_v6 = vpack.c.bf16 %v1173_v8, %v1173_v8  ;;  %v1223_v20 = vpack.c.bf16 %v1175_v9, %v1175_v9 }
 0x442   :  { %v1118_v29 = vadd.f32 %v9497_v35, %v645_v24 }
 0x443   :  { %1509 = vmatmul.mubr.bf16.vlgmr.msra.gmra.mxu1 %v1217_v32  ;;  %1549 = vmatmul.mubr.bf16.vlgmr.msra.gmra.mxu0 %v1219_v33  ;;  %v1119_v41 = vpop.f32.mrf.mxu1  ;;  %v1160_v42 = vpop.f32.mrf.mxu0 }
 0x444   :  { %1569 = vmatpush1.bf16.xpose.msra.mxu1 %v7922_v31  ;;  %1588 = vmatprep.mubr.bf16.mxu1 %v1222_v30  ;;  %v1120_v4 = vadd.f32 %v1119_v41, %v649_v49  ;;  %v1161_v5 = vadd.f32 %v1160_v42, %v657_v57  ;;  %v7912_v30 = vcombine.low %v1188_v17, %v1196_v18  ;;  %v1177_v32 = vmax.f32 %v1118_v29, 0.0 }
 0x445   :  { %1609 = vmatpush1.bf16.xpose.msra.mxu0 %v7924_v37  ;;  %1628 = vmatprep.mubr.bf16.mxu0 %v1224_v34  ;;  %v1121_v44 = vpop.f32.mrf.mxu1  ;;  %v1162_v45 = vpop.f32.mrf.mxu0  ;;  %v1159_v31 = vadd.f32 %v9499_v36, %v653_v25 }
 0x446   :  { %1570 = vmatprep.subr.bf16.mxu1 %v7907_v38  ;;  %1610 = vmatprep.subr.bf16.mxu0 %v7909_v40  ;;  %v1178_v10 = vmax.f32 %v1120_v4, 0.0  ;;  %v1180_v15 = vmax.f32 %v1161_v5, 0.0  ;;  %v1225_v34 = vpack.c.bf16 %v1177_v32, %v1177_v32  ;;  %v8436_v32 = vld [vmem:[%s10001_s5 + $0x10] sm:$0xff]  }
 0x447   :  { %v1122_v50 = vpop.f32.mrf.mxu1  ;;  %v1163_v51 = vpop.f32.mrf.mxu0  ;;  %v1179_v33 = vmax.f32 %v1159_v31, 0.0  ;;  %v8435_v31 = vld [vmem:[%s10001_s5 + $0x18] sm:$0xff]  }
 0x448   :  { %v1226_v21 = vpack.c.bf16 %v1178_v10, %v1178_v10  ;;  %v1228_v23 = vpack.c.bf16 %v1180_v15, %v1180_v15 }
 0x449   :  { %v1227_v37 = vpack.c.bf16 %v1179_v33, %v1179_v33 }
 0x44c   :  { %1571 = vmatpush1.bf16.xpose.msra.mxu1 %v7906_v53 }
 0x44d   :  { %1611 = vmatpush1.bf16.xpose.msra.mxu0 %v7908_v1  ;;  %1648 = vmatprep.subr.bf16.mxu1 %v7927_v2 }
 0x44e   :  { %1688 = vmatprep.subr.bf16.mxu0 %v7929_v3 }
 0x453   :  { %1589 = vmatmul.mubr.bf16.vlgmr.msra.gmra.mxu1 %v1221_v6 }
 0x454   :  { %1629 = vmatmul.mubr.bf16.vlgmr.msra.gmra.mxu0 %v1223_v20  ;;  %1649 = vmatpush1.bf16.xpose.msra.mxu1 %v7926_v16 }
 0x455   :  { %1668 = vmatprep.mubr.bf16.mxu1 %v1226_v21  ;;  %1689 = vmatpush1.bf16.xpose.msra.mxu0 %v7928_v19 }
 0x456   :  { %1708 = vmatprep.mubr.bf16.mxu0 %v1228_v23  ;;  %1650 = vmatprep.subr.bf16.mxu1 %v7911_v7 }
 0x457   :  { %1690 = vmatprep.subr.bf16.mxu0 %v7913_v22 }
 0x45c   :  { %1651 = vmatpush1.bf16.xpose.msra.mxu1 %v7910_v28 }
 0x45d   :  { %1691 = vmatpush1.bf16.xpose.msra.mxu0 %v7912_v30  ;;  %8312 = vmatprep.subr.bf16.mxu1 %v9156_v0 }
 0x463   :  { %1669 = vmatmul.mubr.bf16.vlgmr.msra.gmra.mxu1 %v1225_v34 }
 0x464   :  { %1709 = vmatmul.mubr.bf16.vlgmr.msra.gmra.mxu0 %v1227_v37  ;;  %8316 = vmatprep.mubr.msk.bf16.mxu1 %vm9157_vm0, %v9156_v0 }
 0x465   :  { %2161 = vmatprep.mubr.bf16.mxu0 %v9158_v39  ;;  %8313 = vmatpush3.bf16.msra.mxu1 %v8435_v31 }
 0x466   :  { %8314 = vmatprep.subr.bf16.mxu1 %v9156_v0 }
 0x469   :  { %8315 = vmatpush3.bf16.msra.mxu1 %v8436_v32  ;;  %v7941_v32 = vld [vmem:[#allocation6 + $0x1] ss:$0 sm:$0xff] }
 0x4f3   :  { %v1430_v52 = vpop.f32.mrf.mxu1  ;;  %v1470_v35 = vpop.f32.mrf.mxu0 }
 0x4f4   :  { %v1431_v56 = vadd.f32 %v7897_v54, %v1430_v52  ;;  %v7930_v52 = vld [vmem:[#allocation13] ss:$0 sm:$0xff] }
 0x4f5   :  { %v1432_v38 = vpop.f32.mrf.mxu1  ;;  %v1472_v40 = vpop.f32.mrf.mxu0 }
 0x4f6   :  { %v1471_v1 = vadd.f32 %v1470_v35, %v1431_v56  ;;  %v7931_v38 = vld [vmem:[#allocation15] ss:$0 sm:$0xff] }
 0x4f7   :  { %v1433_v36 = vpop.f32.mrf.mxu1  ;;  %v1473_v41 = vpop.f32.mrf.mxu0 }
 0x4f9   :  { %v1434_v42 = vpop.f32.mrf.mxu1  ;;  %v1474_v43 = vpop.f32.mrf.mxu0 }
 0x4fa   :  { %v7936_v42 = vld [vmem:[#allocation2 + $0x1] ss:$0 sm:$0xff] }
 0x503   :  { %v1510_v44 = vpop.f32.mrf.mxu1  ;;  %v1550_v45 = vpop.f32.mrf.mxu0 }
 0x504   :  { %v1511_v3 = vadd.f32 %v1510_v44, %v1471_v1  ;;  %v1865_v1 = vld [vmem:[#allocation7 + $0x188] sm:$0xff] }
 0x505   :  { %v1512_v46 = vpop.f32.mrf.mxu1  ;;  %v1552_v47 = vpop.f32.mrf.mxu0 }
 0x506   :  { %v1551_v9 = vadd.f32 %v1550_v45, %v1511_v3 }
 0x507   :  { %v1513_v48 = vpop.f32.mrf.mxu1  ;;  %v1553_v49 = vpop.f32.mrf.mxu0 }
 0x509   :  { %v1514_v50 = vpop.f32.mrf.mxu1  ;;  %v1554_v51 = vpop.f32.mrf.mxu0 }
 0x513   :  { %v1590_v57 = vpop.f32.mrf.mxu1 }
 0x514   :  { %v1630_v53 = vpop.f32.mrf.mxu0  ;;  %v1591_v10 = vadd.f32 %v1590_v57, %v1551_v9  ;;  %v1856_v9 = vld [vmem:[#allocation7 + $0x140] sm:$0xff] }
 0x515   :  { %v1592_v63 = vpop.f32.mrf.mxu1 }
 0x516   :  { %v1632_v2 = vpop.f32.mrf.mxu0  ;;  %v1631_v11 = vadd.f32 %v1630_v53, %v1591_v10  ;;  %v1864_v53 = vld [vmem:[#allocation7 + $0x180] sm:$0xff]  ;;  %v1849_v10 = vld [vmem:[#allocation7 + $0x108] sm:$0xff] }
 0x517   :  { %v1593_v60 = vpop.f32.mrf.mxu1  ;;  %v1872_v63 = vld [vmem:[#allocation7 + $0x1c0] sm:$0xff] }
 0x518   :  { %v1633_v4 = vpop.f32.mrf.mxu0  ;;  %v7959_v2 = vcombine.high %v1864_v53, %v1872_v63  ;;  %v1873_v60 = vld [vmem:[#allocation7 + $0x1c8] sm:$0xff]  ;;  %v7958_v3 = vcombine.low %v1864_v53, %v1872_v63 }
 0x519   :  { %v1594_v5 = vpop.f32.mrf.mxu1  ;;  %v7960_v4 = vcombine.low %v1865_v1, %v1873_v60 }
 0x51a   :  { %v1634_v8 = vpop.f32.mrf.mxu0  ;;  %v7961_v5 = vcombine.high %v1865_v1, %v1873_v60  ;;  %2141 = vmatprep.subr.bf16.mxu0 %v7959_v2  ;;  %v1870_v1 = vld [vmem:[#allocation7 + $0x1b0] sm:$0xff]  ;;  %v1871_v60 = vld [vmem:[#allocation7 + $0x1b8] sm:$0xff] }
 0x51b   :  { %2142 = vmatpush1.bf16.msra.mxu0 %v7958_v3  ;;  %v1848_v8 = vld [vmem:[#allocation7 + $0x100] sm:$0xff]  ;;  %v1878_v2 = vld [vmem:[#allocation7 + $0x1f0] sm:$0xff]  ;;  %v1879_v3 = vld [vmem:[#allocation7 + $0x1f8] sm:$0xff] }
 0x51c   :  { %2182 = vmatprep.subr.bf16.mxu1 %v7961_v5 }
 0x523   :  { %v1670_v14 = vpop.f32.mrf.mxu1 }
 0x524   :  { %v1671_v15 = vadd.f32 %v1670_v14, %v1631_v11  ;;  %v1710_v16 = vpop.f32.mrf.mxu0  ;;  %v7943_v11 = vcombine.high %v1848_v8, %v1856_v9  ;;  %v1857_v14 = vld [vmem:[#allocation7 + $0x148] sm:$0xff] }
 0x525   :  { %v1672_v17 = vpop.f32.mrf.mxu1 }
 0x526   :  { %v1711_v18 = vadd.f32 %v1710_v16, %v1671_v15  ;;  %v1712_v6 = vpop.f32.mrf.mxu0  ;;  %v7942_v15 = vcombine.low %v1848_v8, %v1856_v9  ;;  %v7944_v16 = vcombine.low %v1849_v10, %v1857_v14  ;;  %v7945_v17 = vcombine.high %v1849_v10, %v1857_v14  ;;  %2143 = vmatprep.subr.bf16.mxu0 %v7943_v11  ;;  %v1854_v10 = vld [vmem:[#allocation7 + $0x130] sm:$0xff]  ;;  %v1855_v14 = vld [vmem:[#allocation7 + $0x138] sm:$0xff] }
 0x527   :  { %v1673_v19 = vpop.f32.mrf.mxu1  ;;  %v1874_v6 = vld [vmem:[#allocation7 + $0x1d0] sm:$0xff]  ;;  %v7971_v8 = vcombine.high %v1870_v1, %v1878_v2  ;;  %v7973_v9 = vcombine.high %v1871_v60, %v1879_v3 }
 0x528   :  { %v1713_v20 = vpop.f32.mrf.mxu0  ;;  %v1716_v7 = vadd.f32 %v1711_v18, %v9421_v55  ;;  %2144 = vmatpush1.bf16.msra.mxu0 %v7942_v15  ;;  %v1866_v18 = vld [vmem:[#allocation7 + $0x190] sm:$0xff]  ;;  %v1867_v19 = vld [vmem:[#allocation7 + $0x198] sm:$0xff] }
 0x529   :  { %v1674_v21 = vpop.f32.mrf.mxu1  ;;  %v7962_v20 = vcombine.low %v1866_v18, %v1874_v6  ;;  %v1862_v11 = vld [vmem:[#allocation7 + $0x170] sm:$0xff]  ;;  %v1863_v15 = vld [vmem:[#allocation7 + $0x178] sm:$0xff] }
 0x52a   :  { %v1714_v22 = vpop.f32.mrf.mxu0  ;;  %v1719_v23 = vsel %vm482_vm1, %v1716_v7, 0.0  ;;  %v1875_v21 = vld [vmem:[#allocation7 + $0x1d8] sm:$0xff] }
 0x52b   :  { %1720 = vadd.xlane.f32.xlu1 %v1719_v23  ;;  %v7964_v22 = vcombine.low %v1867_v19, %v1875_v21  ;;  %v7965_v23 = vcombine.high %v1867_v19, %v1875_v21  ;;  %v2490_v19 = vld [vmem:[#allocation10 + $0x180] sm:$0xff]  ;;  %v2499_v21 = vld [vmem:[#allocation10 + $0x1c8] sm:$0xff] }
 0x5b4   :  { %v1721_v24 = vpop.xlane.xlu1 %1720 }
 0x5b5   :  { %v1722_v25 = vmul.f32 0.03125, %v1721_v24 }
 0x5b7   :  { %v1723_v28 = vsub.f32 %v1716_v7, %v1722_v25  ;;  %v7963_v7 = vcombine.high %v1866_v18, %v1874_v6  ;;  %v7955_v18 = vcombine.high %v1854_v10, %v1862_v11  ;;  %v7957_v6 = vcombine.high %v1855_v14, %v1863_v15 }
 0x5b9   :  { %v1724_v29 = vmul.f32 %v1723_v28, %v1723_v28  ;;  %2223 = vmatprep.subr.bf16.mxu0 %v7963_v7  ;;  %v2491_v7 = vld [vmem:[#allocation10 + $0x188] sm:$0xff] }
 0x5bb   :  { %v1725_v30 = vsel %vm482_vm1, %v1724_v29, 0.0 }
 0x5bc   :  { %1726 = vadd.xlane.f32.xlu1 %v1725_v30  ;;  %v7940_v30 = vld [vmem:[#allocation4 + $0x1] ss:$0 sm:$0xff] }
 0x645   :  { %v1727_v33 = vpop.xlane.xlu1 %1726 }
 0x646   :  { %v1728_v55 = vmul.f32 0.03125, %v1727_v33 }
 0x648   :  { %v1729_v34 = vadd.f32 1e-05, %v1728_v55  ;;  %v1850_v55 = vld [vmem:[#allocation7 + $0x110] sm:$0xff] }
 0x64a   :  { %8539 = vrsqrt.f32 %v1729_v34  ;;  %v1858_v34 = vld [vmem:[#allocation7 + $0x150] sm:$0xff] }
 0x657   :  { %v8540_v37 = vpop.eup %8539 }
 0x658   :  { %v1731_v35 = vmul.f32 %v8540_v37, %v1723_v28  ;;  %v1851_v37 = vld [vmem:[#allocation7 + $0x118] sm:$0xff] }
 0x65a   :  { %v1738_v40 = vmul.f32 %v7930_v52, %v1731_v35  ;;  %v1859_v52 = vld [vmem:[#allocation7 + $0x158] sm:$0xff] }
 0x65c   :  { %v1745_v36 = vadd.f32 %v7931_v38, %v1738_v40  ;;  %v7947_v40 = vcombine.high %v1850_v55, %v1858_v34 }
 0x65e   :  { %v1751_v41 = vpack.c.bf16 %v1745_v36, %v1745_v36 }
 0x660   :  { %8317 = vmatmul.mubr.msk.bf16.vlgmr.msra.gmra.mxu1 %vm482_vm1, %v1751_v41  ;;  %v1868_v41 = vld [vmem:[#allocation7 + $0x1a0] sm:$0xff] }
 0x661   :  { %2202 = vmatprep.mubr.bf16.mxu1 %v9158_v39  ;;  %2183 = vmatpush1.bf16.msra.mxu1 %v7960_v4 }
 0x662   :  { %2184 = vmatprep.subr.bf16.mxu1 %v7945_v17  ;;  %v7972_v17 = vcombine.low %v1871_v60, %v1879_v3 }
 0x665   :  { %2185 = vmatpush1.bf16.msra.mxu1 %v7944_v16  ;;  %v7970_v16 = vcombine.low %v1870_v1, %v1878_v2 }
 0x666   :  { %2264 = vmatprep.subr.bf16.mxu1 %v7965_v23  ;;  %v7956_v23 = vcombine.low %v1855_v14, %v1863_v15  ;;  %v2477_v14 = vld [vmem:[#allocation10 + $0x118] sm:$0xff] }
 0x667   :  { %v2485_v15 = vld [vmem:[#allocation10 + $0x158] sm:$0xff] }
 0x720   :  { %v1809_v43 = vpop.f32.mrf.mxu1 }
 0x721   :  { %v1810_v44 = vadd.f32 %v7936_v42, %v1809_v43  ;;  %v1876_v42 = vld [vmem:[#allocation7 + $0x1e0] sm:$0xff]  ;;  %v1869_v43 = vld [vmem:[#allocation7 + $0x1a8] sm:$0xff] }
 0x722   :  { %v8318_v45 = vpop.f32.mrf.mxu1 }
 0x723   :  { %v1815_v46 = vadd.f32 %v1810_v44, %v1745_v36  ;;  %v7949_v36 = vcombine.high %v1851_v37, %v1859_v52  ;;  %v1877_v44 = vld [vmem:[#allocation7 + $0x1e8] sm:$0xff]  ;;  %v7946_v45 = vcombine.low %v1850_v55, %v1858_v34  ;;  %v2483_v55 = vld [vmem:[#allocation10 + $0x148] sm:$0xff] }
 0x724   :  { %v1812_v47 = vpop.f32.mrf.mxu1 }
 0x725   :  { %v1820_v48 = vsel %vm482_vm1, %v1815_v46, 0.0  ;;  %v7967_v47 = vcombine.high %v1868_v41, %v1876_v42 }
 0x726   :  { %1821 = vadd.xlane.f32.xlu0 %v1820_v48  ;;  %v8319_v49 = vpop.f32.mrf.mxu1  ;;  %v7969_v48 = vcombine.high %v1869_v43, %v1877_v44 }
 0x727   :  { %v1852_v49 = vld [vmem:[#allocation7 + $0x120] sm:$0xff] }
 0x7af   :  { %v1822_v50 = vpop.xlane.xlu0 %1821 }
 0x7b0   :  { %v1823_v51 = vmul.f32 0.03125, %v1822_v50  ;;  %v1860_v50 = vld [vmem:[#allocation7 + $0x160] sm:$0xff] }
 0x7b1   :  { %v7951_v53 = vcombine.high %v1852_v49, %v1860_v50  ;;  %v7950_v4 = vcombine.low %v1852_v49, %v1860_v50 }
 0x7b2   :  { %v1824_v54 = vsub.f32 %v1815_v46, %v1823_v51  ;;  %v7948_v46 = vcombine.low %v1851_v37, %v1859_v52  ;;  %v1853_v51 = vld [vmem:[#allocation7 + $0x128] sm:$0xff] }
 0x7b4   :  { %v1825_v56 = vmul.f32 %v1824_v54, %v1824_v54 }
 0x7b6   :  { %v1826_v57 = vsel %vm482_vm1, %v1825_v56, 0.0  ;;  %v7966_v56 = vcombine.low %v1868_v41, %v1876_v42  ;;  %v2493_v41 = vld [vmem:[#allocation10 + $0x198] sm:$0xff] }
 0x7b7   :  { %1827 = vadd.xlane.f32.xlu1 %v1826_v57  ;;  %v7968_v57 = vcombine.low %v1869_v43, %v1877_v44  ;;  %v2501_v43 = vld [vmem:[#allocation10 + $0x1d8] sm:$0xff] }
 0x7b8   :  { %v8005_v44 = vcombine.low %v2493_v41, %v2501_v43 }
 0x840   :  { %v1828_v24 = vpop.xlane.xlu1 %1827 }
 0x841   :  { %v1829_v25 = vmul.f32 0.03125, %v1828_v24 }
 0x843   :  { %v1830_v28 = vadd.f32 1e-05, %v1829_v25  ;;  %v8002_v25 = vcombine.high %v2491_v7, %v2499_v21 }
 0x845   :  { %8541 = vrsqrt.f32 %v1830_v28 }
 0x852   :  { %v8542_v29 = vpop.eup %8541 }
 0x853   :  { %v1832_v31 = vmul.f32 %v8542_v29, %v1824_v54  ;;  %v1861_v54 = vld [vmem:[#allocation7 + $0x168] sm:$0xff]  ;;  %v8001_v29 = vcombine.low %v2491_v7, %v2499_v21 }
 0x854   :  { %v7953_v63 = vcombine.high %v1853_v51, %v1861_v54  ;;  %v7952_v5 = vcombine.low %v1853_v51, %v1861_v54 }
 0x855   :  { %v1839_v33 = vmul.f32 %v7940_v30, %v1832_v31  ;;  %v2474_v30 = vld [vmem:[#allocation10 + $0x100] sm:$0xff] }
 0x856   :  { %v2482_v31 = vld [vmem:[#allocation10 + $0x140] sm:$0xff] }
 0x857   :  { %v9529_v35 = vadd.f32 %v7941_v32, %v1839_v33  ;;  %v2475_v32 = vld [vmem:[#allocation10 + $0x108] sm:$0xff]  ;;  %v7984_v33 = vcombine.high %v2474_v30, %v2482_v31  ;;  %v7983_v34 = vcombine.low %v2474_v30, %v2482_v31 }
 0x858   :  { %v7985_v37 = vcombine.low %v2475_v32, %v2483_v55  ;;  %v7986_v52 = vcombine.high %v2475_v32, %v2483_v55 }
 0x859   :  { %v9533_v38 = vpack.c.bf16 %v9529_v35, %v9529_v35 }
 0x85b   :  { %7974 = vmatmul.mubr.msk.bf16.vlgmr.msra.gmra.mxu0 %vm482_vm1, %v9533_v38  ;;  %7975 = vmatmul.mubr.msk.bf16.vlgmr.msra.gmra.mxu1 %vm482_vm1, %v9533_v38 }
 0x85c   :  { %2224 = vmatpush1.bf16.msra.mxu0 %v7962_v20  ;;  %2265 = vmatpush1.bf16.msra.mxu1 %v7964_v22  ;;  %v2498_v20 = vld [vmem:[#allocation10 + $0x1c0] sm:$0xff]  ;;  %v7954_v22 = vcombine.low %v1854_v10, %v1862_v11  ;;  %v2484_v11 = vld [vmem:[#allocation10 + $0x150] sm:$0xff] }
 0x85d   :  { %2225 = vmatprep.subr.bf16.mxu0 %v7947_v40  ;;  %2266 = vmatprep.subr.bf16.mxu1 %v7949_v36  ;;  %v8000_v24 = vcombine.high %v2490_v19, %v2498_v20  ;;  %v7999_v28 = vcombine.low %v2490_v19, %v2498_v20  ;;  %v2492_v40 = vld [vmem:[#allocation10 + $0x190] sm:$0xff] }
 0x85e   :  { %2243 = vmatprep.mubr.bf16.mxu0 %v9158_v39  ;;  %2284 = vmatprep.mubr.bf16.mxu1 %v9158_v39  ;;  %v2500_v36 = vld [vmem:[#allocation10 + $0x1d0] sm:$0xff] }
 0x85f   :  { %v8004_v42 = vcombine.high %v2492_v40, %v2500_v36 }
 0x860   :  { %2226 = vmatpush1.bf16.msra.mxu0 %v7946_v45  ;;  %2267 = vmatpush1.bf16.msra.mxu1 %v7948_v46  ;;  %v8006_v45 = vcombine.high %v2493_v41, %v2501_v43  ;;  %v9557_v46 = vld [vmem:[#allocation9 + $0x10] sm:$0xff]  ;;  %v2495_v41 = vld [vmem:[#allocation10 + $0x1a8] sm:$0xff] }
 0x861   :  { %2305 = vmatprep.subr.bf16.mxu0 %v7967_v47  ;;  %2346 = vmatprep.subr.bf16.mxu1 %v7969_v48  ;;  %v1889_v47 = vrot.slane %v9557_v46, %v9453_v58  ;;  %v1897_v48 = vrot.slane %v9557_v46, %v9455_v59  ;;  %v1893_v49 = vrot.slane %v9557_v46, %v9459_v61 }
 0x862   :  { %v1901_v50 = vrot.slane %v9557_v46, %v9461_v62  ;;  %v1909_v19 = vrot.slane %v9557_v46, %v9471_v12  ;;  %v1917_v20 = vrot.slane %v9557_v46, %v9473_v13  ;;  %v1905_v32 = vrot.slane %v9557_v46, %v9477_v26 }
 0x863   :  { %7976 = vmatmul.mubr.msk.bf16.vlgmr.msra.gmra.mxu0 %vm482_vm1, %v9533_v38  ;;  %7977 = vmatmul.mubr.msk.bf16.vlgmr.msra.gmra.mxu1 %vm482_vm1, %v9533_v38 }
 0x864   :  { %2306 = vmatpush1.bf16.msra.mxu0 %v7966_v56  ;;  %2347 = vmatpush1.bf16.msra.mxu1 %v7968_v57 }
 0x865   :  { %2307 = vmatprep.subr.bf16.mxu0 %v7951_v53  ;;  %2348 = vmatprep.subr.bf16.mxu1 %v7953_v63 }
 0x866   :  { %2325 = vmatprep.mubr.bf16.mxu0 %v9158_v39  ;;  %2366 = vmatprep.mubr.bf16.mxu1 %v9158_v39 }
 0x868   :  { %2308 = vmatpush1.bf16.msra.mxu0 %v7950_v4  ;;  %2349 = vmatpush1.bf16.msra.mxu1 %v7952_v5 }
 0x869   :  { %2387 = vmatprep.subr.bf16.mxu0 %v7971_v8  ;;  %2428 = vmatprep.subr.bf16.mxu1 %v7973_v9  ;;  %v2476_v8 = vld [vmem:[#allocation10 + $0x110] sm:$0xff] }
 0x86b   :  { %7978 = vmatmul.mubr.msk.bf16.vlgmr.msra.gmra.mxu0 %vm482_vm1, %v9533_v38  ;;  %7979 = vmatmul.mubr.msk.bf16.vlgmr.msra.gmra.mxu1 %vm482_vm1, %v9533_v38 }
 0x86c   :  { %2388 = vmatpush1.bf16.msra.mxu0 %v7970_v16  ;;  %2429 = vmatpush1.bf16.msra.mxu1 %v7972_v17 }
 0x86d   :  { %2389 = vmatprep.subr.bf16.mxu0 %v7955_v18  ;;  %2430 = vmatprep.subr.bf16.mxu1 %v7957_v6 }
 0x86e   :  { %2407 = vmatprep.mubr.bf16.mxu0 %v9158_v39  ;;  %2448 = vmatprep.mubr.bf16.mxu1 %v9158_v39 }
 0x870   :  { %2390 = vmatpush1.bf16.msra.mxu0 %v7954_v22  ;;  %2431 = vmatpush1.bf16.msra.mxu1 %v7956_v23 }
 0x871   :  { %2702 = vmatprep.subr.bf16.mxu0 %v8000_v24  ;;  %2742 = vmatprep.subr.bf16.mxu1 %v8002_v25  ;;  %v7988_v24 = vcombine.high %v2476_v8, %v2484_v11  ;;  %v7990_v25 = vcombine.high %v2477_v14, %v2485_v15 }
 0x873   :  { %7980 = vmatmul.mubr.msk.bf16.vlgmr.msra.gmra.mxu0 %vm482_vm1, %v9533_v38  ;;  %7981 = vmatmul.mubr.msk.bf16.vlgmr.msra.gmra.mxu1 %vm482_vm1, %v9533_v38  ;;  %v8003_v38 = vcombine.low %v2492_v40, %v2500_v36  ;;  %v2502_v36 = vld [vmem:[#allocation10 + $0x1e0] sm:$0xff] }
 0x874   :  { %2703 = vmatpush1.bf16.xpose.msra.mxu0 %v7999_v28  ;;  %2743 = vmatpush1.bf16.xpose.msra.mxu1 %v8001_v29 }
 0x875   :  { %2704 = vmatprep.subr.bf16.mxu0 %v7984_v33  ;;  %2744 = vmatprep.subr.bf16.mxu1 %v7986_v52  ;;  %v1913_v33 = vrot.slane %v9557_v46, %v9479_v27 }
 0x87c   :  { %2705 = vmatpush1.bf16.xpose.msra.mxu0 %v7983_v34  ;;  %2745 = vmatpush1.bf16.xpose.msra.mxu1 %v7985_v37  ;;  %v2494_v37 = vld [vmem:[#allocation10 + $0x1a0] sm:$0xff] }
 0x87d   :  { %2782 = vmatprep.subr.bf16.mxu0 %v8004_v42  ;;  %2822 = vmatprep.subr.bf16.mxu1 %v8006_v45  ;;  %v2503_v42 = vld [vmem:[#allocation10 + $0x1e8] sm:$0xff] }
 0x91b   :  { %v2163_v51 = vpop.f32.mrf.mxu0  ;;  %v2204_v54 = vpop.f32.mrf.mxu1 }
 0x91c   :  { %v2164_v56 = vadd.f32 %v2163_v51, %v1889_v47  ;;  %v2205_v57 = vadd.f32 %v2204_v54, %v1897_v48  ;;  %v7989_v47 = vcombine.low %v2477_v14, %v2485_v15  ;;  %v2478_v14 = vld [vmem:[#allocation10 + $0x120] sm:$0xff] }
 0x91d   :  { %v2165_v53 = vpop.f32.mrf.mxu0  ;;  %v2206_v63 = vpop.f32.mrf.mxu1 }
 0x91e   :  { %v2166_v1 = vadd.f32 %v2165_v53, %v1893_v49  ;;  %v2207_v2 = vadd.f32 %v2206_v63, %v1901_v50  ;;  %v2457_v60 = vmax.f32 %v2164_v56, 0.0  ;;  %v2459_v3 = vmax.f32 %v2205_v57, 0.0 }
 0x91f   :  { %v2167_v4 = vpop.f32.mrf.mxu0  ;;  %v2208_v5 = vpop.f32.mrf.mxu1  ;;  %v8008_v53 = vcombine.high %v2494_v37, %v2502_v36  ;;  %v8010_v63 = vcombine.high %v2495_v41, %v2503_v42 }
 0x920   :  { %v2458_v9 = vmax.f32 %v2166_v1, 0.0  ;;  %v2460_v10 = vmax.f32 %v2207_v2, 0.0  ;;  %v2506_v7 = vpack.c.bf16 %v2457_v60, %v2457_v60  ;;  %v2508_v21 = vpack.c.bf16 %v2459_v3, %v2459_v3 }
 0x921   :  { %v2168_v16 = vpop.f32.mrf.mxu0  ;;  %v2209_v17 = vpop.f32.mrf.mxu1 }
 0x922   :  { %v2507_v18 = vpack.c.bf16 %v2458_v9, %v2458_v9  ;;  %v2509_v6 = vpack.c.bf16 %v2460_v10, %v2460_v10  ;;  %v2486_v17 = vld [vmem:[#allocation10 + $0x160] sm:$0xff] }
 0x923   :  { %v2245_v22 = vpop.f32.mrf.mxu0  ;;  %v2286_v23 = vpop.f32.mrf.mxu1 }
 0x924   :  { %2722 = vmatprep.mubr.bf16.mxu0 %v2507_v18  ;;  %2762 = vmatprep.mubr.bf16.mxu1 %v2509_v6  ;;  %v2246_v51 = vadd.f32 %v2245_v22, %v1905_v32  ;;  %v2287_v54 = vadd.f32 %v2286_v23, %v1913_v33  ;;  %v2479_v18 = vld [vmem:[#allocation10 + $0x128] sm:$0xff] }
 0x925   :  { %v2247_v28 = vpop.f32.mrf.mxu0  ;;  %v2288_v29 = vpop.f32.mrf.mxu1  ;;  %2723 = vmatmul.mubr.bf16.vlgmr.msra.gmra.mxu0 %v2506_v7  ;;  %2763 = vmatmul.mubr.bf16.vlgmr.msra.gmra.mxu1 %v2508_v21  ;;  %v2487_v6 = vld [vmem:[#allocation10 + $0x168] sm:$0xff] }
 0x926   :  { %v2248_v30 = vadd.f32 %v2247_v28, %v1909_v19  ;;  %v2289_v31 = vadd.f32 %v2288_v29, %v1917_v20  ;;  %2783 = vmatpush1.bf16.xpose.msra.mxu0 %v8003_v38  ;;  %2823 = vmatpush1.bf16.xpose.msra.mxu1 %v8005_v44  ;;  %v9575_v38 = vld [vmem:[#allocation9 + $0x18] sm:$0xff]  ;;  %v7987_v44 = vcombine.low %v2476_v8, %v2484_v11  ;;  %v2461_v4 = vmax.f32 %v2246_v51, 0.0 }
 0x927   :  { %v2249_v55 = vpop.f32.mrf.mxu0  ;;  %v2290_v34 = vpop.f32.mrf.mxu1  ;;  %2784 = vmatprep.subr.bf16.mxu0 %v7988_v24  ;;  %2824 = vmatprep.subr.bf16.mxu1 %v7990_v25  ;;  %v1925_v46 = vrot.slane %v9575_v38, %v9459_v61  ;;  %v1933_v50 = vrot.slane %v9575_v38, %v9461_v62  ;;  %v2463_v5 = vmax.f32 %v2287_v54, 0.0  ;;  %v8007_v20 = vcombine.low %v2494_v37, %v2502_v36  ;;  %v2496_v37 = vld [vmem:[#allocation10 + $0x1b0] sm:$0xff] }
 0x928   :  { %v2462_v52 = vmax.f32 %v2248_v30, 0.0  ;;  %v2464_v40 = vmax.f32 %v2289_v31, 0.0  ;;  %v2510_v7 = vpack.c.bf16 %v2461_v4, %v2461_v4  ;;  %v8009_v25 = vcombine.low %v2495_v41, %v2503_v42  ;;  %v2497_v42 = vld [vmem:[#allocation10 + $0x1b8] sm:$0xff] }
 0x929   :  { %v2250_v43 = vpop.f32.mrf.mxu0  ;;  %v2291_v45 = vpop.f32.mrf.mxu1  ;;  %v2512_v21 = vpack.c.bf16 %v2463_v5, %v2463_v5  ;;  %v7992_v28 = vcombine.high %v2478_v14, %v2486_v17  ;;  %v7994_v29 = vcombine.high %v2479_v18, %v2487_v6  ;;  %v1921_v32 = vrot.slane %v9575_v38, %v9453_v58  ;;  %v2481_v5 = vld [vmem:[#allocation10 + $0x138] sm:$0xff] }
 0x92a   :  { %v2511_v48 = vpack.c.bf16 %v2462_v52, %v2462_v52  ;;  %v2513_v49 = vpack.c.bf16 %v2464_v40, %v2464_v40  ;;  %v1929_v34 = vrot.slane %v9575_v38, %v9455_v59  ;;  %v2504_v52 = vld [vmem:[#allocation10 + $0x1f0] sm:$0xff]  ;;  %v1941_v40 = vrot.slane %v9575_v38, %v9471_v12  ;;  %v2505_v43 = vld [vmem:[#allocation10 + $0x1f8] sm:$0xff] }
 0x92b   :  { %v2327_v56 = vpop.f32.mrf.mxu0  ;;  %v2368_v57 = vpop.f32.mrf.mxu1  ;;  %v1949_v45 = vrot.slane %v9575_v38, %v9473_v13  ;;  %v8011_v4 = vcombine.low %v2496_v37, %v2504_v52 }
 0x92c   :  { %2802 = vmatprep.mubr.bf16.mxu0 %v2511_v48  ;;  %2842 = vmatprep.mubr.bf16.mxu1 %v2513_v49  ;;  %v7993_v48 = vcombine.low %v2479_v18, %v2487_v6  ;;  %v8012_v49 = vcombine.high %v2496_v37, %v2504_v52 }
 0x92d   :  { %v2329_v1 = vpop.f32.mrf.mxu0  ;;  %v2370_v2 = vpop.f32.mrf.mxu1 }
 0x92e   :  { %v2330_v60 = vadd.f32 %v2329_v1, %v1925_v46  ;;  %v2371_v3 = vadd.f32 %v2370_v2, %v1933_v50  ;;  %2785 = vmatpush1.bf16.xpose.msra.mxu0 %v7987_v44  ;;  %2825 = vmatpush1.bf16.xpose.msra.mxu1 %v7989_v47  ;;  %v7991_v44 = vcombine.low %v2478_v14, %v2486_v17  ;;  %v2480_v2 = vld [vmem:[#allocation10 + $0x130] sm:$0xff] }
 0x92f   :  { %v2331_v8 = vpop.f32.mrf.mxu0  ;;  %v2372_v9 = vpop.f32.mrf.mxu1  ;;  %2862 = vmatprep.subr.bf16.mxu0 %v8008_v53  ;;  %2902 = vmatprep.subr.bf16.mxu1 %v8010_v63  ;;  %v2328_v47 = vadd.f32 %v2327_v56, %v1921_v32  ;;  %v2369_v46 = vadd.f32 %v2368_v57, %v1929_v34  ;;  %v8014_v50 = vcombine.high %v2497_v42, %v2505_v43 }
 0x930   :  { %v2466_v10 = vmax.f32 %v2330_v60, 0.0  ;;  %v2468_v11 = vmax.f32 %v2371_v3, 0.0  ;;  %v2488_v60 = vld [vmem:[#allocation10 + $0x170] sm:$0xff]  ;;  %v2489_v8 = vld [vmem:[#allocation10 + $0x178] sm:$0xff]  ;;  %v8013_v9 = vcombine.low %v2497_v42, %v2505_v43  ;;  %v1945_v17 = vrot.slane %v9575_v38, %v9479_v27  ;;  %v7982_v42 = vld [vmem:[#allocation12 + $0x1] ss:$0 sm:$0xff] }
 0x931   :  { %v2332_v15 = vpop.f32.mrf.mxu0  ;;  %v2373_v16 = vpop.f32.mrf.mxu1  ;;  %v2465_v53 = vmax.f32 %v2328_v47, 0.0  ;;  %v2467_v63 = vmax.f32 %v2369_v46, 0.0  ;;  %v7996_v57 = vcombine.high %v2480_v2, %v2488_v60  ;;  %v7998_v14 = vcombine.high %v2481_v5, %v2489_v8 }
 0x932   :  { %v2515_v19 = vpack.c.bf16 %v2466_v10, %v2466_v10  ;;  %v2517_v22 = vpack.c.bf16 %v2468_v11, %v2468_v11  ;;  %v1937_v16 = vrot.slane %v9575_v38, %v9477_v26  ;;  %v7995_v18 = vcombine.low %v2480_v2, %v2488_v60 }
 0x933   :  { %v9581_v23 = vpop.f32.mrf.mxu0  ;;  %v9583_v24 = vpop.f32.mrf.mxu1  ;;  %v2514_v56 = vpack.c.bf16 %v2465_v53, %v2465_v53  ;;  %v2516_v10 = vpack.c.bf16 %v2467_v63, %v2467_v63 }
 0x934   :  { %v2410_v6 = vadd.f32 %v9581_v23, %v1937_v16 }
 0x935   :  { %2803 = vmatmul.mubr.bf16.vlgmr.msra.gmra.mxu0 %v2510_v7  ;;  %2843 = vmatmul.mubr.bf16.vlgmr.msra.gmra.mxu1 %v2512_v21  ;;  %v2411_v30 = vpop.f32.mrf.mxu0  ;;  %v2452_v31 = vpop.f32.mrf.mxu1 }
 0x936   :  { %2863 = vmatpush1.bf16.xpose.msra.mxu0 %v8007_v20  ;;  %2882 = vmatprep.mubr.bf16.mxu0 %v2515_v19  ;;  %v2412_v51 = vadd.f32 %v2411_v30, %v1941_v40  ;;  %v2453_v54 = vadd.f32 %v2452_v31, %v1949_v45  ;;  %v7997_v19 = vcombine.low %v2481_v5, %v2489_v8  ;;  %v2469_v7 = vmax.f32 %v2410_v6, 0.0 }
 0x937   :  { %2903 = vmatpush1.bf16.xpose.msra.mxu1 %v8009_v25  ;;  %2922 = vmatprep.mubr.bf16.mxu1 %v2517_v22  ;;  %v2413_v33 = vpop.f32.mrf.mxu0  ;;  %v2454_v55 = vpop.f32.mrf.mxu1  ;;  %v2451_v20 = vadd.f32 %v9583_v24, %v1945_v17 }
 0x938   :  { %2864 = vmatprep.subr.bf16.mxu0 %v7992_v28  ;;  %2904 = vmatprep.subr.bf16.mxu1 %v7994_v29  ;;  %v2470_v1 = vmax.f32 %v2412_v51, 0.0  ;;  %v2472_v3 = vmax.f32 %v2453_v54, 0.0  ;;  %v2518_v22 = vpack.c.bf16 %v2469_v7, %v2469_v7  ;;  %v8438_v7 = vld [vmem:[%s10001_s5 + $0x20] sm:$0xff]  }
 0x939   :  { %v2414_v36 = vpop.f32.mrf.mxu0  ;;  %v2455_v41 = vpop.f32.mrf.mxu1  ;;  %v2471_v21 = vmax.f32 %v2451_v20, 0.0  ;;  %v8437_v20 = vld [vmem:[%s10001_s5 + $0x28] sm:$0xff]  }
 0x93a   :  { %v2519_v11 = vpack.c.bf16 %v2470_v1, %v2470_v1  ;;  %v2521_v15 = vpack.c.bf16 %v2472_v3, %v2472_v3 }
 0x93b   :  { %v2520_v25 = vpack.c.bf16 %v2471_v21, %v2471_v21 }
 0x93e   :  { %2865 = vmatpush1.bf16.xpose.msra.mxu0 %v7991_v44 }
 0x93f   :  { %2905 = vmatpush1.bf16.xpose.msra.mxu1 %v7993_v48  ;;  %2942 = vmatprep.subr.bf16.mxu0 %v8012_v49 }
 0x940   :  { %2982 = vmatprep.subr.bf16.mxu1 %v8014_v50 }
 0x945   :  { %2883 = vmatmul.mubr.bf16.vlgmr.msra.gmra.mxu0 %v2514_v56 }
 0x946   :  { %2923 = vmatmul.mubr.bf16.vlgmr.msra.gmra.mxu1 %v2516_v10  ;;  %2943 = vmatpush1.bf16.xpose.msra.mxu0 %v8011_v4 }
 0x947   :  { %2962 = vmatprep.mubr.bf16.mxu0 %v2519_v11  ;;  %2983 = vmatpush1.bf16.xpose.msra.mxu1 %v8013_v9 }
 0x948   :  { %3002 = vmatprep.mubr.bf16.mxu1 %v2521_v15  ;;  %2944 = vmatprep.subr.bf16.mxu0 %v7996_v57 }
 0x949   :  { %2984 = vmatprep.subr.bf16.mxu1 %v7998_v14 }
 0x94e   :  { %2945 = vmatpush1.bf16.xpose.msra.mxu0 %v7995_v18 }
 0x94f   :  { %2985 = vmatpush1.bf16.xpose.msra.mxu1 %v7997_v19  ;;  %8320 = vmatprep.subr.bf16.mxu0 %v9156_v0 }
 0x955   :  { %2963 = vmatmul.mubr.bf16.vlgmr.msra.gmra.mxu0 %v2518_v22 }
 0x956   :  { %3003 = vmatmul.mubr.bf16.vlgmr.msra.gmra.mxu1 %v2520_v25  ;;  %8324 = vmatprep.mubr.msk.bf16.mxu0 %vm9157_vm0, %v9156_v0 }
 0x957   :  { %3457 = vmatprep.mubr.bf16.mxu1 %v9158_v39  ;;  %8321 = vmatpush3.bf16.msra.mxu0 %v8437_v20 }
 0x958   :  { %8322 = vmatprep.subr.bf16.mxu0 %v9156_v0 }
 0x95b   :  { %8323 = vmatpush3.bf16.msra.mxu0 %v8438_v7  ;;  %v8026_v7 = vld [vmem:[#allocation6 + $0x2] ss:$0 sm:$0xff] }
 0x9e5   :  { %v2724_v38 = vpop.f32.mrf.mxu0  ;;  %v2764_v23 = vpop.f32.mrf.mxu1 }
 0x9e6   :  { %v2725_v43 = vadd.f32 %v7982_v42, %v2724_v38  ;;  %v8015_v38 = vld [vmem:[#allocation13 + $0x1] ss:$0 sm:$0xff] }
 0x9e7   :  { %v2726_v28 = vpop.f32.mrf.mxu0  ;;  %v2766_v29 = vpop.f32.mrf.mxu1 }
 0x9e8   :  { %v2765_v48 = vadd.f32 %v2764_v23, %v2725_v43  ;;  %v8016_v28 = vld [vmem:[#allocation15 + $0x1] ss:$0 sm:$0xff] }
 0x9e9   :  { %v2727_v24 = vpop.f32.mrf.mxu0  ;;  %v2767_v30 = vpop.f32.mrf.mxu1 }
 0x9eb   :  { %v2728_v31 = vpop.f32.mrf.mxu0  ;;  %v2768_v32 = vpop.f32.mrf.mxu1 }
 0x9ec   :  { %v8021_v31 = vld [vmem:[#allocation2 + $0x2] ss:$0 sm:$0xff] }
 0x9f5   :  { %v2804_v33 = vpop.f32.mrf.mxu0  ;;  %v2844_v55 = vpop.f32.mrf.mxu1 }
 0x9f6   :  { %v2805_v50 = vadd.f32 %v2804_v33, %v2765_v48  ;;  %v3161_v48 = vld [vmem:[#allocation7 + $0x288] sm:$0xff] }
 0x9f7   :  { %v2806_v34 = vpop.f32.mrf.mxu0  ;;  %v2846_v37 = vpop.f32.mrf.mxu1 }
 0x9f8   :  { %v2845_v63 = vadd.f32 %v2844_v55, %v2805_v50 }
 0x9f9   :  { %v2807_v52 = vpop.f32.mrf.mxu0  ;;  %v2847_v40 = vpop.f32.mrf.mxu1 }
 0x9fb   :  { %v2808_v36 = vpop.f32.mrf.mxu0  ;;  %v2848_v41 = vpop.f32.mrf.mxu1 }
 0xa05   :  { %v2884_v45 = vpop.f32.mrf.mxu0 }
 0xa06   :  { %v2924_v44 = vpop.f32.mrf.mxu1  ;;  %v2885_v1 = vadd.f32 %v2884_v45, %v2845_v63  ;;  %v3152_v63 = vld [vmem:[#allocation7 + $0x240] sm:$0xff] }
 0xa07   :  { %v2886_v47 = vpop.f32.mrf.mxu0 }
 0xa08   :  { %v2926_v49 = vpop.f32.mrf.mxu1  ;;  %v2925_v2 = vadd.f32 %v2924_v44, %v2885_v1  ;;  %v3160_v44 = vld [vmem:[#allocation7 + $0x280] sm:$0xff]  ;;  %v3145_v1 = vld [vmem:[#allocation7 + $0x208] sm:$0xff] }
 0xa09   :  { %v2887_v46 = vpop.f32.mrf.mxu0  ;;  %v3168_v47 = vld [vmem:[#allocation7 + $0x2c0] sm:$0xff] }
 0xa0a   :  { %v2927_v51 = vpop.f32.mrf.mxu1  ;;  %v8044_v49 = vcombine.high %v3160_v44, %v3168_v47  ;;  %v3169_v46 = vld [vmem:[#allocation7 + $0x2c8] sm:$0xff]  ;;  %v8043_v50 = vcombine.low %v3160_v44, %v3168_v47 }
 0xa0b   :  { %v2888_v54 = vpop.f32.mrf.mxu0  ;;  %v8045_v51 = vcombine.low %v3161_v48, %v3169_v46 }
 0xa0c   :  { %v2928_v53 = vpop.f32.mrf.mxu1  ;;  %v8046_v54 = vcombine.high %v3161_v48, %v3169_v46  ;;  %3437 = vmatprep.subr.bf16.mxu1 %v8044_v49  ;;  %v3166_v48 = vld [vmem:[#allocation7 + $0x2b0] sm:$0xff]  ;;  %v3167_v46 = vld [vmem:[#allocation7 + $0x2b8] sm:$0xff] }
 0xa0d   :  { %3438 = vmatpush1.bf16.msra.mxu1 %v8043_v50  ;;  %v3144_v53 = vld [vmem:[#allocation7 + $0x200] sm:$0xff]  ;;  %v3174_v49 = vld [vmem:[#allocation7 + $0x2f0] sm:$0xff]  ;;  %v3175_v50 = vld [vmem:[#allocation7 + $0x2f8] sm:$0xff] }
 0xa0e   :  { %3478 = vmatprep.subr.bf16.mxu0 %v8046_v54 }
 0xa15   :  { %v2964_v60 = vpop.f32.mrf.mxu0 }
 0xa16   :  { %v2965_v3 = vadd.f32 %v2964_v60, %v2925_v2  ;;  %v3004_v4 = vpop.f32.mrf.mxu1  ;;  %v8028_v2 = vcombine.high %v3144_v53, %v3152_v63  ;;  %v3153_v60 = vld [vmem:[#allocation7 + $0x248] sm:$0xff] }
 0xa17   :  { %v2966_v5 = vpop.f32.mrf.mxu0 }
 0xa18   :  { %v3005_v8 = vadd.f32 %v3004_v4, %v2965_v3  ;;  %v3006_v56 = vpop.f32.mrf.mxu1  ;;  %v8027_v3 = vcombine.low %v3144_v53, %v3152_v63  ;;  %v8029_v4 = vcombine.low %v3145_v1, %v3153_v60  ;;  %v8030_v5 = vcombine.high %v3145_v1, %v3153_v60  ;;  %3439 = vmatprep.subr.bf16.mxu1 %v8028_v2  ;;  %v3150_v1 = vld [vmem:[#allocation7 + $0x230] sm:$0xff]  ;;  %v3151_v60 = vld [vmem:[#allocation7 + $0x238] sm:$0xff] }
 0xa19   :  { %v2967_v9 = vpop.f32.mrf.mxu0  ;;  %v3170_v56 = vld [vmem:[#allocation7 + $0x2d0] sm:$0xff]  ;;  %v8056_v53 = vcombine.high %v3166_v48, %v3174_v49  ;;  %v8058_v63 = vcombine.high %v3167_v46, %v3175_v50 }
 0xa1a   :  { %v3007_v10 = vpop.f32.mrf.mxu1  ;;  %v3010_v57 = vadd.f32 %v3005_v8, %v9529_v35  ;;  %3440 = vmatpush1.bf16.msra.mxu1 %v8027_v3  ;;  %v3162_v8 = vld [vmem:[#allocation7 + $0x290] sm:$0xff]  ;;  %v3163_v9 = vld [vmem:[#allocation7 + $0x298] sm:$0xff] }
 0xa1b   :  { %v2968_v11 = vpop.f32.mrf.mxu0  ;;  %v8047_v10 = vcombine.low %v3162_v8, %v3170_v56  ;;  %v3158_v2 = vld [vmem:[#allocation7 + $0x270] sm:$0xff]  ;;  %v3159_v3 = vld [vmem:[#allocation7 + $0x278] sm:$0xff] }
 0xa1c   :  { %v3008_v14 = vpop.f32.mrf.mxu1  ;;  %v3015_v15 = vsel %vm482_vm1, %v3010_v57, 0.0  ;;  %v3171_v11 = vld [vmem:[#allocation7 + $0x2d8] sm:$0xff] }
 0xa1d   :  { %3016 = vadd.xlane.f32.xlu0 %v3015_v15  ;;  %v8049_v14 = vcombine.low %v3163_v9, %v3171_v11  ;;  %v8050_v15 = vcombine.high %v3163_v9, %v3171_v11  ;;  %v3786_v9 = vld [vmem:[#allocation10 + $0x280] sm:$0xff]  ;;  %v3795_v11 = vld [vmem:[#allocation10 + $0x2c8] sm:$0xff] }
 0xaa6   :  { %v3017_v16 = vpop.xlane.xlu0 %3016 }
 0xaa7   :  { %v3018_v17 = vmul.f32 0.03125, %v3017_v16 }
 0xaa9   :  { %v3019_v18 = vsub.f32 %v3010_v57, %v3018_v17  ;;  %v8048_v57 = vcombine.high %v3162_v8, %v3170_v56  ;;  %v8040_v8 = vcombine.high %v3150_v1, %v3158_v2  ;;  %v8042_v56 = vcombine.high %v3151_v60, %v3159_v3 }
 0xaab   :  { %v3020_v6 = vmul.f32 %v3019_v18, %v3019_v18  ;;  %3519 = vmatprep.subr.bf16.mxu1 %v8048_v57  ;;  %v3787_v57 = vld [vmem:[#allocation10 + $0x288] sm:$0xff] }
 0xaad   :  { %v3021_v19 = vsel %vm482_vm1, %v3020_v6, 0.0 }
 0xaae   :  { %3022 = vadd.xlane.f32.xlu1 %v3021_v19  ;;  %v8025_v19 = vld [vmem:[#allocation4 + $0x2] ss:$0 sm:$0xff] }
 0xb37   :  { %v3023_v21 = vpop.xlane.xlu1 %3022 }
 0xb38   :  { %v3024_v35 = vmul.f32 0.03125, %v3023_v21 }
 0xb3a   :  { %v3025_v22 = vadd.f32 1e-05, %v3024_v35  ;;  %v3146_v35 = vld [vmem:[#allocation7 + $0x210] sm:$0xff] }
 0xb3c   :  { %8543 = vrsqrt.f32 %v3025_v22  ;;  %v3154_v22 = vld [vmem:[#allocation7 + $0x250] sm:$0xff] }
 0xb49   :  { %v8544_v25 = vpop.eup %8543 }
 0xb4a   :  { %v3027_v23 = vmul.f32 %v8544_v25, %v3019_v18  ;;  %v3147_v25 = vld [vmem:[#allocation7 + $0x218] sm:$0xff] }
 0xb4c   :  { %v3034_v29 = vmul.f32 %v8015_v38, %v3027_v23  ;;  %v3155_v38 = vld [vmem:[#allocation7 + $0x258] sm:$0xff] }
 0xb4e   :  { %v3041_v24 = vadd.f32 %v8016_v28, %v3034_v29  ;;  %v8032_v29 = vcombine.high %v3146_v35, %v3154_v22 }
 0xb50   :  { %v3047_v30 = vpack.c.bf16 %v3041_v24, %v3041_v24 }
 0xb52   :  { %8325 = vmatmul.mubr.msk.bf16.vlgmr.msra.gmra.mxu0 %vm482_vm1, %v3047_v30  ;;  %v3164_v30 = vld [vmem:[#allocation7 + $0x2a0] sm:$0xff] }
 0xb53   :  { %3498 = vmatprep.mubr.bf16.mxu0 %v9158_v39  ;;  %3479 = vmatpush1.bf16.msra.mxu0 %v8045_v51 }
 0xb54   :  { %3480 = vmatprep.subr.bf16.mxu0 %v8030_v5  ;;  %v8057_v5 = vcombine.low %v3167_v46, %v3175_v50 }
 0xb57   :  { %3481 = vmatpush1.bf16.msra.mxu0 %v8029_v4  ;;  %v8055_v4 = vcombine.low %v3166_v48, %v3174_v49 }
 0xb58   :  { %3560 = vmatprep.subr.bf16.mxu0 %v8050_v15  ;;  %v8041_v15 = vcombine.low %v3151_v60, %v3159_v3  ;;  %v3773_v60 = vld [vmem:[#allocation10 + $0x218] sm:$0xff] }
 0xb59   :  { %v3781_v3 = vld [vmem:[#allocation10 + $0x258] sm:$0xff] }
 0xc12   :  { %v3105_v32 = vpop.f32.mrf.mxu0 }
 0xc13   :  { %v3106_v33 = vadd.f32 %v8021_v31, %v3105_v32  ;;  %v3172_v31 = vld [vmem:[#allocation7 + $0x2e0] sm:$0xff]  ;;  %v3165_v32 = vld [vmem:[#allocation7 + $0x2a8] sm:$0xff] }
 0xc14   :  { %v8326_v55 = vpop.f32.mrf.mxu0 }
 0xc15   :  { %v3111_v34 = vadd.f32 %v3106_v33, %v3041_v24  ;;  %v8034_v24 = vcombine.high %v3147_v25, %v3155_v38  ;;  %v3173_v33 = vld [vmem:[#allocation7 + $0x2e8] sm:$0xff]  ;;  %v8031_v55 = vcombine.low %v3146_v35, %v3154_v22  ;;  %v3779_v35 = vld [vmem:[#allocation10 + $0x248] sm:$0xff] }
 0xc16   :  { %v3108_v37 = vpop.f32.mrf.mxu0 }
 0xc17   :  { %v3116_v52 = vsel %vm482_vm1, %v3111_v34, 0.0  ;;  %v8052_v37 = vcombine.high %v3164_v30, %v3172_v31 }
 0xc18   :  { %3117 = vadd.xlane.f32.xlu0 %v3116_v52  ;;  %v8327_v40 = vpop.f32.mrf.mxu0  ;;  %v8054_v52 = vcombine.high %v3165_v32, %v3173_v33 }
 0xc19   :  { %v3148_v40 = vld [vmem:[#allocation7 + $0x220] sm:$0xff] }
 0xca1   :  { %v3118_v36 = vpop.xlane.xlu0 %3117 }
 0xca2   :  { %v3119_v41 = vmul.f32 0.03125, %v3118_v36  ;;  %v3156_v36 = vld [vmem:[#allocation7 + $0x260] sm:$0xff] }
 0xca3   :  { %v8036_v44 = vcombine.high %v3148_v40, %v3156_v36  ;;  %v8035_v51 = vcombine.low %v3148_v40, %v3156_v36 }
 0xca4   :  { %v3120_v42 = vsub.f32 %v3111_v34, %v3119_v41  ;;  %v8033_v34 = vcombine.low %v3147_v25, %v3155_v38  ;;  %v3149_v41 = vld [vmem:[#allocation7 + $0x228] sm:$0xff] }
 0xca6   :  { %v3121_v43 = vmul.f32 %v3120_v42, %v3120_v42 }
 0xca8   :  { %v3122_v45 = vsel %vm482_vm1, %v3121_v43, 0.0  ;;  %v8051_v43 = vcombine.low %v3164_v30, %v3172_v31  ;;  %v3789_v30 = vld [vmem:[#allocation10 + $0x298] sm:$0xff] }
 0xca9   :  { %3123 = vadd.xlane.f32.xlu1 %v3122_v45  ;;  %v8053_v45 = vcombine.low %v3165_v32, %v3173_v33  ;;  %v3797_v32 = vld [vmem:[#allocation10 + $0x2d8] sm:$0xff] }
 0xcaa   :  { %v8090_v33 = vcombine.low %v3789_v30, %v3797_v32 }
 0xd32   :  { %v3124_v16 = vpop.xlane.xlu1 %3123 }
 0xd33   :  { %v3125_v17 = vmul.f32 0.03125, %v3124_v16 }
 0xd35   :  { %v3126_v18 = vadd.f32 1e-05, %v3125_v17  ;;  %v8087_v17 = vcombine.high %v3787_v57, %v3795_v11 }
 0xd37   :  { %8545 = vrsqrt.f32 %v3126_v18 }
 0xd44   :  { %v8546_v6 = vpop.eup %8545 }
 0xd45   :  { %v3128_v20 = vmul.f32 %v8546_v6, %v3120_v42  ;;  %v3157_v42 = vld [vmem:[#allocation7 + $0x268] sm:$0xff]  ;;  %v8086_v6 = vcombine.low %v3787_v57, %v3795_v11 }
 0xd46   :  { %v8038_v47 = vcombine.high %v3149_v41, %v3157_v42  ;;  %v8037_v54 = vcombine.low %v3149_v41, %v3157_v42 }
 0xd47   :  { %v3135_v21 = vmul.f32 %v8025_v19, %v3128_v20  ;;  %v3770_v19 = vld [vmem:[#allocation10 + $0x200] sm:$0xff] }
 0xd48   :  { %v3778_v20 = vld [vmem:[#allocation10 + $0x240] sm:$0xff] }
 0xd49   :  { %v9613_v23 = vadd.f32 %v8026_v7, %v3135_v21  ;;  %v3771_v7 = vld [vmem:[#allocation10 + $0x208] sm:$0xff]  ;;  %v8069_v21 = vcombine.high %v3770_v19, %v3778_v20  ;;  %v8068_v22 = vcombine.low %v3770_v19, %v3778_v20 }
 0xd4a   :  { %v8070_v25 = vcombine.low %v3771_v7, %v3779_v35  ;;  %v8071_v38 = vcombine.high %v3771_v7, %v3779_v35 }
 0xd4b   :  { %v9617_v28 = vpack.c.bf16 %v9613_v23, %v9613_v23 }
 0xd4d   :  { %8059 = vmatmul.mubr.msk.bf16.vlgmr.msra.gmra.mxu1 %vm482_vm1, %v9617_v28  ;;  %8060 = vmatmul.mubr.msk.bf16.vlgmr.msra.gmra.mxu0 %vm482_vm1, %v9617_v28 }
 0xd4e   :  { %3520 = vmatpush1.bf16.msra.mxu1 %v8047_v10  ;;  %3561 = vmatpush1.bf16.msra.mxu0 %v8049_v14  ;;  %v3794_v10 = vld [vmem:[#allocation10 + $0x2c0] sm:$0xff]  ;;  %v8039_v14 = vcombine.low %v3150_v1, %v3158_v2  ;;  %v3780_v2 = vld [vmem:[#allocation10 + $0x250] sm:$0xff] }
 0xd4f   :  { %3521 = vmatprep.subr.bf16.mxu1 %v8032_v29  ;;  %3562 = vmatprep.subr.bf16.mxu0 %v8034_v24  ;;  %v8085_v16 = vcombine.high %v3786_v9, %v3794_v10  ;;  %v8084_v18 = vcombine.low %v3786_v9, %v3794_v10  ;;  %v3788_v29 = vld [vmem:[#allocation10 + $0x290] sm:$0xff] }
 0xd50   :  { %3539 = vmatprep.mubr.bf16.mxu1 %v9158_v39  ;;  %3580 = vmatprep.mubr.bf16.mxu0 %v9158_v39  ;;  %v3796_v24 = vld [vmem:[#allocation10 + $0x2d0] sm:$0xff] }
 0xd51   :  { %v8089_v31 = vcombine.high %v3788_v29, %v3796_v24 }
 0xd52   :  { %3522 = vmatpush1.bf16.msra.mxu1 %v8031_v55  ;;  %3563 = vmatpush1.bf16.msra.mxu0 %v8033_v34  ;;  %v8091_v55 = vcombine.high %v3789_v30, %v3797_v32  ;;  %v9641_v34 = vld [vmem:[#allocation9 + $0x20] sm:$0xff]  ;;  %v3791_v30 = vld [vmem:[#allocation10 + $0x2a8] sm:$0xff] }
 0xd53   :  { %3601 = vmatprep.subr.bf16.mxu1 %v8052_v37  ;;  %3642 = vmatprep.subr.bf16.mxu0 %v8054_v52  ;;  %v3185_v37 = vrot.slane %v9641_v34, %v9453_v58  ;;  %v3193_v52 = vrot.slane %v9641_v34, %v9455_v59  ;;  %v3189_v40 = vrot.slane %v9641_v34, %v9459_v61 }
 0xd54   :  { %v3197_v36 = vrot.slane %v9641_v34, %v9461_v62  ;;  %v3205_v9 = vrot.slane %v9641_v34, %v9471_v12  ;;  %v3213_v10 = vrot.slane %v9641_v34, %v9473_v13  ;;  %v3201_v7 = vrot.slane %v9641_v34, %v9477_v26 }
 0xd55   :  { %8061 = vmatmul.mubr.msk.bf16.vlgmr.msra.gmra.mxu1 %vm482_vm1, %v9617_v28  ;;  %8062 = vmatmul.mubr.msk.bf16.vlgmr.msra.gmra.mxu0 %vm482_vm1, %v9617_v28 }
 0xd56   :  { %3602 = vmatpush1.bf16.msra.mxu1 %v8051_v43  ;;  %3643 = vmatpush1.bf16.msra.mxu0 %v8053_v45 }
 0xd57   :  { %3603 = vmatprep.subr.bf16.mxu1 %v8036_v44  ;;  %3644 = vmatprep.subr.bf16.mxu0 %v8038_v47 }
 0xd58   :  { %3621 = vmatprep.mubr.bf16.mxu1 %v9158_v39  ;;  %3662 = vmatprep.mubr.bf16.mxu0 %v9158_v39 }
 0xd5a   :  { %3604 = vmatpush1.bf16.msra.mxu1 %v8035_v51  ;;  %3645 = vmatpush1.bf16.msra.mxu0 %v8037_v54 }
 0xd5b   :  { %3683 = vmatprep.subr.bf16.mxu1 %v8056_v53  ;;  %3724 = vmatprep.subr.bf16.mxu0 %v8058_v63  ;;  %v3772_v53 = vld [vmem:[#allocation10 + $0x210] sm:$0xff] }
 0xd5d   :  { %8063 = vmatmul.mubr.msk.bf16.vlgmr.msra.gmra.mxu1 %vm482_vm1, %v9617_v28  ;;  %8064 = vmatmul.mubr.msk.bf16.vlgmr.msra.gmra.mxu0 %vm482_vm1, %v9617_v28 }
 0xd5e   :  { %3684 = vmatpush1.bf16.msra.mxu1 %v8055_v4  ;;  %3725 = vmatpush1.bf16.msra.mxu0 %v8057_v5 }
 0xd5f   :  { %3685 = vmatprep.subr.bf16.mxu1 %v8040_v8  ;;  %3726 = vmatprep.subr.bf16.mxu0 %v8042_v56 }
 0xd60   :  { %3703 = vmatprep.mubr.bf16.mxu1 %v9158_v39  ;;  %3744 = vmatprep.mubr.bf16.mxu0 %v9158_v39 }
 0xd62   :  { %3686 = vmatpush1.bf16.msra.mxu1 %v8039_v14  ;;  %3727 = vmatpush1.bf16.msra.mxu0 %v8041_v15 }
 0xd63   :  { %3998 = vmatprep.subr.bf16.mxu1 %v8085_v16  ;;  %4038 = vmatprep.subr.bf16.mxu0 %v8087_v17  ;;  %v8073_v16 = vcombine.high %v3772_v53, %v3780_v2  ;;  %v8075_v17 = vcombine.high %v3773_v60, %v3781_v3 }
 0xd65   :  { %8065 = vmatmul.mubr.msk.bf16.vlgmr.msra.gmra.mxu1 %vm482_vm1, %v9617_v28  ;;  %8066 = vmatmul.mubr.msk.bf16.vlgmr.msra.gmra.mxu0 %vm482_vm1, %v9617_v28  ;;  %v8088_v28 = vcombine.low %v3788_v29, %v3796_v24  ;;  %v3798_v24 = vld [vmem:[#allocation10 + $0x2e0] sm:$0xff] }
 0xd66   :  { %3999 = vmatpush1.bf16.xpose.msra.mxu1 %v8084_v18  ;;  %4039 = vmatpush1.bf16.xpose.msra.mxu0 %v8086_v6 }
 0xd67   :  { %4000 = vmatprep.subr.bf16.mxu1 %v8069_v21  ;;  %4040 = vmatprep.subr.bf16.mxu0 %v8071_v38  ;;  %v3209_v21 = vrot.slane %v9641_v34, %v9479_v27 }
 0xd6e   :  { %4001 = vmatpush1.bf16.xpose.msra.mxu1 %v8068_v22  ;;  %4041 = vmatpush1.bf16.xpose.msra.mxu0 %v8070_v25  ;;  %v3790_v25 = vld [vmem:[#allocation10 + $0x2a0] sm:$0xff] }
 0xd6f   :  { %4078 = vmatprep.subr.bf16.mxu1 %v8089_v31  ;;  %4118 = vmatprep.subr.bf16.mxu0 %v8091_v55  ;;  %v3799_v31 = vld [vmem:[#allocation10 + $0x2e8] sm:$0xff] }
 0xe0d   :  { %v3459_v41 = vpop.f32.mrf.mxu1  ;;  %v3500_v42 = vpop.f32.mrf.mxu0 }
 0xe0e   :  { %v3460_v43 = vadd.f32 %v3459_v41, %v3185_v37  ;;  %v3501_v45 = vadd.f32 %v3500_v42, %v3193_v52  ;;  %v8074_v37 = vcombine.low %v3773_v60, %v3781_v3  ;;  %v3774_v60 = vld [vmem:[#allocation10 + $0x220] sm:$0xff] }
 0xe0f   :  { %v3461_v44 = vpop.f32.mrf.mxu1  ;;  %v3502_v47 = vpop.f32.mrf.mxu0 }
 0xe10   :  { %v3462_v48 = vadd.f32 %v3461_v44, %v3189_v40  ;;  %v3503_v49 = vadd.f32 %v3502_v47, %v3197_v36  ;;  %v3753_v46 = vmax.f32 %v3460_v43, 0.0  ;;  %v3755_v50 = vmax.f32 %v3501_v45, 0.0 }
 0xe11   :  { %v3463_v51 = vpop.f32.mrf.mxu1  ;;  %v3504_v54 = vpop.f32.mrf.mxu0  ;;  %v8093_v44 = vcombine.high %v3790_v25, %v3798_v24  ;;  %v8095_v47 = vcombine.high %v3791_v30, %v3799_v31 }
 0xe12   :  { %v3754_v63 = vmax.f32 %v3462_v48, 0.0  ;;  %v3756_v1 = vmax.f32 %v3503_v49, 0.0  ;;  %v3802_v57 = vpack.c.bf16 %v3753_v46, %v3753_v46  ;;  %v3804_v11 = vpack.c.bf16 %v3755_v50, %v3755_v50 }
 0xe13   :  { %v3464_v4 = vpop.f32.mrf.mxu1  ;;  %v3505_v5 = vpop.f32.mrf.mxu0 }
 0xe14   :  { %v3803_v8 = vpack.c.bf16 %v3754_v63, %v3754_v63  ;;  %v3805_v56 = vpack.c.bf16 %v3756_v1, %v3756_v1  ;;  %v3782_v5 = vld [vmem:[#allocation10 + $0x260] sm:$0xff] }
 0xe15   :  { %v3541_v14 = vpop.f32.mrf.mxu1  ;;  %v3582_v15 = vpop.f32.mrf.mxu0 }
 0xe16   :  { %4018 = vmatprep.mubr.bf16.mxu1 %v3803_v8  ;;  %4058 = vmatprep.mubr.bf16.mxu0 %v3805_v56  ;;  %v3542_v41 = vadd.f32 %v3541_v14, %v3201_v7  ;;  %v3583_v42 = vadd.f32 %v3582_v15, %v3209_v21  ;;  %v3775_v8 = vld [vmem:[#allocation10 + $0x228] sm:$0xff] }
 0xe17   :  { %v3543_v18 = vpop.f32.mrf.mxu1  ;;  %v3584_v6 = vpop.f32.mrf.mxu0  ;;  %4019 = vmatmul.mubr.bf16.vlgmr.msra.gmra.mxu1 %v3802_v57  ;;  %4059 = vmatmul.mubr.bf16.vlgmr.msra.gmra.mxu0 %v3804_v11  ;;  %v3783_v56 = vld [vmem:[#allocation10 + $0x268] sm:$0xff] }
 0xe18   :  { %v3544_v19 = vadd.f32 %v3543_v18, %v3205_v9  ;;  %v3585_v20 = vadd.f32 %v3584_v6, %v3213_v10  ;;  %4079 = vmatpush1.bf16.xpose.msra.mxu1 %v8088_v28  ;;  %4119 = vmatpush1.bf16.xpose.msra.mxu0 %v8090_v33  ;;  %v9659_v28 = vld [vmem:[#allocation9 + $0x28] sm:$0xff]  ;;  %v8072_v33 = vcombine.low %v3772_v53, %v3780_v2  ;;  %v3757_v51 = vmax.f32 %v3542_v41, 0.0 }
 0xe19   :  { %v3545_v35 = vpop.f32.mrf.mxu1  ;;  %v3586_v22 = vpop.f32.mrf.mxu0  ;;  %4080 = vmatprep.subr.bf16.mxu1 %v8073_v16  ;;  %4120 = vmatprep.subr.bf16.mxu0 %v8075_v17  ;;  %v3221_v34 = vrot.slane %v9659_v28, %v9459_v61  ;;  %v3229_v36 = vrot.slane %v9659_v28, %v9461_v62  ;;  %v3759_v54 = vmax.f32 %v3583_v42, 0.0  ;;  %v8092_v10 = vcombine.low %v3790_v25, %v3798_v24  ;;  %v3792_v25 = vld [vmem:[#allocation10 + $0x2b0] sm:$0xff] }
 0xe1a   :  { %v3758_v38 = vmax.f32 %v3544_v19, 0.0  ;;  %v3760_v29 = vmax.f32 %v3585_v20, 0.0  ;;  %v3806_v57 = vpack.c.bf16 %v3757_v51, %v3757_v51  ;;  %v8094_v17 = vcombine.low %v3791_v30, %v3799_v31  ;;  %v3793_v31 = vld [vmem:[#allocation10 + $0x2b8] sm:$0xff] }
 0xe1b   :  { %v3546_v32 = vpop.f32.mrf.mxu1  ;;  %v3587_v55 = vpop.f32.mrf.mxu0  ;;  %v3808_v11 = vpack.c.bf16 %v3759_v54, %v3759_v54  ;;  %v8077_v18 = vcombine.high %v3774_v60, %v3782_v5  ;;  %v8079_v6 = vcombine.high %v3775_v8, %v3783_v56  ;;  %v3217_v7 = vrot.slane %v9659_v28, %v9453_v58  ;;  %v3777_v54 = vld [vmem:[#allocation10 + $0x238] sm:$0xff] }
 0xe1c   :  { %v3807_v52 = vpack.c.bf16 %v3758_v38, %v3758_v38  ;;  %v3809_v40 = vpack.c.bf16 %v3760_v29, %v3760_v29  ;;  %v3225_v22 = vrot.slane %v9659_v28, %v9455_v59  ;;  %v3800_v38 = vld [vmem:[#allocation10 + $0x2f0] sm:$0xff]  ;;  %v3237_v29 = vrot.slane %v9659_v28, %v9471_v12  ;;  %v3801_v32 = vld [vmem:[#allocation10 + $0x2f8] sm:$0xff] }
 0xe1d   :  { %v3623_v43 = vpop.f32.mrf.mxu1  ;;  %v3664_v45 = vpop.f32.mrf.mxu0  ;;  %v3245_v55 = vrot.slane %v9659_v28, %v9473_v13  ;;  %v8096_v51 = vcombine.low %v3792_v25, %v3800_v38 }
 0xe1e   :  { %4098 = vmatprep.mubr.bf16.mxu1 %v3807_v52  ;;  %4138 = vmatprep.mubr.bf16.mxu0 %v3809_v40  ;;  %v8078_v52 = vcombine.low %v3775_v8, %v3783_v56  ;;  %v8097_v40 = vcombine.high %v3792_v25, %v3800_v38 }
 0xe1f   :  { %v3625_v48 = vpop.f32.mrf.mxu1  ;;  %v3666_v49 = vpop.f32.mrf.mxu0 }
 0xe20   :  { %v3626_v46 = vadd.f32 %v3625_v48, %v3221_v34  ;;  %v3667_v50 = vadd.f32 %v3666_v49, %v3229_v36  ;;  %4081 = vmatpush1.bf16.xpose.msra.mxu1 %v8072_v33  ;;  %4121 = vmatpush1.bf16.xpose.msra.mxu0 %v8074_v37  ;;  %v8076_v33 = vcombine.low %v3774_v60, %v3782_v5  ;;  %v3776_v49 = vld [vmem:[#allocation10 + $0x230] sm:$0xff] }
 0xe21   :  { %v3627_v53 = vpop.f32.mrf.mxu1  ;;  %v3668_v63 = vpop.f32.mrf.mxu0  ;;  %4158 = vmatprep.subr.bf16.mxu1 %v8093_v44  ;;  %4198 = vmatprep.subr.bf16.mxu0 %v8095_v47  ;;  %v3624_v37 = vadd.f32 %v3623_v43, %v3217_v7  ;;  %v3665_v34 = vadd.f32 %v3664_v45, %v3225_v22  ;;  %v8099_v36 = vcombine.high %v3793_v31, %v3801_v32 }
 0xe22   :  { %v3762_v1 = vmax.f32 %v3626_v46, 0.0  ;;  %v3764_v2 = vmax.f32 %v3667_v50, 0.0  ;;  %v3784_v46 = vld [vmem:[#allocation10 + $0x270] sm:$0xff]  ;;  %v3785_v53 = vld [vmem:[#allocation10 + $0x278] sm:$0xff]  ;;  %v8098_v63 = vcombine.low %v3793_v31, %v3801_v32  ;;  %v3241_v5 = vrot.slane %v9659_v28, %v9479_v27  ;;  %v8067_v31 = vld [vmem:[#allocation12 + $0x2] ss:$0 sm:$0xff] }
 0xe23   :  { %v3628_v3 = vpop.f32.mrf.mxu1  ;;  %v3669_v4 = vpop.f32.mrf.mxu0  ;;  %v3761_v44 = vmax.f32 %v3624_v37, 0.0  ;;  %v3763_v47 = vmax.f32 %v3665_v34, 0.0  ;;  %v8081_v45 = vcombine.high %v3776_v49, %v3784_v46  ;;  %v8083_v60 = vcombine.high %v3777_v54, %v3785_v53 }
 0xe24   :  { %v3811_v9 = vpack.c.bf16 %v3762_v1, %v3762_v1  ;;  %v3813_v14 = vpack.c.bf16 %v3764_v2, %v3764_v2  ;;  %v3233_v4 = vrot.slane %v9659_v28, %v9477_v26  ;;  %v8080_v8 = vcombine.low %v3776_v49, %v3784_v46 }
 0xe25   :  { %v9665_v15 = vpop.f32.mrf.mxu1  ;;  %v9667_v16 = vpop.f32.mrf.mxu0  ;;  %v3810_v43 = vpack.c.bf16 %v3761_v44, %v3761_v44  ;;  %v3812_v1 = vpack.c.bf16 %v3763_v47, %v3763_v47 }
 0xe26   :  { %v3706_v56 = vadd.f32 %v9665_v15, %v3233_v4 }
 0xe27   :  { %4099 = vmatmul.mubr.bf16.vlgmr.msra.gmra.mxu1 %v3806_v57  ;;  %4139 = vmatmul.mubr.bf16.vlgmr.msra.gmra.mxu0 %v3808_v11  ;;  %v3707_v19 = vpop.f32.mrf.mxu1  ;;  %v3748_v20 = vpop.f32.mrf.mxu0 }
 0xe28   :  { %4159 = vmatpush1.bf16.xpose.msra.mxu1 %v8092_v10  ;;  %4178 = vmatprep.mubr.bf16.mxu1 %v3811_v9  ;;  %v3708_v41 = vadd.f32 %v3707_v19, %v3237_v29  ;;  %v3749_v42 = vadd.f32 %v3748_v20, %v3245_v55  ;;  %v8082_v9 = vcombine.low %v3777_v54, %v3785_v53  ;;  %v3765_v57 = vmax.f32 %v3706_v56, 0.0 }
 0xe29   :  { %4199 = vmatpush1.bf16.xpose.msra.mxu0 %v8094_v17  ;;  %4218 = vmatprep.mubr.bf16.mxu0 %v3813_v14  ;;  %v3709_v21 = vpop.f32.mrf.mxu1  ;;  %v3750_v35 = vpop.f32.mrf.mxu0  ;;  %v3747_v10 = vadd.f32 %v9667_v16, %v3241_v5 }
 0xe2a   :  { %4160 = vmatprep.subr.bf16.mxu1 %v8077_v18  ;;  %4200 = vmatprep.subr.bf16.mxu0 %v8079_v6  ;;  %v3766_v48 = vmax.f32 %v3708_v41, 0.0  ;;  %v3768_v50 = vmax.f32 %v3749_v42, 0.0  ;;  %v3814_v14 = vpack.c.bf16 %v3765_v57, %v3765_v57  ;;  %v8440_v57 = vld [vmem:[%s10003_s26] sm:$0xff]  }
 0xe2b   :  { %v3710_v24 = vpop.f32.mrf.mxu1  ;;  %v3751_v30 = vpop.f32.mrf.mxu0  ;;  %v3767_v11 = vmax.f32 %v3747_v10, 0.0  ;;  %v8439_v10 = vld [vmem:[%s10003_s26 + $0x8] sm:$0xff]  }
 0xe2c   :  { %v3815_v2 = vpack.c.bf16 %v3766_v48, %v3766_v48  ;;  %v3817_v3 = vpack.c.bf16 %v3768_v50, %v3768_v50 }
 0xe2d   :  { %v3816_v17 = vpack.c.bf16 %v3767_v11, %v3767_v11 }
 0xe30   :  { %4161 = vmatpush1.bf16.xpose.msra.mxu1 %v8076_v33 }
 0xe31   :  { %4201 = vmatpush1.bf16.xpose.msra.mxu0 %v8078_v52  ;;  %4238 = vmatprep.subr.bf16.mxu1 %v8097_v40 }
 0xe32   :  { %4278 = vmatprep.subr.bf16.mxu0 %v8099_v36 }
 0xe37   :  { %4179 = vmatmul.mubr.bf16.vlgmr.msra.gmra.mxu1 %v3810_v43 }
 0xe38   :  { %4219 = vmatmul.mubr.bf16.vlgmr.msra.gmra.mxu0 %v3812_v1  ;;  %4239 = vmatpush1.bf16.xpose.msra.mxu1 %v8096_v51 }
 0xe39   :  { %4258 = vmatprep.mubr.bf16.mxu1 %v3815_v2  ;;  %4279 = vmatpush1.bf16.xpose.msra.mxu0 %v8098_v63 }
 0xe3a   :  { %4298 = vmatprep.mubr.bf16.mxu0 %v3817_v3  ;;  %4240 = vmatprep.subr.bf16.mxu1 %v8081_v45 }
 0xe3b   :  { %4280 = vmatprep.subr.bf16.mxu0 %v8083_v60 }
 0xe40   :  { %4241 = vmatpush1.bf16.xpose.msra.mxu1 %v8080_v8 }
 0xe41   :  { %4281 = vmatpush1.bf16.xpose.msra.mxu0 %v8082_v9  ;;  %8328 = vmatprep.subr.bf16.mxu1 %v9156_v0 }
 0xe42   :  { %8336 = vmatprep.subr.bf16.mxu0 %v9156_v0 }
 0xe47   :  { %4259 = vmatmul.mubr.bf16.vlgmr.msra.gmra.mxu1 %v3814_v14 }
 0xe48   :  { %4299 = vmatmul.mubr.bf16.vlgmr.msra.gmra.mxu0 %v3816_v17  ;;  %8332 = vmatprep.mubr.msk.bf16.mxu1 %vm9157_vm0, %v9156_v0 }
 0xe49   :  { %8338 = vmatprep.mubr.msk.bf16.mxu0 %vm9157_vm0, %v9156_v0  ;;  %8329 = vmatpush3.bf16.msra.mxu1 %v8439_v10  ;;  %v8107_v10 = vld [vmem:[#allocation24] ss:$0 sm:$0xff] }
 0xe4a   :  { %8330 = vmatprep.subr.bf16.mxu1 %v9156_v0 }
 0xe4d   :  { %8331 = vmatpush3.bf16.msra.mxu1 %v8440_v57  ;;  %v8112_v57 = vld [vmem:[#allocation21] ss:$0 sm:$0xff] }
 0xe4e   :  { %8342 = vmatprep.subr.bf16.mxu1 %v9156_v0 }
 0xed7   :  { %v4020_v28 = vpop.f32.mrf.mxu1  ;;  %v4060_v15 = vpop.f32.mrf.mxu0 }
 0xed8   :  { %v4021_v32 = vadd.f32 %v8067_v31, %v4020_v28  ;;  %v8100_v28 = vld [vmem:[#allocation13 + $0x2] ss:$0 sm:$0xff] }
 0xed9   :  { %v4022_v16 = vpop.f32.mrf.mxu1  ;;  %v4062_v18 = vpop.f32.mrf.mxu0 }
 0xeda   :  { %v4061_v52 = vadd.f32 %v4060_v15, %v4021_v32  ;;  %v8101_v16 = vld [vmem:[#allocation15 + $0x2] ss:$0 sm:$0xff]  ;;  %v4417_v32 = vld [vmem:[#allocation22] sm:$0xf] }
 0xedb   :  { %v4023_v6 = vpop.f32.mrf.mxu1  ;;  %v4063_v19 = vpop.f32.mrf.mxu0 }
 0xedd   :  { %v4024_v20 = vpop.f32.mrf.mxu1  ;;  %v4064_v7 = vpop.f32.mrf.mxu0 }
 0xede   :  { %v4474_v20 = vld [vmem:[#allocation16] sm:$0xf] }
 0xedf   :  { %v4483_v7 = vsel %vm4430_vm2, %v4474_v20, 0  ;;  %v4586_v20 = vld [vmem:[#allocation28] sm:$0xff] }
 0xee7   :  { %v4100_v21 = vpop.f32.mrf.mxu1  ;;  %v4140_v35 = vpop.f32.mrf.mxu0 }
 0xee8   :  { %v4101_v36 = vadd.f32 %v4100_v21, %v4061_v52  ;;  %v8102_v21 = vld [vmem:[%s10004_s28] ss:$0 sm:$0xff] }
 0xee9   :  { %v4102_v22 = vpop.f32.mrf.mxu1  ;;  %v4142_v25 = vpop.f32.mrf.mxu0 }
 0xeea   :  { %v4141_v47 = vadd.f32 %v4140_v35, %v4101_v36 }
 0xeeb   :  { %v4103_v38 = vpop.f32.mrf.mxu1  ;;  %v4143_v29 = vpop.f32.mrf.mxu0 }
 0xeed   :  { %v4104_v24 = vpop.f32.mrf.mxu1  ;;  %v4144_v30 = vpop.f32.mrf.mxu0 }
 0xef7   :  { %v4180_v55 = vpop.f32.mrf.mxu1 }
 0xef8   :  { %v4220_v33 = vpop.f32.mrf.mxu0  ;;  %v4181_v48 = vadd.f32 %v4180_v55, %v4141_v47  ;;  %v4432_v55 = vsel %vm4430_vm2, %v4417_v32, 0  ;;  %v4589_v32 = vld [vmem:[#allocation28 + $0x18] sm:$0xff] }
 0xef9   :  { %v4182_v37 = vpop.f32.mrf.mxu1  ;;  %8337 = vmatpush3.bf16.msra.mxu0 %v4432_v55  ;;  %v8122_v55 = vcombine.high %v4589_v32, %v4589_v32 }
 0xefa   :  { %v4222_v40 = vpop.f32.mrf.mxu0  ;;  %v4221_v49 = vadd.f32 %v4220_v33, %v4181_v48  ;;  %v4407_v37 = vld [vmem:[%s10005_s20] sm:$0xff] }
 0xefb   :  { %v4183_v34 = vpop.f32.mrf.mxu1 }
 0xefc   :  { %v4223_v41 = vpop.f32.mrf.mxu0 }
 0xefd   :  { %v4184_v42 = vpop.f32.mrf.mxu1  ;;  %v8109_v41 = vld [vmem:[#allocation18] ss:$0 sm:$0xff] }
 0xefe   :  { %v4224_v44 = vpop.f32.mrf.mxu0 }
 0xf07   :  { %v4260_v46 = vpop.f32.mrf.mxu1 }
 0xf08   :  { %v4261_v50 = vadd.f32 %v4260_v46, %v4221_v49  ;;  %v4300_v51 = vpop.f32.mrf.mxu0 }
 0xf09   :  { %v4262_v54 = vpop.f32.mrf.mxu1 }
 0xf0a   :  { %v4301_v53 = vadd.f32 %v4300_v51, %v4261_v50  ;;  %v4302_v43 = vpop.f32.mrf.mxu0 }
 0xf0b   :  { %v4263_v63 = vpop.f32.mrf.mxu1 }
 0xf0c   :  { %v4303_v1 = vpop.f32.mrf.mxu0  ;;  %v4306_v45 = vadd.f32 %v4301_v53, %v9613_v23 }
 0xf0d   :  { %v4264_v2 = vpop.f32.mrf.mxu1 }
 0xf0e   :  { %v4304_v60 = vpop.f32.mrf.mxu0  ;;  %v4311_v3 = vsel %vm482_vm1, %v4306_v45, 0.0 }
 0xf0f   :  { %4312 = vadd.xlane.f32.xlu0 %v4311_v3 }
 0xf98   :  { %v4313_v4 = vpop.xlane.xlu0 %4312 }
 0xf99   :  { %v4314_v5 = vmul.f32 0.03125, %v4313_v4 }
 0xf9b   :  { %v4315_v8 = vsub.f32 %v4306_v45, %v4314_v5 }
 0xf9d   :  { %v4316_v56 = vmul.f32 %v4315_v8, %v4315_v8 }
 0xf9f   :  { %v4317_v9 = vsel %vm482_vm1, %v4316_v56, 0.0  ;;  %v8111_v56 = vld [vmem:[#allocation19] ss:$0 sm:$0xff] }
 0xfa0   :  { %4318 = vadd.xlane.f32.xlu1 %v4317_v9 }
0x1029   :  { %v4319_v23 = vpop.xlane.xlu1 %4318 }
0x102a   :  { %v4320_v11 = vmul.f32 0.03125, %v4319_v23 }
0x102c   :  { %v4321_v14 = vadd.f32 1e-05, %v4320_v11 }
0x102e   :  { %8547 = vrsqrt.f32 %v4321_v14 }
0x103b   :  { %v8548_v17 = vpop.eup %8547 }
0x103c   :  { %v4323_v15 = vmul.f32 %v8548_v17, %v4315_v8 }
0x103e   :  { %v4330_v18 = vmul.f32 %v8100_v28, %v4323_v15 }
0x1040   :  { %v4337_v6 = vadd.f32 %v8101_v16, %v4330_v18 }
0x1042   :  { %v4342_v19 = vpack.c.bf16 %v4337_v6, %v4337_v6 }
0x1044   :  { %8333 = vmatmul.mubr.msk.bf16.vlgmr.msra.gmra.mxu1 %vm482_vm1, %v4342_v19 }
0x1045   :  { %8344 = vmatprep.mubr.msk.bf16.mxu1 %vm9157_vm0, %v9156_v0  ;;  %8343 = vmatpush3.bf16.msra.mxu1 %v4483_v7  ;;  %v4587_v7 = vld [vmem:[#allocation28 + $0x8] sm:$0xff] }
0x1104   :  { %v4399_v35 = vpop.f32.mrf.mxu1 }
0x1105   :  { %v9701_v22 = vadd.f32 %v8102_v21, %v4399_v35  ;;  %v8116_v21 = vcombine.high %v4586_v20, %v4586_v20  ;;  %v8115_v35 = vcombine.low %v4586_v20, %v4586_v20  ;;  %v4595_v20 = vld [vmem:[#allocation30] sm:$0xff] }
0x1106   :  { %v8334_v25 = vpop.f32.mrf.mxu1 }
0x1107   :  { %v8106_v38 = vclamps-f32 %v9701_v22, 20.0  ;;  %v8118_v25 = vcombine.high %v4587_v7, %v4587_v7  ;;  %8131 = vmatprep.subr.msk.bf16.mxu0 %vm4430_vm2, %v8116_v21  ;;  %v4610_v21 = vrot.slane %v4595_v20, %v9455_v59 }
0x1108   :  { %v4402_v29 = vpop.f32.mrf.mxu1 }
0x1109   :  { %v4408_v24 = vmul.f32 0.5, %v8106_v38  ;;  %v8117_v38 = vcombine.low %v4587_v7, %v4587_v7  ;;  %v4723_v29 = vsel %vm4430_vm2, %v8115_v35, 0  ;;  %8133 = vmatprep.subr.msk.bf16.mxu1 %vm4430_vm2, %v8118_v25  ;;  %v4602_v7 = vrot.slane %v4595_v20, %v9453_v58 }
0x110a   :  { %v8335_v30 = vpop.f32.mrf.mxu1  ;;  %v4606_v35 = vrot.slane %v4595_v20, %v9459_v61  ;;  %v4614_v25 = vrot.slane %v4595_v20, %v9461_v62 }
0x110b   :  { %v4409_v31 = vmul.f32 1.442695, %v4408_v24  ;;  %v4729_v24 = vsel %vm4430_vm2, %v8117_v38, 0  ;;  %v4588_v30 = vld [vmem:[#allocation28 + $0x10] sm:$0xff] }
0x110d   :  { %8549 = vpow2.f32 %v4409_v31  ;;  %v8120_v31 = vcombine.high %v4588_v30, %v4588_v30 }
0x111a   :  { %v8550_v33 = vpop.eup %8549 }
0x111b   :  { %4412 = vrot.lane.b32.xlu0 %v8550_v33, %s9159_s29 }
0x118d   :  { %v4413_v52 = vpop.permute.xlu0 %4412 }
0x118e   :  { %v4415_v40 = vmul.f32 %v4413_v52, %v4407_v37 }
0x1190   :  { %v4416_v34 = vadd.f32 %v4415_v40, %v9701_v22 }
0x1192   :  { %v4418_v36 = vpack.c.bf16 %v4416_v34, %v4416_v34 }
0x1194   :  { %8339 = vmatmul.mubr.msk.bf16.vlgmr.msra.gmra.mxu0 %vm4426_vm3, %v4418_v36  ;;  %8345 = vmatmul.mubr.msk.bf16.vlgmr.msra.gmra.mxu1 %vm4426_vm3, %v4418_v36 }
0x1195   :  { %4802 = vmatprep.mubr.bf16.mxu0 %v9158_v39  ;;  %4843 = vmatprep.mubr.bf16.mxu1 %v9158_v39 }
0x1196   :  { %4785 = vmatpush1.bf16.msra.mxu0 %v4723_v29  ;;  %4826 = vmatpush1.bf16.msra.mxu1 %v4729_v24 }
0x1197   :  { %8135 = vmatprep.subr.msk.bf16.mxu0 %vm4430_vm2, %v8120_v31  ;;  %8137 = vmatprep.subr.msk.bf16.mxu1 %vm4430_vm2, %v8122_v55 }
0x1254   :  { %v4468_v42 = vpop.f32.mrf.mxu0  ;;  %v4519_v44 = vpop.f32.mrf.mxu1 }
0x1255   :  { %v4520_v47 = vadd.f32 %v8109_v41, %v4519_v44  ;;  %v9714_v11 = vadd.f32 %v8107_v10, %v4468_v42  ;;  %v8114_v41 = vld [vmem:[#allocation27] ss:$0 sm:$0xff]  ;;  %v8119_v44 = vcombine.low %v4588_v30, %v4588_v30 }
0x1256   :  { %v8340_v48 = vpop.f32.mrf.mxu0  ;;  %v8346_v49 = vpop.f32.mrf.mxu1 }
0x1257   :  { %v4525_v46 = vadd.f32 %v4520_v47, %v4416_v34  ;;  %v8113_v34 = vld [vmem:[#allocation25] ss:$0 sm:$0xff]  ;;  %v8121_v47 = vcombine.low %v4589_v32, %v4589_v32  ;;  %v4590_v49 = vld [vmem:[#allocation28 + $0x20] sm:$0xff] }
0x1258   :  { %v4471_v50 = vpop.f32.mrf.mxu0  ;;  %v4522_v51 = vpop.f32.mrf.mxu1 }
0x1259   :  { %v4528_v54 = vsel %vm4426_vm3, %v4525_v46, 0.0  ;;  %v4735_v51 = vsel %vm4430_vm2, %v8119_v44, 0  ;;  %v4626_v44 = vrot.slane %v4595_v20, %v9479_v27 }
0x125a   :  { %v8341_v53 = vpop.f32.mrf.mxu0  ;;  %4529 = vadd.xlane.f32.xlu1 %v4528_v54  ;;  %v8347_v43 = vpop.f32.mrf.mxu1  ;;  %v4741_v54 = vsel %vm4430_vm2, %v8121_v47, 0  ;;  %v9759_v47 = vld [vmem:[#allocation31 + $0x20] sm:$0xff] }
0x125b   :  { %v8124_v53 = vcombine.high %v4590_v49, %v4590_v49 }
0x12e3   :  { %v4530_v63 = vpop.xlane.xlu1 %4529 }
0x12e4   :  { %v4532_v1 = vmul.f32 0.125, %v4530_v63  ;;  %v8123_v63 = vcombine.low %v4590_v49, %v4590_v49  ;;  %v9761_v49 = vld [vmem:[#allocation31 + $0x28] sm:$0xff] }
0x12e6   :  { %v4533_v45 = vsub.f32 %v4525_v46, %v4532_v1  ;;  %v4591_v46 = vld [vmem:[#allocation28 + $0x28] sm:$0xff] }
0x12e7   :  { %v8126_v43 = vcombine.high %v4591_v46, %v4591_v46  ;;  %v8125_v1 = vcombine.low %v4591_v46, %v4591_v46 }
0x12e8   :  { %v4534_v2 = vmul.f32 %v4533_v45, %v4533_v45 }
0x12ea   :  { %v4535_v60 = vsel %vm4426_vm3, %v4534_v2, 0.0  ;;  %v4593_v2 = vld [vmem:[#allocation28 + $0x38] sm:$0xff] }
0x12eb   :  { %4536 = vadd.xlane.f32.xlu1 %v4535_v60  ;;  %v4747_v60 = vsel %vm4430_vm2, %v8123_v63, 0  ;;  %v4630_v63 = vrot.slane %v4595_v20, %v9473_v13 }
0x1374   :  { %v4537_v3 = vpop.xlane.xlu1 %4536 }
0x1375   :  { %v4538_v4 = vmul.f32 0.125, %v4537_v3  ;;  %v4753_v3 = vsel %vm4430_vm2, %v8125_v1, 0 }
0x1377   :  { %v4539_v5 = vadd.f32 1e-05, %v4538_v4 }
0x1379   :  { %8551 = vrsqrt.f32 %v4539_v5  ;;  %v8130_v5 = vcombine.high %v4593_v2, %v4593_v2 }
0x1386   :  { %v8552_v8 = vpop.eup %8551 }
0x1387   :  { %v4541_v9 = vmul.f32 %v8552_v8, %v4533_v45  ;;  %v4592_v45 = vld [vmem:[#allocation28 + $0x30] sm:$0xff] }
0x1388   :  { %v8128_v4 = vcombine.high %v4592_v45, %v4592_v45  ;;  %v8127_v8 = vcombine.low %v4592_v45, %v4592_v45 }
0x1389   :  { %v4548_v23 = vmul.f32 %v8111_v56, %v4541_v9  ;;  %v8129_v56 = vcombine.low %v4593_v2, %v4593_v2 }
0x138a   :  { %v4759_v9 = vsel %vm4430_vm2, %v8127_v8, 0 }
0x138b   :  { %v4555_v14 = vadd.f32 %v8112_v57, %v4548_v23  ;;  %v4765_v10 = vsel %vm4430_vm2, %v8129_v56, 0  ;;  %v5114_v57 = vld [vmem:[#allocation31] sm:$0xff]  ;;  %v5115_v23 = vld [vmem:[#allocation31 + $0x8] sm:$0xff] }
0x138d   :  { %v4556_v17 = vadd.f32 %v4555_v14, %v9714_v11  ;;  %v8149_v14 = vcombine.high %v5114_v57, %v5114_v57 }
0x138f   :  { %v4559_v28 = vsel %vm4426_vm3, %v4556_v17, 0.0 }
0x1390   :  { %4560 = vadd.xlane.f32.xlu1 %v4559_v28  ;;  %v8148_v28 = vcombine.low %v5114_v57, %v5114_v57  ;;  %v9769_v57 = vld [vmem:[#allocation30 + $0x8] sm:$0xff] }
0x1419   :  { %v4561_v15 = vpop.xlane.xlu1 %4560 }
0x141a   :  { %v4562_v16 = vmul.f32 0.125, %v4561_v15  ;;  %v8150_v15 = vcombine.low %v5115_v23, %v5115_v23 }
0x141c   :  { %v4563_v18 = vsub.f32 %v4556_v17, %v4562_v16  ;;  %v8151_v17 = vcombine.high %v5115_v23, %v5115_v23  ;;  %v5116_v16 = vld [vmem:[#allocation31 + $0x10] sm:$0xff] }
0x141e   :  { %v4564_v6 = vmul.f32 %v4563_v18, %v4563_v18 }
0x1420   :  { %v4565_v19 = vsel %vm4426_vm3, %v4564_v6, 0.0  ;;  %v8153_v6 = vcombine.high %v5116_v16, %v5116_v16 }
0x1421   :  { %4566 = vadd.xlane.f32.xlu1 %v4565_v19 }
0x14aa   :  { %v4567_v33 = vpop.xlane.xlu1 %4566 }
0x14ab   :  { %v4568_v37 = vmul.f32 0.125, %v4567_v33 }
0x14ad   :  { %v4569_v52 = vadd.f32 1e-05, %v4568_v37 }
0x14af   :  { %8553 = vrsqrt.f32 %v4569_v52 }
0x14bc   :  { %v8554_v40 = vpop.eup %8553 }
0x14bd   :  { %v4571_v36 = vmul.f32 %v8554_v40, %v4563_v18  ;;  %v5117_v18 = vld [vmem:[#allocation31 + $0x18] sm:$0xff] }
0x14be   :  { %v8155_v19 = vcombine.high %v5117_v18, %v5117_v18  ;;  %v8154_v1 = vcombine.low %v5117_v18, %v5117_v18 }
0x14bf   :  { %v4578_v42 = vmul.f32 %v8113_v34, %v4571_v36 }
0x14c1   :  { %v9725_v48 = vadd.f32 %v8114_v41, %v4578_v42  ;;  %v4618_v42 = vrot.slane %v4595_v20, %v9477_v26 }
0x14c3   :  { %v4594_v50 = vpack.c.bf16 %v9725_v48, %v9725_v48 }
0x14c5   :  { %8132 = vmatmul.mubr.msk.bf16.vlgmr.msra.gmra.mxu0 %vm4426_vm3, %v4594_v50  ;;  %8134 = vmatmul.mubr.msk.bf16.vlgmr.msra.gmra.mxu1 %vm4426_vm3, %v4594_v50 }
0x14c6   :  { %4867 = vmatpush1.bf16.msra.mxu0 %v4735_v51  ;;  %4908 = vmatpush1.bf16.msra.mxu1 %v4741_v54  ;;  %v8152_v51 = vcombine.low %v5116_v16, %v5116_v16  ;;  %v4622_v54 = vrot.slane %v4595_v20, %v9471_v12  ;;  %v4642_v20 = vrot.slane %v9769_v57, %v9455_v59 }
0x14c7   :  { %4884 = vmatprep.mubr.bf16.mxu0 %v9158_v39  ;;  %4925 = vmatprep.mubr.bf16.mxu1 %v9158_v39 }
0x14c8   :  { %8139 = vmatprep.subr.msk.bf16.mxu0 %vm4430_vm2, %v8124_v53  ;;  %8141 = vmatprep.subr.msk.bf16.mxu1 %vm4430_vm2, %v8126_v43 }
0x14cd   :  { %8136 = vmatmul.mubr.msk.bf16.vlgmr.msra.gmra.mxu0 %vm4426_vm3, %v4594_v50  ;;  %8138 = vmatmul.mubr.msk.bf16.vlgmr.msra.gmra.mxu1 %vm4426_vm3, %v4594_v50 }
0x14ce   :  { %4949 = vmatpush1.bf16.msra.mxu0 %v4747_v60  ;;  %4990 = vmatpush1.bf16.msra.mxu1 %v4753_v3 }
0x14cf   :  { %4966 = vmatprep.mubr.bf16.mxu0 %v9158_v39  ;;  %5007 = vmatprep.mubr.bf16.mxu1 %v9158_v39 }
0x14d0   :  { %8143 = vmatprep.subr.msk.bf16.mxu0 %vm4430_vm2, %v8128_v4  ;;  %8145 = vmatprep.subr.msk.bf16.mxu1 %vm4430_vm2, %v8130_v5  ;;  %v8157_v4 = vcombine.high %v9759_v47, %v9759_v47  ;;  %v8159_v5 = vcombine.high %v9761_v49, %v9761_v49 }
0x14d5   :  { %8140 = vmatmul.mubr.msk.bf16.vlgmr.msra.gmra.mxu0 %vm4426_vm3, %v4594_v50  ;;  %8142 = vmatmul.mubr.msk.bf16.vlgmr.msra.gmra.mxu1 %vm4426_vm3, %v4594_v50 }
0x14d6   :  { %5031 = vmatpush1.bf16.msra.mxu0 %v4759_v9  ;;  %5072 = vmatpush1.bf16.msra.mxu1 %v4765_v10 }
0x14d7   :  { %5048 = vmatprep.mubr.bf16.mxu0 %v9158_v39  ;;  %5089 = vmatprep.mubr.bf16.mxu1 %v9158_v39 }
0x14d8   :  { %5215 = vmatprep.subr.bf16.mxu0 %v8149_v14  ;;  %5255 = vmatprep.subr.bf16.mxu1 %v8151_v17 }
0x14dd   :  { %8144 = vmatmul.mubr.msk.bf16.vlgmr.msra.gmra.mxu0 %vm4426_vm3, %v4594_v50  ;;  %8146 = vmatmul.mubr.msk.bf16.vlgmr.msra.gmra.mxu1 %vm4426_vm3, %v4594_v50 }
0x14de   :  { %5216 = vmatpush1.bf16.xpose.msra.mxu0 %v8148_v28  ;;  %5256 = vmatpush1.bf16.xpose.msra.mxu1 %v8150_v15 }
0x14df   :  { %5295 = vmatprep.subr.bf16.mxu0 %v8153_v6  ;;  %5335 = vmatprep.subr.bf16.mxu1 %v8155_v19  ;;  %v4634_v19 = vrot.slane %v9769_v57, %v9453_v58 }
0x1585   :  { %v4804_v38 = vpop.f32.mrf.mxu0  ;;  %v4845_v29 = vpop.f32.mrf.mxu1 }
0x1586   :  { %v4805_v24 = vadd.f32 %v4804_v38, %v4602_v7  ;;  %v4846_v30 = vadd.f32 %v4845_v29, %v4610_v21  ;;  %v5120_v7 = vld [vmem:[#allocation31 + $0x30] sm:$0xff]  ;;  %v5121_v21 = vld [vmem:[#allocation31 + $0x38] sm:$0xff]  ;;  %v8156_v38 = vcombine.low %v9759_v47, %v9759_v47  ;;  %v4638_v29 = vrot.slane %v9769_v57, %v9459_v61 }
0x1587   :  { %v4806_v31 = vpop.f32.mrf.mxu0  ;;  %v4847_v32 = vpop.f32.mrf.mxu1 }
0x1588   :  { %v4807_v55 = vadd.f32 %v4806_v31, %v4606_v35  ;;  %v4848_v33 = vadd.f32 %v4847_v32, %v4614_v25  ;;  %v5098_v37 = vmax.f32 %v4805_v24, 0.0  ;;  %v5100_v52 = vmax.f32 %v4846_v30, 0.0 }
0x1589   :  { %v4808_v40 = vpop.f32.mrf.mxu0  ;;  %v4849_v34 = vpop.f32.mrf.mxu1  ;;  %v4646_v31 = vrot.slane %v9769_v57, %v9461_v62  ;;  %v8158_v32 = vcombine.low %v9761_v49, %v9761_v49 }
0x158a   :  { %v5099_v36 = vmax.f32 %v4807_v55, 0.0  ;;  %v5101_v41 = vmax.f32 %v4848_v33, 0.0  ;;  %v5122_v45 = vpack.c.bf16 %v5098_v37, %v5098_v37  ;;  %v5124_v2 = vpack.c.bf16 %v5100_v52, %v5100_v52 }
0x158b   :  { %v4809_v46 = vpop.f32.mrf.mxu0  ;;  %v4850_v50 = vpop.f32.mrf.mxu1  ;;  %v8161_v40 = vcombine.high %v5120_v7, %v5120_v7  ;;  %v8163_v34 = vcombine.high %v5121_v21, %v5121_v21 }
0x158c   :  { %v5123_v53 = vpack.c.bf16 %v5099_v36, %v5099_v36  ;;  %v5125_v43 = vpack.c.bf16 %v5101_v41, %v5101_v41 }
0x158d   :  { %v4886_v60 = vpop.f32.mrf.mxu0  ;;  %v4927_v3 = vpop.f32.mrf.mxu1 }
0x158e   :  { %v4887_v8 = vadd.f32 %v4886_v60, %v4618_v42  ;;  %v4928_v56 = vadd.f32 %v4927_v3, %v4626_v44  ;;  %5233 = vmatprep.mubr.bf16.mxu0 %v5123_v53  ;;  %5273 = vmatprep.mubr.bf16.mxu1 %v5125_v43  ;;  %v8160_v60 = vcombine.low %v5120_v7, %v5120_v7 }
0x158f   :  { %v4888_v9 = vpop.f32.mrf.mxu0  ;;  %v4929_v10 = vpop.f32.mrf.mxu1  ;;  %5234 = vmatmul.mubr.bf16.vlgmr.msra.gmra.mxu0 %v5122_v45  ;;  %5274 = vmatmul.mubr.bf16.vlgmr.msra.gmra.mxu1 %v5124_v2  ;;  %v4654_v3 = vrot.slane %v9769_v57, %v9471_v12 }
0x1590   :  { %v4889_v23 = vadd.f32 %v4888_v9, %v4622_v54  ;;  %v4930_v14 = vadd.f32 %v4929_v10, %v4630_v63  ;;  %5296 = vmatpush1.bf16.xpose.msra.mxu0 %v8152_v51  ;;  %5336 = vmatpush1.bf16.xpose.msra.mxu1 %v8154_v1  ;;  %v5102_v17 = vmax.f32 %v4887_v8, 0.0  ;;  %v5104_v28 = vmax.f32 %v4928_v56, 0.0 }
0x1591   :  { %v4890_v15 = vpop.f32.mrf.mxu0  ;;  %v4931_v16 = vpop.f32.mrf.mxu1  ;;  %5375 = vmatprep.subr.bf16.mxu0 %v8157_v4  ;;  %5415 = vmatprep.subr.bf16.mxu1 %v8159_v5  ;;  %v4650_v63 = vrot.slane %v9769_v57, %v9477_v26  ;;  %v4658_v1 = vrot.slane %v9769_v57, %v9479_v27  ;;  %v4662_v8 = vrot.slane %v9769_v57, %v9473_v13 }
0x1592   :  { %v5103_v18 = vmax.f32 %v4889_v23, 0.0  ;;  %v5105_v6 = vmax.f32 %v4930_v14, 0.0  ;;  %v5126_v55 = vpack.c.bf16 %v5102_v17, %v5102_v17  ;;  %v5128_v33 = vpack.c.bf16 %v5104_v28, %v5104_v28 }
0x1593   :  { %v4891_v35 = vpop.f32.mrf.mxu0  ;;  %v4932_v25 = vpop.f32.mrf.mxu1  ;;  %v8162_v56 = vcombine.low %v5121_v21, %v5121_v21 }
0x1594   :  { %v5127_v24 = vpack.c.bf16 %v5103_v18, %v5103_v18  ;;  %v5129_v30 = vpack.c.bf16 %v5105_v6, %v5105_v6 }
0x1595   :  { %v4968_v37 = vpop.f32.mrf.mxu0  ;;  %v5009_v52 = vpop.f32.mrf.mxu1 }
0x1596   :  { %v4969_v36 = vadd.f32 %v4968_v37, %v4634_v19  ;;  %v5010_v41 = vadd.f32 %v5009_v52, %v4642_v20  ;;  %5313 = vmatprep.mubr.bf16.mxu0 %v5127_v24  ;;  %5353 = vmatprep.mubr.bf16.mxu1 %v5129_v30  ;;  %v8147_v52 = vld [vmem:[#allocation33] ss:$0 sm:$0xff] }
0x1597   :  { %v4970_v42 = vpop.f32.mrf.mxu0  ;;  %v5011_v44 = vpop.f32.mrf.mxu1  ;;  %5314 = vmatmul.mubr.bf16.vlgmr.msra.gmra.mxu0 %v5126_v55  ;;  %5354 = vmatmul.mubr.bf16.vlgmr.msra.gmra.mxu1 %v5128_v33 }
0x1598   :  { %v4971_v47 = vadd.f32 %v4970_v42, %v4638_v29  ;;  %v5012_v46 = vadd.f32 %v5011_v44, %v4646_v31  ;;  %5376 = vmatpush1.bf16.xpose.msra.mxu0 %v8156_v38  ;;  %5416 = vmatpush1.bf16.xpose.msra.mxu1 %v8158_v32  ;;  %v5106_v50 = vmax.f32 %v4969_v36, 0.0  ;;  %v5108_v49 = vmax.f32 %v5010_v41, 0.0 }
0x1599   :  { %v4972_v51 = vpop.f32.mrf.mxu0  ;;  %v5013_v54 = vpop.f32.mrf.mxu1  ;;  %5455 = vmatprep.subr.bf16.mxu0 %v8161_v40  ;;  %5495 = vmatprep.subr.bf16.mxu1 %v8163_v34 }
0x159a   :  { %v5107_v53 = vmax.f32 %v4971_v47, 0.0  ;;  %v5109_v43 = vmax.f32 %v5012_v46, 0.0  ;;  %v5130_v9 = vpack.c.bf16 %v5106_v50, %v5106_v50  ;;  %v5132_v10 = vpack.c.bf16 %v5108_v49, %v5108_v49 }
0x159b   :  { %v4973_v45 = vpop.f32.mrf.mxu0  ;;  %v5014_v2 = vpop.f32.mrf.mxu1 }
0x159c   :  { %v5131_v4 = vpack.c.bf16 %v5107_v53, %v5107_v53  ;;  %v5133_v5 = vpack.c.bf16 %v5109_v43, %v5109_v43 }
0x159d   :  { %v5050_v23 = vpop.f32.mrf.mxu0  ;;  %v5091_v14 = vpop.f32.mrf.mxu1 }
0x159e   :  { %v5051_v17 = vadd.f32 %v5050_v23, %v4650_v63  ;;  %v5092_v28 = vadd.f32 %v5091_v14, %v4658_v1  ;;  %5393 = vmatprep.mubr.bf16.mxu0 %v5131_v4  ;;  %5433 = vmatprep.mubr.bf16.mxu1 %v5133_v5 }
0x159f   :  { %v5052_v15 = vpop.f32.mrf.mxu0  ;;  %v5093_v16 = vpop.f32.mrf.mxu1  ;;  %5394 = vmatmul.mubr.bf16.vlgmr.msra.gmra.mxu0 %v5130_v9  ;;  %5434 = vmatmul.mubr.bf16.vlgmr.msra.gmra.mxu1 %v5132_v10 }
0x15a0   :  { %v5053_v18 = vadd.f32 %v5052_v15, %v4654_v3  ;;  %v5094_v6 = vadd.f32 %v5093_v16, %v4662_v8  ;;  %5456 = vmatpush1.bf16.xpose.msra.mxu0 %v8160_v60  ;;  %5496 = vmatpush1.bf16.xpose.msra.mxu1 %v8162_v56  ;;  %v5110_v19 = vmax.f32 %v5051_v17, 0.0  ;;  %v5112_v20 = vmax.f32 %v5092_v28, 0.0 }
0x15a1   :  { %v5054_v57 = vpop.f32.mrf.mxu0  ;;  %v5095_v7 = vpop.f32.mrf.mxu1  ;;  %8348 = vmatprep.subr.bf16.mxu0 %v9156_v0 }
0x15a2   :  { %v5111_v21 = vmax.f32 %v5053_v18, 0.0  ;;  %v5113_v35 = vmax.f32 %v5094_v6, 0.0  ;;  %v5134_v30 = vpack.c.bf16 %v5110_v19, %v5110_v19  ;;  %v5136_v31 = vpack.c.bf16 %v5112_v20, %v5112_v20 }
0x15a3   :  { %v5055_v25 = vpop.f32.mrf.mxu0  ;;  %v5096_v38 = vpop.f32.mrf.mxu1 }
0x15a4   :  { %v5135_v29 = vpack.c.bf16 %v5111_v21, %v5111_v21  ;;  %v5137_v24 = vpack.c.bf16 %v5113_v35, %v5113_v35 }
0x15a6   :  { %5473 = vmatprep.mubr.bf16.mxu0 %v5135_v29  ;;  %5513 = vmatprep.mubr.bf16.mxu1 %v5137_v24  ;;  %v5552_v24 = vld [vmem:[#allocation16 + $0x4] sm:$0xf] }
0x15a7   :  { %5474 = vmatmul.mubr.bf16.vlgmr.msra.gmra.mxu0 %v5134_v30  ;;  %5514 = vmatmul.mubr.bf16.vlgmr.msra.gmra.mxu1 %v5136_v31  ;;  %v5566_v30 = vsel %vm4430_vm2, %v5552_v24, 0  ;;  %v5680_v24 = vld [vmem:[#allocation28 + $0x58] sm:$0xff] }
0x15a8   :  { %8350 = vmatprep.mubr.msk.bf16.mxu0 %vm9157_vm0, %v9156_v0  ;;  %5894 = vmatprep.mubr.bf16.mxu1 %v9158_v39 }
0x15a9   :  { %8349 = vmatpush3.bf16.msra.mxu0 %v5566_v30  ;;  %v8179_v30 = vcombine.high %v5680_v24, %v5680_v24 }
0x164f   :  { %v5235_v32 = vpop.f32.mrf.mxu0  ;;  %v5275_v55 = vpop.f32.mrf.mxu1 }
0x1650   :  { %v5236_v42 = vadd.f32 %v8147_v52, %v5235_v32  ;;  %v8165_v52 = vld [vmem:[#allocation36] ss:$0 sm:$0xff] }
0x1651   :  { %v5237_v33 = vpop.f32.mrf.mxu0  ;;  %v5277_v37 = vpop.f32.mrf.mxu1 }
0x1652   :  { %v5276_v49 = vadd.f32 %v5275_v55, %v5236_v42  ;;  %v8164_v33 = vld [vmem:[#allocation34] ss:$0 sm:$0xff] }
0x1653   :  { %v5238_v40 = vpop.f32.mrf.mxu0  ;;  %v5278_v34 = vpop.f32.mrf.mxu1 }
0x1655   :  { %v5239_v36 = vpop.f32.mrf.mxu0  ;;  %v5279_v41 = vpop.f32.mrf.mxu1 }
0x1656   :  { %v8166_v41 = vld [vmem:[#allocation18 + $0x1] ss:$0 sm:$0xff] }
0x1657   :  { %v5315_v44 = vpop.f32.mrf.mxu0  ;;  %v5355_v47 = vpop.f32.mrf.mxu1 }
0x1658   :  { %v5316_v53 = vadd.f32 %v5315_v44, %v5276_v49 }
0x1659   :  { %v5317_v46 = vpop.f32.mrf.mxu0  ;;  %v5357_v50 = vpop.f32.mrf.mxu1 }
0x165a   :  { %v5356_v2 = vadd.f32 %v5355_v47, %v5316_v53 }
0x165b   :  { %v5318_v51 = vpop.f32.mrf.mxu0  ;;  %v5358_v54 = vpop.f32.mrf.mxu1 }
0x165d   :  { %v5319_v43 = vpop.f32.mrf.mxu0  ;;  %v5359_v63 = vpop.f32.mrf.mxu1 }
0x165f   :  { %v5395_v1 = vpop.f32.mrf.mxu0  ;;  %v5435_v45 = vpop.f32.mrf.mxu1 }
0x1660   :  { %v5396_v4 = vadd.f32 %v5395_v1, %v5356_v2 }
0x1661   :  { %v5397_v60 = vpop.f32.mrf.mxu0  ;;  %v5437_v3 = vpop.f32.mrf.mxu1 }
0x1662   :  { %v5436_v10 = vadd.f32 %v5435_v45, %v5396_v4  ;;  %v8168_v4 = vld [vmem:[#allocation19 + $0x1] ss:$0 sm:$0xff] }
0x1663   :  { %v5398_v5 = vpop.f32.mrf.mxu0  ;;  %v5438_v8 = vpop.f32.mrf.mxu1 }
0x1664   :  { %v8169_v8 = vld [vmem:[#allocation21 + $0x1] ss:$0 sm:$0xff] }
0x1665   :  { %v5399_v56 = vpop.f32.mrf.mxu0  ;;  %v5439_v9 = vpop.f32.mrf.mxu1 }
0x1667   :  { %v5475_v23 = vpop.f32.mrf.mxu0  ;;  %v5515_v14 = vpop.f32.mrf.mxu1 }
0x1668   :  { %v5476_v17 = vadd.f32 %v5475_v23, %v5436_v10 }
0x1669   :  { %v5477_v28 = vpop.f32.mrf.mxu0  ;;  %v5517_v15 = vpop.f32.mrf.mxu1 }
0x166a   :  { %v5516_v16 = vadd.f32 %v5515_v14, %v5476_v17 }
0x166b   :  { %v5478_v18 = vpop.f32.mrf.mxu0  ;;  %v5518_v6 = vpop.f32.mrf.mxu1 }
0x166c   :  { %v5521_v19 = vadd.f32 %v5516_v16, %v9725_v48  ;;  %v5677_v6 = vld [vmem:[#allocation28 + $0x40] sm:$0xff] }
0x166d   :  { %v5479_v20 = vpop.f32.mrf.mxu0  ;;  %v5519_v57 = vpop.f32.mrf.mxu1 }
0x166e   :  { %v5524_v7 = vsel %vm4426_vm3, %v5521_v19, 0.0  ;;  %v8173_v20 = vcombine.high %v5677_v6, %v5677_v6  ;;  %v8172_v57 = vcombine.low %v5677_v6, %v5677_v6  ;;  %v5687_v6 = vld [vmem:[#allocation30 + $0x10] sm:$0xff] }
0x166f   :  { %5525 = vadd.xlane.f32.xlu1 %v5524_v7 }
0x1670   :  { %8188 = vmatprep.subr.msk.bf16.mxu1 %vm4430_vm2, %v8173_v20  ;;  %v5702_v20 = vrot.slane %v5687_v6, %v9455_v59 }
0x16f8   :  { %v5526_v21 = vpop.xlane.xlu1 %5525 }
0x16f9   :  { %v5527_v35 = vmul.f32 0.125, %v5526_v21 }
0x16fb   :  { %v5528_v25 = vsub.f32 %v5521_v19, %v5527_v35  ;;  %v5678_v19 = vld [vmem:[#allocation28 + $0x48] sm:$0xff]  ;;  %v5815_v35 = vsel %vm4430_vm2, %v8172_v57, 0  ;;  %v5698_v57 = vrot.slane %v5687_v6, %v9459_v61 }
0x16fc   :  { %v8175_v7 = vcombine.high %v5678_v19, %v5678_v19  ;;  %v8174_v21 = vcombine.low %v5678_v19, %v5678_v19  ;;  %5877 = vmatpush1.bf16.msra.mxu1 %v5815_v35  ;;  %v5694_v19 = vrot.slane %v5687_v6, %v9453_v58 }
0x16fd   :  { %v5529_v38 = vmul.f32 %v5528_v25, %v5528_v25 }
0x16fe   :  { %8190 = vmatprep.subr.msk.bf16.mxu0 %vm4430_vm2, %v8175_v7  ;;  %v5706_v7 = vrot.slane %v5687_v6, %v9461_v62 }
0x16ff   :  { %v5530_v29 = vsel %vm4426_vm3, %v5529_v38, 0.0  ;;  %v5679_v38 = vld [vmem:[#allocation28 + $0x50] sm:$0xff] }
0x1700   :  { %5531 = vadd.xlane.f32.xlu1 %v5530_v29  ;;  %v8177_v29 = vcombine.high %v5679_v38, %v5679_v38 }
0x1702   :  { %8192 = vmatprep.subr.msk.bf16.mxu1 %vm4430_vm2, %v8177_v29 }
0x1789   :  { %v5532_v31 = vpop.xlane.xlu1 %5531 }
0x178a   :  { %v5533_v32 = vmul.f32 0.125, %v5532_v31 }
0x178c   :  { %v5534_v55 = vadd.f32 1e-05, %v5533_v32 }
0x178e   :  { %8555 = vrsqrt.f32 %v5534_v55 }
0x179b   :  { %v8556_v48 = vpop.eup %8555 }
0x179c   :  { %v5536_v37 = vmul.f32 %v8556_v48, %v5528_v25  ;;  %v5821_v25 = vsel %vm4430_vm2, %v8174_v21, 0 }
0x179e   :  { %v5543_v40 = vmul.f32 %v8164_v33, %v5536_v37  ;;  %v8170_v33 = vld [vmem:[#allocation25 + $0x1] ss:$0 sm:$0xff] }
0x17a0   :  { %v5550_v34 = vadd.f32 %v8165_v52, %v5543_v40  ;;  %v8171_v52 = vld [vmem:[#allocation27 + $0x1] ss:$0 sm:$0xff] }
0x17a2   :  { %v5553_v36 = vpack.c.bf16 %v5550_v34, %v5550_v34 }
0x17a4   :  { %8351 = vmatmul.mubr.msk.bf16.vlgmr.msra.gmra.mxu0 %vm4426_vm3, %v5553_v36  ;;  %v8178_v36 = vcombine.low %v5680_v24, %v5680_v24 }
0x17a5   :  { %5935 = vmatprep.mubr.bf16.mxu0 %v9158_v39  ;;  %5918 = vmatpush1.bf16.msra.mxu0 %v5821_v25 }
0x17a6   :  { %8194 = vmatprep.subr.msk.bf16.mxu0 %vm4430_vm2, %v8179_v30 }
0x1864   :  { %v5602_v42 = vpop.f32.mrf.mxu0 }
0x1865   :  { %v5603_v44 = vadd.f32 %v8166_v41, %v5602_v42  ;;  %v5681_v42 = vld [vmem:[#allocation28 + $0x60] sm:$0xff] }
0x1866   :  { %v8352_v47 = vpop.f32.mrf.mxu0 }
0x1867   :  { %v5608_v46 = vadd.f32 %v5603_v44, %v5550_v34  ;;  %v8176_v34 = vcombine.low %v5679_v38, %v5679_v38  ;;  %v5682_v44 = vld [vmem:[#allocation28 + $0x68] sm:$0xff] }
0x1868   :  { %v5605_v50 = vpop.f32.mrf.mxu0 }
0x1869   :  { %v5613_v49 = vsel %vm4426_vm3, %v5608_v46, 0.0  ;;  %v5833_v50 = vsel %vm4430_vm2, %v8178_v36, 0  ;;  %v9847_v36 = vld [vmem:[#allocation31 + $0x60] sm:$0xff] }
0x186a   :  { %5614 = vadd.xlane.f32.xlu0 %v5613_v49  ;;  %v8353_v51 = vpop.f32.mrf.mxu0  ;;  %v8181_v49 = vcombine.high %v5681_v42, %v5681_v42 }
0x186b   :  { %v8183_v51 = vcombine.high %v5682_v44, %v5682_v44 }
0x18f3   :  { %v5615_v54 = vpop.xlane.xlu0 %5614 }
0x18f4   :  { %v5616_v53 = vmul.f32 0.125, %v5615_v54  ;;  %v8180_v54 = vcombine.low %v5681_v42, %v5681_v42  ;;  %v9849_v42 = vld [vmem:[#allocation31 + $0x68] sm:$0xff] }
0x18f6   :  { %v5617_v43 = vsub.f32 %v5608_v46, %v5616_v53  ;;  %v5827_v46 = vsel %vm4430_vm2, %v8176_v34, 0  ;;  %v8182_v53 = vcombine.low %v5682_v44, %v5682_v44  ;;  %v5718_v34 = vrot.slane %v5687_v6, %v9479_v27 }
0x18f8   :  { %v5618_v63 = vmul.f32 %v5617_v43, %v5617_v43 }
0x18fa   :  { %v5619_v1 = vsel %vm4426_vm3, %v5618_v63, 0.0  ;;  %v5684_v63 = vld [vmem:[#allocation28 + $0x78] sm:$0xff] }
0x18fb   :  { %5620 = vadd.xlane.f32.xlu1 %v5619_v1  ;;  %v5839_v1 = vsel %vm4430_vm2, %v8180_v54, 0  ;;  %v5722_v54 = vrot.slane %v5687_v6, %v9473_v13 }
0x190c   :  { %5641 = vrot.lane.b32.xlu1 %v9714_v11, %s9159_s29 }
0x1984   :  { %v5621_v45 = vpop.xlane.xlu1 %5620 }
0x1985   :  { %v5622_v2 = vmul.f32 0.125, %v5621_v45  ;;  %v5845_v45 = vsel %vm4430_vm2, %v8182_v53, 0 }
0x1987   :  { %v5623_v60 = vadd.f32 1e-05, %v5622_v2 }
0x1988   :  { %v5642_v10 = vpop.permute.xlu1 %5641 }
0x1989   :  { %8557 = vrsqrt.f32 %v5623_v60  ;;  %v8187_v60 = vcombine.high %v5684_v63, %v5684_v63 }
0x1996   :  { %v8558_v3 = vpop.eup %8557 }
0x1997   :  { %v5625_v5 = vmul.f32 %v8558_v3, %v5617_v43  ;;  %v5683_v43 = vld [vmem:[#allocation28 + $0x70] sm:$0xff] }
0x1998   :  { %v8185_v2 = vcombine.high %v5683_v43, %v5683_v43  ;;  %v8184_v3 = vcombine.low %v5683_v43, %v5683_v43 }
0x1999   :  { %v5632_v56 = vmul.f32 %v8168_v4, %v5625_v5  ;;  %v8186_v4 = vcombine.low %v5684_v63, %v5684_v63 }
0x199a   :  { %v5851_v5 = vsel %vm4430_vm2, %v8184_v3, 0 }
0x199b   :  { %v5639_v9 = vadd.f32 %v8169_v8, %v5632_v56  ;;  %v5857_v8 = vsel %vm4430_vm2, %v8186_v4, 0  ;;  %v6207_v56 = vld [vmem:[#allocation31 + $0x40] sm:$0xff] }
0x199d   :  { %v5644_v23 = vadd.f32 %v5642_v10, %v5639_v9  ;;  %v6208_v9 = vld [vmem:[#allocation31 + $0x48] sm:$0xff]  ;;  %v8206_v10 = vcombine.high %v6207_v56, %v6207_v56 }
0x199f   :  { %v5649_v14 = vsel %vm4426_vm3, %v5644_v23, 0.0 }
0x19a0   :  { %5650 = vadd.xlane.f32.xlu1 %v5649_v14  ;;  %v8205_v14 = vcombine.low %v6207_v56, %v6207_v56  ;;  %v9857_v56 = vld [vmem:[#allocation30 + $0x18] sm:$0xff] }
0x1a29   :  { %v5651_v17 = vpop.xlane.xlu1 %5650 }
0x1a2a   :  { %v5652_v28 = vmul.f32 0.125, %v5651_v17  ;;  %v8207_v17 = vcombine.low %v6208_v9, %v6208_v9 }
0x1a2c   :  { %v5653_v15 = vsub.f32 %v5644_v23, %v5652_v28  ;;  %v8208_v23 = vcombine.high %v6208_v9, %v6208_v9  ;;  %v6209_v28 = vld [vmem:[#allocation31 + $0x50] sm:$0xff] }
0x1a2e   :  { %v5654_v16 = vmul.f32 %v5653_v15, %v5653_v15 }
0x1a30   :  { %v5655_v18 = vsel %vm4426_vm3, %v5654_v16, 0.0  ;;  %v8210_v16 = vcombine.high %v6209_v28, %v6209_v28 }
0x1a31   :  { %5656 = vadd.xlane.f32.xlu0 %v5655_v18 }
0x1aba   :  { %v5657_v31 = vpop.xlane.xlu0 %5656 }
0x1abb   :  { %v5658_v32 = vmul.f32 0.125, %v5657_v31 }
0x1abd   :  { %v5659_v55 = vadd.f32 1e-05, %v5658_v32 }
0x1abf   :  { %8559 = vrsqrt.f32 %v5659_v55 }
0x1acc   :  { %v8560_v48 = vpop.eup %8559 }
0x1acd   :  { %v5661_v37 = vmul.f32 %v8560_v48, %v5653_v15  ;;  %v6210_v15 = vld [vmem:[#allocation31 + $0x58] sm:$0xff] }
0x1ace   :  { %v8212_v18 = vcombine.high %v6210_v15, %v6210_v15  ;;  %v8211_v53 = vcombine.low %v6210_v15, %v6210_v15 }
0x1acf   :  { %v5668_v40 = vmul.f32 %v8170_v33, %v5661_v37 }
0x1ad1   :  { %v9813_v41 = vadd.f32 %v8171_v52, %v5668_v40  ;;  %v5710_v40 = vrot.slane %v5687_v6, %v9477_v26 }
0x1ad3   :  { %v5685_v47 = vpack.c.bf16 %v9813_v41, %v9813_v41 }
0x1ad5   :  { %8189 = vmatmul.mubr.msk.bf16.vlgmr.msra.gmra.mxu1 %vm4426_vm3, %v5685_v47  ;;  %8191 = vmatmul.mubr.msk.bf16.vlgmr.msra.gmra.mxu0 %vm4426_vm3, %v5685_v47 }
0x1ad6   :  { %5959 = vmatpush1.bf16.msra.mxu1 %v5827_v46  ;;  %6000 = vmatpush1.bf16.msra.mxu0 %v5833_v50  ;;  %v8209_v46 = vcombine.low %v6209_v28, %v6209_v28  ;;  %v5714_v50 = vrot.slane %v5687_v6, %v9471_v12  ;;  %v5734_v6 = vrot.slane %v9857_v56, %v9455_v59 }
0x1ad7   :  { %5976 = vmatprep.mubr.bf16.mxu1 %v9158_v39  ;;  %6017 = vmatprep.mubr.bf16.mxu0 %v9158_v39 }
0x1ad8   :  { %8196 = vmatprep.subr.msk.bf16.mxu1 %vm4430_vm2, %v8181_v49  ;;  %8198 = vmatprep.subr.msk.bf16.mxu0 %vm4430_vm2, %v8183_v51 }
0x1add   :  { %8193 = vmatmul.mubr.msk.bf16.vlgmr.msra.gmra.mxu1 %vm4426_vm3, %v5685_v47  ;;  %8195 = vmatmul.mubr.msk.bf16.vlgmr.msra.gmra.mxu0 %vm4426_vm3, %v5685_v47 }
0x1ade   :  { %6041 = vmatpush1.bf16.msra.mxu1 %v5839_v1  ;;  %6082 = vmatpush1.bf16.msra.mxu0 %v5845_v45 }
0x1adf   :  { %6058 = vmatprep.mubr.bf16.mxu1 %v9158_v39  ;;  %6099 = vmatprep.mubr.bf16.mxu0 %v9158_v39 }
0x1ae0   :  { %8200 = vmatprep.subr.msk.bf16.mxu1 %vm4430_vm2, %v8185_v2  ;;  %8202 = vmatprep.subr.msk.bf16.mxu0 %vm4430_vm2, %v8187_v60  ;;  %v8214_v2 = vcombine.high %v9847_v36, %v9847_v36  ;;  %v8216_v60 = vcombine.high %v9849_v42, %v9849_v42 }
0x1ae5   :  { %8197 = vmatmul.mubr.msk.bf16.vlgmr.msra.gmra.mxu1 %vm4426_vm3, %v5685_v47  ;;  %8199 = vmatmul.mubr.msk.bf16.vlgmr.msra.gmra.mxu0 %vm4426_vm3, %v5685_v47 }
0x1ae6   :  { %6123 = vmatpush1.bf16.msra.mxu1 %v5851_v5  ;;  %6164 = vmatpush1.bf16.msra.mxu0 %v5857_v8 }
0x1ae7   :  { %6140 = vmatprep.mubr.bf16.mxu1 %v9158_v39  ;;  %6181 = vmatprep.mubr.bf16.mxu0 %v9158_v39 }
0x1ae8   :  { %6309 = vmatprep.subr.bf16.mxu1 %v8206_v10  ;;  %6349 = vmatprep.subr.bf16.mxu0 %v8208_v23 }
0x1aed   :  { %8201 = vmatmul.mubr.msk.bf16.vlgmr.msra.gmra.mxu1 %vm4426_vm3, %v5685_v47  ;;  %8203 = vmatmul.mubr.msk.bf16.vlgmr.msra.gmra.mxu0 %vm4426_vm3, %v5685_v47 }
0x1aee   :  { %6310 = vmatpush1.bf16.xpose.msra.mxu1 %v8205_v14  ;;  %6350 = vmatpush1.bf16.xpose.msra.mxu0 %v8207_v17 }
0x1aef   :  { %6389 = vmatprep.subr.bf16.mxu1 %v8210_v16  ;;  %6429 = vmatprep.subr.bf16.mxu0 %v8212_v18  ;;  %v5726_v18 = vrot.slane %v9857_v56, %v9453_v58 }
0x1b95   :  { %v5896_v21 = vpop.f32.mrf.mxu1  ;;  %v5937_v35 = vpop.f32.mrf.mxu0 }
0x1b96   :  { %v5897_v25 = vadd.f32 %v5896_v21, %v5694_v19  ;;  %v5938_v38 = vadd.f32 %v5937_v35, %v5702_v20  ;;  %v6213_v19 = vld [vmem:[#allocation31 + $0x70] sm:$0xff]  ;;  %v6214_v20 = vld [vmem:[#allocation31 + $0x78] sm:$0xff]  ;;  %v8213_v21 = vcombine.low %v9847_v36, %v9847_v36  ;;  %v5730_v35 = vrot.slane %v9857_v56, %v9459_v61 }
0x1b97   :  { %v5898_v29 = vpop.f32.mrf.mxu1  ;;  %v5939_v24 = vpop.f32.mrf.mxu0 }
0x1b98   :  { %v5899_v30 = vadd.f32 %v5898_v29, %v5698_v57  ;;  %v5940_v31 = vadd.f32 %v5939_v24, %v5706_v7  ;;  %v6190_v32 = vmax.f32 %v5897_v25, 0.0  ;;  %v6192_v55 = vmax.f32 %v5938_v38, 0.0 }
0x1b99   :  { %v5900_v48 = vpop.f32.mrf.mxu1  ;;  %v5941_v33 = vpop.f32.mrf.mxu0  ;;  %v5738_v29 = vrot.slane %v9857_v56, %v9461_v62  ;;  %v8215_v24 = vcombine.low %v9849_v42, %v9849_v42 }
0x1b9a   :  { %v6191_v37 = vmax.f32 %v5899_v30, 0.0  ;;  %v6193_v52 = vmax.f32 %v5940_v31, 0.0  ;;  %v6215_v43 = vpack.c.bf16 %v6190_v32, %v6190_v32  ;;  %v6217_v63 = vpack.c.bf16 %v6192_v55, %v6192_v55 }
0x1b9b   :  { %v5901_v44 = vpop.f32.mrf.mxu1  ;;  %v5942_v47 = vpop.f32.mrf.mxu0  ;;  %v8218_v48 = vcombine.high %v6213_v19, %v6213_v19  ;;  %v8220_v33 = vcombine.high %v6214_v20, %v6214_v20 }
0x1b9c   :  { %v6216_v49 = vpack.c.bf16 %v6191_v37, %v6191_v37  ;;  %v6218_v51 = vpack.c.bf16 %v6193_v52, %v6193_v52 }
0x1b9d   :  { %v5978_v1 = vpop.f32.mrf.mxu1  ;;  %v6019_v45 = vpop.f32.mrf.mxu0 }
0x1b9e   :  { %v5979_v3 = vadd.f32 %v5978_v1, %v5710_v40  ;;  %v6020_v4 = vadd.f32 %v6019_v45, %v5718_v34  ;;  %6327 = vmatprep.mubr.bf16.mxu1 %v6216_v49  ;;  %6367 = vmatprep.mubr.bf16.mxu0 %v6218_v51  ;;  %v8217_v1 = vcombine.low %v6213_v19, %v6213_v19 }
0x1b9f   :  { %v5980_v5 = vpop.f32.mrf.mxu1  ;;  %v6021_v8 = vpop.f32.mrf.mxu0  ;;  %6328 = vmatmul.mubr.bf16.vlgmr.msra.gmra.mxu1 %v6215_v43  ;;  %6368 = vmatmul.mubr.bf16.vlgmr.msra.gmra.mxu0 %v6217_v63  ;;  %v5746_v45 = vrot.slane %v9857_v56, %v9471_v12 }
0x1ba0   :  { %v5981_v9 = vadd.f32 %v5980_v5, %v5714_v50  ;;  %v6022_v10 = vadd.f32 %v6021_v8, %v5722_v54  ;;  %6390 = vmatpush1.bf16.xpose.msra.mxu1 %v8209_v46  ;;  %6430 = vmatpush1.bf16.xpose.msra.mxu0 %v8211_v53  ;;  %v6194_v23 = vmax.f32 %v5979_v3, 0.0  ;;  %v6196_v14 = vmax.f32 %v6020_v4, 0.0 }
0x1ba1   :  { %v5982_v17 = vpop.f32.mrf.mxu1  ;;  %v6023_v28 = vpop.f32.mrf.mxu0  ;;  %6469 = vmatprep.subr.bf16.mxu1 %v8214_v2  ;;  %6509 = vmatprep.subr.bf16.mxu0 %v8216_v60  ;;  %v5742_v54 = vrot.slane %v9857_v56, %v9477_v26  ;;  %v5750_v53 = vrot.slane %v9857_v56, %v9479_v27  ;;  %v5754_v3 = vrot.slane %v9857_v56, %v9473_v13 }
0x1ba2   :  { %v6195_v15 = vmax.f32 %v5981_v9, 0.0  ;;  %v6197_v16 = vmax.f32 %v6022_v10, 0.0  ;;  %v6219_v30 = vpack.c.bf16 %v6194_v23, %v6194_v23  ;;  %v6221_v31 = vpack.c.bf16 %v6196_v14, %v6196_v14 }
0x1ba3   :  { %v5983_v57 = vpop.f32.mrf.mxu1  ;;  %v6024_v7 = vpop.f32.mrf.mxu0  ;;  %v8219_v4 = vcombine.low %v6214_v20, %v6214_v20 }
0x1ba4   :  { %v6220_v25 = vpack.c.bf16 %v6195_v15, %v6195_v15  ;;  %v6222_v38 = vpack.c.bf16 %v6197_v16, %v6197_v16 }
0x1ba5   :  { %v6060_v32 = vpop.f32.mrf.mxu1  ;;  %v6101_v55 = vpop.f32.mrf.mxu0 }
0x1ba6   :  { %v6061_v37 = vadd.f32 %v6060_v32, %v5726_v18  ;;  %v6102_v52 = vadd.f32 %v6101_v55, %v5734_v6  ;;  %6407 = vmatprep.mubr.bf16.mxu1 %v6220_v25  ;;  %6447 = vmatprep.mubr.bf16.mxu0 %v6222_v38  ;;  %v8204_v55 = vld [vmem:[#allocation33 + $0x1] ss:$0 sm:$0xff] }
0x1ba7   :  { %v6062_v40 = vpop.f32.mrf.mxu1  ;;  %v6103_v34 = vpop.f32.mrf.mxu0  ;;  %6408 = vmatmul.mubr.bf16.vlgmr.msra.gmra.mxu1 %v6219_v30  ;;  %6448 = vmatmul.mubr.bf16.vlgmr.msra.gmra.mxu0 %v6221_v31 }
0x1ba8   :  { %v6063_v36 = vadd.f32 %v6062_v40, %v5730_v35  ;;  %v6104_v44 = vadd.f32 %v6103_v34, %v5738_v29  ;;  %6470 = vmatpush1.bf16.xpose.msra.mxu1 %v8213_v21  ;;  %6510 = vmatpush1.bf16.xpose.msra.mxu0 %v8215_v24  ;;  %v6198_v47 = vmax.f32 %v6061_v37, 0.0  ;;  %v6200_v42 = vmax.f32 %v6102_v52, 0.0 }
0x1ba9   :  { %v6064_v46 = vpop.f32.mrf.mxu1  ;;  %v6105_v50 = vpop.f32.mrf.mxu0  ;;  %6549 = vmatprep.subr.bf16.mxu1 %v8218_v48  ;;  %6589 = vmatprep.subr.bf16.mxu0 %v8220_v33 }
0x1baa   :  { %v6199_v49 = vmax.f32 %v6063_v36, 0.0  ;;  %v6201_v51 = vmax.f32 %v6104_v44, 0.0  ;;  %v6223_v5 = vpack.c.bf16 %v6198_v47, %v6198_v47  ;;  %v6225_v8 = vpack.c.bf16 %v6200_v42, %v6200_v42 }
0x1bab   :  { %v6065_v43 = vpop.f32.mrf.mxu1  ;;  %v6106_v63 = vpop.f32.mrf.mxu0 }
0x1bac   :  { %v6224_v2 = vpack.c.bf16 %v6199_v49, %v6199_v49  ;;  %v6226_v60 = vpack.c.bf16 %v6201_v51, %v6201_v51 }
0x1bad   :  { %v6142_v9 = vpop.f32.mrf.mxu1  ;;  %v6183_v10 = vpop.f32.mrf.mxu0 }
0x1bae   :  { %v6143_v23 = vadd.f32 %v6142_v9, %v5742_v54  ;;  %v6184_v14 = vadd.f32 %v6183_v10, %v5750_v53  ;;  %6487 = vmatprep.mubr.bf16.mxu1 %v6224_v2  ;;  %6527 = vmatprep.mubr.bf16.mxu0 %v6226_v60 }
0x1baf   :  { %v6144_v17 = vpop.f32.mrf.mxu1  ;;  %v6185_v28 = vpop.f32.mrf.mxu0  ;;  %6488 = vmatmul.mubr.bf16.vlgmr.msra.gmra.mxu1 %v6223_v5  ;;  %6528 = vmatmul.mubr.bf16.vlgmr.msra.gmra.mxu0 %v6225_v8 }
0x1bb0   :  { %v6145_v15 = vadd.f32 %v6144_v17, %v5746_v45  ;;  %v6186_v16 = vadd.f32 %v6185_v28, %v5754_v3  ;;  %6550 = vmatpush1.bf16.xpose.msra.mxu1 %v8217_v1  ;;  %6590 = vmatpush1.bf16.xpose.msra.mxu0 %v8219_v4  ;;  %v6202_v18 = vmax.f32 %v6143_v23, 0.0  ;;  %v6204_v6 = vmax.f32 %v6184_v14, 0.0 }
0x1bb1   :  { %v6146_v56 = vpop.f32.mrf.mxu1  ;;  %v6187_v19 = vpop.f32.mrf.mxu0  ;;  %8354 = vmatprep.subr.bf16.mxu1 %v9156_v0 }
0x1bb2   :  { %v6203_v20 = vmax.f32 %v6145_v15, 0.0  ;;  %v6205_v57 = vmax.f32 %v6186_v16, 0.0  ;;  %v6227_v38 = vpack.c.bf16 %v6202_v18, %v6202_v18  ;;  %v6229_v29 = vpack.c.bf16 %v6204_v6, %v6204_v6 }
0x1bb3   :  { %v6147_v7 = vpop.f32.mrf.mxu1  ;;  %v6188_v21 = vpop.f32.mrf.mxu0 }
0x1bb4   :  { %v6228_v35 = vpack.c.bf16 %v6203_v20, %v6203_v20  ;;  %v6230_v25 = vpack.c.bf16 %v6205_v57, %v6205_v57 }
0x1bb6   :  { %6567 = vmatprep.mubr.bf16.mxu1 %v6228_v35  ;;  %6607 = vmatprep.mubr.bf16.mxu0 %v6230_v25  ;;  %v6648_v25 = vld [vmem:[#allocation16 + $0x8] sm:$0xf] }
0x1bb7   :  { %6568 = vmatmul.mubr.bf16.vlgmr.msra.gmra.mxu1 %v6227_v38  ;;  %6608 = vmatmul.mubr.bf16.vlgmr.msra.gmra.mxu0 %v6229_v29  ;;  %v6662_v38 = vsel %vm4430_vm2, %v6648_v25, 0 }
0x1bb8   :  { %8356 = vmatprep.mubr.msk.bf16.mxu1 %vm9157_vm0, %v9156_v0  ;;  %6989 = vmatprep.mubr.bf16.mxu0 %v9158_v39 }
0x1bb9   :  { %8355 = vmatpush3.bf16.msra.mxu1 %v6662_v38 }
0x1c5f   :  { %v6329_v24 = vpop.f32.mrf.mxu1  ;;  %v6369_v30 = vpop.f32.mrf.mxu0 }
0x1c60   :  { %v6330_v40 = vadd.f32 %v8204_v55, %v6329_v24  ;;  %v8222_v55 = vld [vmem:[#allocation36 + $0x1] ss:$0 sm:$0xff] }
0x1c61   :  { %v6331_v31 = vpop.f32.mrf.mxu1  ;;  %v6371_v32 = vpop.f32.mrf.mxu0 }
0x1c62   :  { %v6370_v42 = vadd.f32 %v6369_v30, %v6330_v40  ;;  %v8221_v31 = vld [vmem:[#allocation34 + $0x1] ss:$0 sm:$0xff] }
0x1c63   :  { %v6332_v48 = vpop.f32.mrf.mxu1  ;;  %v6372_v33 = vpop.f32.mrf.mxu0 }
0x1c65   :  { %v6333_v37 = vpop.f32.mrf.mxu1  ;;  %v6373_v52 = vpop.f32.mrf.mxu0 }
0x1c66   :  { %v8223_v52 = vld [vmem:[#allocation18 + $0x2] ss:$0 sm:$0xff] }
0x1c67   :  { %v6409_v34 = vpop.f32.mrf.mxu1  ;;  %v6449_v36 = vpop.f32.mrf.mxu0 }
0x1c68   :  { %v6410_v49 = vadd.f32 %v6409_v34, %v6370_v42 }
0x1c69   :  { %v6411_v44 = vpop.f32.mrf.mxu1  ;;  %v6451_v47 = vpop.f32.mrf.mxu0 }
0x1c6a   :  { %v6450_v63 = vadd.f32 %v6449_v36, %v6410_v49 }
0x1c6b   :  { %v6412_v46 = vpop.f32.mrf.mxu1  ;;  %v6452_v50 = vpop.f32.mrf.mxu0 }
0x1c6d   :  { %v6413_v51 = vpop.f32.mrf.mxu1  ;;  %v6453_v54 = vpop.f32.mrf.mxu0 }
0x1c6f   :  { %v6489_v53 = vpop.f32.mrf.mxu1  ;;  %v6529_v43 = vpop.f32.mrf.mxu0 }
0x1c70   :  { %v6490_v2 = vadd.f32 %v6489_v53, %v6450_v63 }
0x1c71   :  { %v6491_v1 = vpop.f32.mrf.mxu1  ;;  %v6531_v45 = vpop.f32.mrf.mxu0 }
0x1c72   :  { %v6530_v8 = vadd.f32 %v6529_v43, %v6490_v2  ;;  %v8225_v2 = vld [vmem:[#allocation19 + $0x2] ss:$0 sm:$0xff] }
0x1c73   :  { %v6492_v60 = vpop.f32.mrf.mxu1  ;;  %v6532_v3 = vpop.f32.mrf.mxu0 }
0x1c74   :  { %v8226_v3 = vld [vmem:[#allocation21 + $0x2] ss:$0 sm:$0xff] }
0x1c75   :  { %v6493_v4 = vpop.f32.mrf.mxu1  ;;  %v6533_v5 = vpop.f32.mrf.mxu0 }
0x1c77   :  { %v6569_v9 = vpop.f32.mrf.mxu1  ;;  %v6609_v10 = vpop.f32.mrf.mxu0 }
0x1c78   :  { %v6570_v23 = vadd.f32 %v6569_v9, %v6530_v8 }
0x1c79   :  { %v6571_v14 = vpop.f32.mrf.mxu1  ;;  %v6611_v17 = vpop.f32.mrf.mxu0 }
0x1c7a   :  { %v6610_v28 = vadd.f32 %v6609_v10, %v6570_v23 }
0x1c7b   :  { %v6572_v15 = vpop.f32.mrf.mxu1  ;;  %v6612_v16 = vpop.f32.mrf.mxu0 }
0x1c7c   :  { %v6615_v18 = vadd.f32 %v6610_v28, %v9813_v41  ;;  %v6772_v28 = vld [vmem:[#allocation28 + $0x80] sm:$0xff]  ;;  %v6773_v15 = vld [vmem:[#allocation28 + $0x88] sm:$0xff] }
0x1c7d   :  { %v6573_v6 = vpop.f32.mrf.mxu1  ;;  %v6613_v56 = vpop.f32.mrf.mxu0  ;;  %v8230_v16 = vcombine.high %v6772_v28, %v6772_v28 }
0x1c7e   :  { %v6620_v19 = vsel %vm4426_vm3, %v6615_v18, 0.0  ;;  %v8232_v6 = vcombine.high %v6773_v15, %v6773_v15  ;;  %v8231_v56 = vcombine.low %v6773_v15, %v6773_v15 }
0x1c7f   :  { %6621 = vadd.xlane.f32.xlu0 %v6620_v19  ;;  %8245 = vmatprep.subr.msk.bf16.mxu0 %vm4430_vm2, %v8230_v16 }
0x1c80   :  { %8247 = vmatprep.subr.msk.bf16.mxu1 %vm4430_vm2, %v8232_v6 }
0x1d08   :  { %v6622_v20 = vpop.xlane.xlu0 %6621 }
0x1d09   :  { %v6623_v57 = vmul.f32 0.125, %v6622_v20  ;;  %v6916_v20 = vsel %vm4430_vm2, %v8231_v56, 0 }
0x1d0b   :  { %v6624_v7 = vsub.f32 %v6615_v18, %v6623_v57  ;;  %v8229_v18 = vcombine.low %v6772_v28, %v6772_v28  ;;  %v6774_v57 = vld [vmem:[#allocation28 + $0x90] sm:$0xff] }
0x1d0d   :  { %v6625_v21 = vmul.f32 %v6624_v7, %v6624_v7  ;;  %v6910_v19 = vsel %vm4430_vm2, %v8229_v18, 0 }
0x1d0e   :  { %6972 = vmatpush1.bf16.msra.mxu0 %v6910_v19 }
0x1d0f   :  { %v6626_v35 = vsel %vm4426_vm3, %v6625_v21, 0.0  ;;  %v6775_v21 = vld [vmem:[#allocation28 + $0x98] sm:$0xff] }
0x1d10   :  { %6627 = vadd.xlane.f32.xlu0 %v6626_v35  ;;  %v8236_v35 = vcombine.high %v6775_v21, %v6775_v21 }
0x1d99   :  { %v6628_v29 = vpop.xlane.xlu0 %6627 }
0x1d9a   :  { %v6629_v24 = vmul.f32 0.125, %v6628_v29 }
0x1d9c   :  { %v6630_v30 = vadd.f32 1e-05, %v6629_v24 }
0x1d9e   :  { %8561 = vrsqrt.f32 %v6630_v30  ;;  %v8227_v30 = vld [vmem:[#allocation25 + $0x2] ss:$0 sm:$0xff] }
0x1dab   :  { %v8562_v41 = vpop.eup %8561 }
0x1dac   :  { %v6632_v32 = vmul.f32 %v8562_v41, %v6624_v7  ;;  %v8234_v7 = vcombine.high %v6774_v57, %v6774_v57 }
0x1dae   :  { %v6639_v48 = vmul.f32 %v8221_v31, %v6632_v32  ;;  %8249 = vmatprep.subr.msk.bf16.mxu0 %vm4430_vm2, %v8234_v7  ;;  %v8228_v31 = vld [vmem:[#allocation27 + $0x2] ss:$0 sm:$0xff] }
0x1db0   :  { %v6646_v33 = vadd.f32 %v8222_v55, %v6639_v48  ;;  %v8233_v55 = vcombine.low %v6774_v57, %v6774_v57  ;;  %v8235_v48 = vcombine.low %v6775_v21, %v6775_v21 }
0x1db2   :  { %v6649_v37 = vpack.c.bf16 %v6646_v33, %v6646_v33 }
0x1db4   :  { %8357 = vmatmul.mubr.msk.bf16.vlgmr.msra.gmra.mxu1 %vm4426_vm3, %v6649_v37  ;;  %v6776_v37 = vld [vmem:[#allocation28 + $0xa0] sm:$0xff] }
0x1db5   :  { %7030 = vmatprep.mubr.bf16.mxu1 %v9158_v39  ;;  %7013 = vmatpush1.bf16.msra.mxu1 %v6916_v20 }
0x1db6   :  { %8251 = vmatprep.subr.msk.bf16.mxu1 %vm4430_vm2, %v8236_v35 }
0x1e74   :  { %v6698_v40 = vpop.f32.mrf.mxu1 }
0x1e75   :  { %v6699_v34 = vadd.f32 %v8223_v52, %v6698_v40  ;;  %v6777_v52 = vld [vmem:[#allocation28 + $0xa8] sm:$0xff] }
0x1e76   :  { %v8358_v36 = vpop.f32.mrf.mxu1 }
0x1e77   :  { %v6704_v44 = vadd.f32 %v6699_v34, %v6646_v33  ;;  %v6922_v34 = vsel %vm4430_vm2, %v8233_v55, 0  ;;  %v6928_v36 = vsel %vm4430_vm2, %v8235_v48, 0 }
0x1e78   :  { %v6701_v47 = vpop.f32.mrf.mxu1 }
0x1e79   :  { %v6709_v42 = vsel %vm4426_vm3, %v6704_v44, 0.0  ;;  %v8240_v47 = vcombine.high %v6777_v52, %v6777_v52 }
0x1e7a   :  { %6710 = vadd.xlane.f32.xlu0 %v6709_v42  ;;  %v8359_v46 = vpop.f32.mrf.mxu1  ;;  %v8237_v42 = vcombine.low %v6776_v37, %v6776_v37 }
0x1e7b   :  { %v8239_v46 = vcombine.low %v6777_v52, %v6777_v52 }
0x1f03   :  { %v6711_v50 = vpop.xlane.xlu0 %6710 }
0x1f04   :  { %v6712_v49 = vmul.f32 0.125, %v6711_v50  ;;  %v6778_v50 = vld [vmem:[#allocation28 + $0xb0] sm:$0xff] }
0x1f06   :  { %v6713_v51 = vsub.f32 %v6704_v44, %v6712_v49  ;;  %v8238_v44 = vcombine.high %v6776_v37, %v6776_v37  ;;  %v6779_v49 = vld [vmem:[#allocation28 + $0xb8] sm:$0xff] }
0x1f08   :  { %v6714_v54 = vmul.f32 %v6713_v51, %v6713_v51 }
0x1f0a   :  { %v6715_v53 = vsel %vm4426_vm3, %v6714_v54, 0.0  ;;  %v6940_v54 = vsel %vm4430_vm2, %v8239_v46, 0 }
0x1f0b   :  { %6716 = vadd.xlane.f32.xlu0 %v6715_v53  ;;  %v8242_v53 = vcombine.high %v6778_v50, %v6778_v50 }
0x1f21   :  { %6736 = vrot.lane.b32.xlu0 %v9714_v11, %s9160_s22 }
0x1f25   :  { %7798 = vrot.lane.b32.xlu0 %v9701_v22, %s9161_s27 }
0x1f94   :  { %v6717_v43 = vpop.xlane.xlu0 %6716 }
0x1f95   :  { %v6718_v63 = vmul.f32 0.125, %v6717_v43  ;;  %v8244_v43 = vcombine.high %v6779_v49, %v6779_v49 }
0x1f97   :  { %v6719_v1 = vadd.f32 1e-05, %v6718_v63  ;;  %v8241_v63 = vcombine.low %v6778_v50, %v6778_v50 }
0x1f98   :  { %v6737_v8 = vpop.permute.xlu0 %6736 }
0x1f99   :  { %8563 = vrsqrt.f32 %v6719_v1  ;;  %v8243_v1 = vcombine.low %v6779_v49, %v6779_v49 }
0x1fa6   :  { %v8564_v45 = vpop.eup %8563 }
0x1fa7   :  { %v6721_v60 = vmul.f32 %v8564_v45, %v6713_v51  ;;  %v6934_v51 = vsel %vm4430_vm2, %v8237_v42, 0  ;;  %v6946_v45 = vsel %vm4430_vm2, %v8241_v63, 0 }
0x1fa9   :  { %v6728_v4 = vmul.f32 %v8225_v2, %v6721_v60  ;;  %v6952_v2 = vsel %vm4430_vm2, %v8243_v1, 0  ;;  %v7302_v60 = vld [vmem:[#allocation31 + $0x80] sm:$0xff]  ;;  %v9945_v1 = vld [vmem:[#allocation30 + $0x28] sm:$0xff] }
0x1fab   :  { %v6735_v5 = vadd.f32 %v8226_v3, %v6728_v4  ;;  %v7303_v3 = vld [vmem:[#allocation31 + $0x88] sm:$0xff]  ;;  %v8263_v4 = vcombine.high %v7302_v60, %v7302_v60 }
0x1fad   :  { %v6739_v9 = vadd.f32 %v6737_v8, %v6735_v5  ;;  %v8265_v5 = vcombine.high %v7303_v3, %v7303_v3  ;;  %v8262_v8 = vcombine.low %v7302_v60, %v7302_v60 }
0x1faf   :  { %v6744_v10 = vsel %vm4426_vm3, %v6739_v9, 0.0 }
0x1fb0   :  { %6745 = vadd.xlane.f32.xlu1 %v6744_v10  ;;  %v7304_v10 = vld [vmem:[#allocation31 + $0x90] sm:$0xff] }
0x1fb1   :  { %v8266_v37 = vcombine.low %v7304_v10, %v7304_v10 }
0x2039   :  { %v6746_v23 = vpop.xlane.xlu1 %6745 }
0x203a   :  { %v6747_v11 = vmul.f32 0.125, %v6746_v23  ;;  %v7305_v23 = vld [vmem:[#allocation31 + $0x98] sm:$0xff] }
0x203c   :  { %v6748_v14 = vsub.f32 %v6739_v9, %v6747_v11  ;;  %v8264_v9 = vcombine.low %v7303_v3, %v7303_v3  ;;  %v8267_v11 = vcombine.high %v7304_v10, %v7304_v10  ;;  %v6821_v10 = vrot.slane %v9945_v1, %v9453_v58 }
0x203e   :  { %v6749_v17 = vmul.f32 %v6748_v14, %v6748_v14 }
0x2040   :  { %v6750_v22 = vsel %vm4426_vm3, %v6749_v17, 0.0 }
0x2041   :  { %6751 = vadd.xlane.f32.xlu1 %v6750_v22 }
0x20ca   :  { %v6752_v25 = vpop.xlane.xlu1 %6751 }
0x20cb   :  { %v6753_v38 = vmul.f32 0.125, %v6752_v25 }
0x20cd   :  { %v6754_v29 = vadd.f32 1e-05, %v6753_v38 }
0x20cf   :  { %8565 = vrsqrt.f32 %v6754_v29 }
0x20dc   :  { %v8566_v24 = vpop.eup %8565 }
0x20dd   :  { %v6756_v41 = vmul.f32 %v8566_v24, %v6748_v14  ;;  %v8269_v14 = vcombine.high %v7305_v23, %v7305_v23 }
0x20df   :  { %v6763_v32 = vmul.f32 %v8227_v30, %v6756_v41 }
0x20e1   :  { %v9901_v33 = vadd.f32 %v8228_v31, %v6763_v32  ;;  %v9935_v31 = vld [vmem:[#allocation31 + $0xa0] sm:$0xff]  ;;  %v9937_v32 = vld [vmem:[#allocation31 + $0xa8] sm:$0xff] }
0x20e2   :  { %v8271_v49 = vcombine.high %v9935_v31, %v9935_v31 }
0x20e3   :  { %v6780_v40 = vpack.c.bf16 %v9901_v33, %v9901_v33 }
0x20e5   :  { %8246 = vmatmul.mubr.msk.bf16.vlgmr.msra.gmra.mxu0 %vm4426_vm3, %v6780_v40  ;;  %8248 = vmatmul.mubr.msk.bf16.vlgmr.msra.gmra.mxu1 %vm4426_vm3, %v6780_v40 }
0x20e6   :  { %7054 = vmatpush1.bf16.msra.mxu0 %v6922_v34  ;;  %7095 = vmatpush1.bf16.msra.mxu1 %v6928_v36 }
0x20e7   :  { %7071 = vmatprep.mubr.bf16.mxu0 %v9158_v39  ;;  %7112 = vmatprep.mubr.bf16.mxu1 %v9158_v39 }
0x20e8   :  { %8253 = vmatprep.subr.msk.bf16.mxu0 %vm4430_vm2, %v8238_v44  ;;  %8255 = vmatprep.subr.msk.bf16.mxu1 %vm4430_vm2, %v8240_v47  ;;  %v8268_v44 = vcombine.low %v7305_v23, %v7305_v23  ;;  %v6829_v23 = vrot.slane %v9945_v1, %v9455_v59 }
0x20ed   :  { %8250 = vmatmul.mubr.msk.bf16.vlgmr.msra.gmra.mxu0 %vm4426_vm3, %v6780_v40  ;;  %8252 = vmatmul.mubr.msk.bf16.vlgmr.msra.gmra.mxu1 %vm4426_vm3, %v6780_v40 }
0x20ee   :  { %7136 = vmatpush1.bf16.msra.mxu0 %v6934_v51  ;;  %7177 = vmatpush1.bf16.msra.mxu1 %v6940_v54  ;;  %v8273_v51 = vcombine.high %v9937_v32, %v9937_v32 }
0x20ef   :  { %7153 = vmatprep.mubr.bf16.mxu0 %v9158_v39  ;;  %7194 = vmatprep.mubr.bf16.mxu1 %v9158_v39 }
0x20f0   :  { %8257 = vmatprep.subr.msk.bf16.mxu0 %vm4430_vm2, %v8242_v53  ;;  %8259 = vmatprep.subr.msk.bf16.mxu1 %vm4430_vm2, %v8244_v43 }
0x20f5   :  { %8254 = vmatmul.mubr.msk.bf16.vlgmr.msra.gmra.mxu0 %vm4426_vm3, %v6780_v40  ;;  %8256 = vmatmul.mubr.msk.bf16.vlgmr.msra.gmra.mxu1 %vm4426_vm3, %v6780_v40 }
0x20f6   :  { %7218 = vmatpush1.bf16.msra.mxu0 %v6946_v45  ;;  %7259 = vmatpush1.bf16.msra.mxu1 %v6952_v2 }
0x20f7   :  { %7235 = vmatprep.mubr.bf16.mxu0 %v9158_v39  ;;  %7276 = vmatprep.mubr.bf16.mxu1 %v9158_v39  ;;  %v6782_v39 = vld [vmem:[#allocation30 + $0x20] sm:$0xff] }
0x20f8   :  { %7404 = vmatprep.subr.bf16.mxu0 %v8263_v4  ;;  %7444 = vmatprep.subr.bf16.mxu1 %v8265_v5  ;;  %v6789_v17 = vrot.slane %v6782_v39, %v9453_v58  ;;  %v6797_v22 = vrot.slane %v6782_v39, %v9455_v59  ;;  %v6793_v28 = vrot.slane %v6782_v39, %v9459_v61 }
0x20f9   :  { %v6801_v15 = vrot.slane %v6782_v39, %v9461_v62  ;;  %v6805_v30 = vrot.slane %v6782_v39, %v9477_v26  ;;  %v6813_v41 = vrot.slane %v6782_v39, %v9479_v27  ;;  %v6809_v52 = vrot.slane %v6782_v39, %v9471_v12 }
0x20fa   :  { %v6817_v36 = vrot.slane %v6782_v39, %v9473_v13  ;;  %v8272_v58 = vcombine.low %v9937_v32, %v9937_v32  ;;  %v6837_v32 = vrot.slane %v9945_v1, %v9477_v26 }
0x20fd   :  { %8258 = vmatmul.mubr.msk.bf16.vlgmr.msra.gmra.mxu0 %vm4426_vm3, %v6780_v40  ;;  %8260 = vmatmul.mubr.msk.bf16.vlgmr.msra.gmra.mxu1 %vm4426_vm3, %v6780_v40 }
0x20fe   :  { %7405 = vmatpush1.bf16.xpose.msra.mxu0 %v8262_v8  ;;  %7445 = vmatpush1.bf16.xpose.msra.mxu1 %v8264_v9 }
0x20ff   :  { %7484 = vmatprep.subr.bf16.mxu0 %v8267_v11  ;;  %7524 = vmatprep.subr.bf16.mxu1 %v8269_v14  ;;  %v7308_v11 = vld [vmem:[#allocation31 + $0xb0] sm:$0xff]  ;;  %v7309_v14 = vld [vmem:[#allocation31 + $0xb8] sm:$0xff] }
0x21a5   :  { %v6991_v16 = vpop.f32.mrf.mxu0  ;;  %v7032_v18 = vpop.f32.mrf.mxu1 }
0x21a6   :  { %v6992_v6 = vadd.f32 %v6991_v16, %v6789_v17  ;;  %v7033_v56 = vadd.f32 %v7032_v18, %v6797_v22  ;;  %v8270_v22 = vcombine.low %v9935_v31, %v9935_v31  ;;  %v6833_v18 = vrot.slane %v9945_v1, %v9461_v62 }
0x21a7   :  { %v6993_v19 = vpop.f32.mrf.mxu0  ;;  %v7034_v20 = vpop.f32.mrf.mxu1 }
0x21a8   :  { %v6994_v57 = vadd.f32 %v6993_v19, %v6793_v28  ;;  %v7035_v7 = vadd.f32 %v7034_v20, %v6801_v15  ;;  %v7285_v21 = vmax.f32 %v6992_v6, 0.0  ;;  %v7287_v35 = vmax.f32 %v7033_v56, 0.0 }
0x21a9   :  { %v6995_v25 = vpop.f32.mrf.mxu0  ;;  %v7036_v38 = vpop.f32.mrf.mxu1  ;;  %v6825_v28 = vrot.slane %v9945_v1, %v9459_v61  ;;  %v8275_v20 = vcombine.high %v7308_v11, %v7308_v11 }
0x21aa   :  { %v7286_v29 = vmax.f32 %v6994_v57, 0.0  ;;  %v7288_v24 = vmax.f32 %v7035_v7, 0.0  ;;  %v7310_v47 = vpack.c.bf16 %v7285_v21, %v7285_v21  ;;  %v7312_v42 = vpack.c.bf16 %v7287_v35, %v7287_v35 }
0x21ab   :  { %v6996_v55 = vpop.f32.mrf.mxu0  ;;  %v7037_v48 = vpop.f32.mrf.mxu1  ;;  %v8277_v57 = vcombine.high %v7309_v14, %v7309_v14 }
0x21ac   :  { %v7311_v40 = vpack.c.bf16 %v7286_v29, %v7286_v29  ;;  %v7313_v34 = vpack.c.bf16 %v7288_v24, %v7288_v24  ;;  %v6845_v55 = vrot.slane %v9945_v1, %v9479_v27 }
0x21ad   :  { %v7073_v46 = vpop.f32.mrf.mxu0  ;;  %v7114_v50 = vpop.f32.mrf.mxu1 }
0x21ae   :  { %v7074_v54 = vadd.f32 %v7073_v46, %v6805_v30  ;;  %v7115_v53 = vadd.f32 %v7114_v50, %v6813_v41  ;;  %7422 = vmatprep.mubr.bf16.mxu0 %v7311_v40  ;;  %7462 = vmatprep.mubr.bf16.mxu1 %v7313_v34  ;;  %v6841_v40 = vrot.slane %v9945_v1, %v9471_v12 }
0x21af   :  { %v7075_v43 = vpop.f32.mrf.mxu0  ;;  %v7116_v63 = vpop.f32.mrf.mxu1  ;;  %7423 = vmatmul.mubr.bf16.vlgmr.msra.gmra.mxu0 %v7310_v47  ;;  %7463 = vmatmul.mubr.bf16.vlgmr.msra.gmra.mxu1 %v7312_v42  ;;  %v8276_v47 = vcombine.low %v7309_v14, %v7309_v14 }
0x21b0   :  { %v7076_v45 = vadd.f32 %v7075_v43, %v6809_v52  ;;  %v7117_v2 = vadd.f32 %v7116_v63, %v6817_v36  ;;  %7485 = vmatpush1.bf16.xpose.msra.mxu0 %v8266_v37  ;;  %7525 = vmatpush1.bf16.xpose.msra.mxu1 %v8268_v44  ;;  %v7289_v60 = vmax.f32 %v7074_v54, 0.0  ;;  %v7291_v3 = vmax.f32 %v7115_v53, 0.0 }
0x21b1   :  { %v7077_v4 = vpop.f32.mrf.mxu0  ;;  %v7118_v5 = vpop.f32.mrf.mxu1  ;;  %7564 = vmatprep.subr.bf16.mxu0 %v8271_v49  ;;  %7604 = vmatprep.subr.bf16.mxu1 %v8273_v51  ;;  %v8274_v52 = vcombine.low %v7308_v11, %v7308_v11  ;;  %v6849_v44 = vrot.slane %v9945_v1, %v9473_v13 }
0x21b2   :  { %v7290_v8 = vmax.f32 %v7076_v45, 0.0  ;;  %v7292_v9 = vmax.f32 %v7117_v2, 0.0  ;;  %v7314_v6 = vpack.c.bf16 %v7289_v60, %v7289_v60  ;;  %v7316_v59 = vpack.c.bf16 %v7291_v3, %v7291_v3 }
0x21b3   :  { %v7078_v39 = vpop.f32.mrf.mxu0  ;;  %v7119_v17 = vpop.f32.mrf.mxu1 }
0x21b4   :  { %v7315_v15 = vpack.c.bf16 %v7290_v8, %v7290_v8  ;;  %v7317_v16 = vpack.c.bf16 %v7292_v9, %v7292_v9  ;;  %v8261_v39 = vld [vmem:[#allocation33 + $0x2] ss:$0 sm:$0xff] }
0x21b5   :  { %v7155_v56 = vpop.f32.mrf.mxu0  ;;  %v7196_v19 = vpop.f32.mrf.mxu1 }
0x21b6   :  { %v7156_v7 = vadd.f32 %v7155_v56, %v6821_v10  ;;  %v7197_v21 = vadd.f32 %v7196_v19, %v6829_v23  ;;  %7502 = vmatprep.mubr.bf16.mxu0 %v7315_v15  ;;  %7542 = vmatprep.mubr.bf16.mxu1 %v7317_v16 }
0x21b7   :  { %v7157_v35 = vpop.f32.mrf.mxu0  ;;  %v7198_v61 = vpop.f32.mrf.mxu1  ;;  %7503 = vmatmul.mubr.bf16.vlgmr.msra.gmra.mxu0 %v7314_v6  ;;  %7543 = vmatmul.mubr.bf16.vlgmr.msra.gmra.mxu1 %v7316_v59 }
0x21b8   :  { %v7158_v25 = vadd.f32 %v7157_v35, %v6825_v28  ;;  %v7199_v38 = vadd.f32 %v7198_v61, %v6833_v18  ;;  %7565 = vmatpush1.bf16.xpose.msra.mxu0 %v8270_v22  ;;  %7605 = vmatpush1.bf16.xpose.msra.mxu1 %v8272_v58  ;;  %v7293_v62 = vmax.f32 %v7156_v7, 0.0  ;;  %v7295_v29 = vmax.f32 %v7197_v21, 0.0 }
0x21b9   :  { %v7159_v24 = vpop.f32.mrf.mxu0  ;;  %v7200_v30 = vpop.f32.mrf.mxu1  ;;  %7644 = vmatprep.subr.bf16.mxu0 %v8275_v20  ;;  %7684 = vmatprep.subr.bf16.mxu1 %v8277_v57 }
0x21ba   :  { %v7294_v41 = vmax.f32 %v7158_v25, 0.0  ;;  %v7296_v31 = vmax.f32 %v7199_v38, 0.0  ;;  %v7318_v42 = vpack.c.bf16 %v7293_v62, %v7293_v62  ;;  %v7320_v46 = vpack.c.bf16 %v7295_v29, %v7295_v29 }
0x21bb   :  { %v7160_v48 = vpop.f32.mrf.mxu0  ;;  %v7201_v37 = vpop.f32.mrf.mxu1 }
0x21bc   :  { %v7319_v34 = vpack.c.bf16 %v7294_v41, %v7294_v41  ;;  %v7321_v36 = vpack.c.bf16 %v7296_v31, %v7296_v31 }
0x21bd   :  { %v7237_v50 = vpop.f32.mrf.mxu0  ;;  %v7278_v49 = vpop.f32.mrf.mxu1 }
0x21be   :  { %v7238_v26 = vadd.f32 %v7237_v50, %v6837_v32  ;;  %v7279_v51 = vadd.f32 %v7278_v49, %v6845_v55  ;;  %7582 = vmatprep.mubr.bf16.mxu0 %v7319_v34  ;;  %7622 = vmatprep.mubr.bf16.mxu1 %v7321_v36 }
0x21bf   :  { %v7239_v27 = vpop.f32.mrf.mxu0  ;;  %v7280_v54 = vpop.f32.mrf.mxu1  ;;  %7583 = vmatmul.mubr.bf16.vlgmr.msra.gmra.mxu0 %v7318_v42  ;;  %7623 = vmatmul.mubr.bf16.vlgmr.msra.gmra.mxu1 %v7320_v46 }
0x21c0   :  { %v7240_v53 = vadd.f32 %v7239_v27, %v6841_v40  ;;  %v7281_v12 = vadd.f32 %v7280_v54, %v6849_v44  ;;  %7645 = vmatpush1.bf16.xpose.msra.mxu0 %v8274_v52  ;;  %7685 = vmatpush1.bf16.xpose.msra.mxu1 %v8276_v47  ;;  %v7297_v43 = vmax.f32 %v7238_v26, 0.0  ;;  %v7299_v63 = vmax.f32 %v7279_v51, 0.0  ;;  %v7742_v54 = vld [vmem:[#allocation37] sm:$0xf] }
0x21c1   :  { %v7241_v13 = vpop.f32.mrf.mxu0  ;;  %v7282_v1 = vpop.f32.mrf.mxu1  ;;  %8360 = vmatprep.subr.bf16.mxu0 %v9156_v0 }
0x21c2   :  { %v7298_v45 = vmax.f32 %v7240_v53, 0.0  ;;  %v7300_v2 = vmax.f32 %v7281_v12, 0.0  ;;  %v7322_v8 = vpack.c.bf16 %v7297_v43, %v7297_v43  ;;  %v7324_v9 = vpack.c.bf16 %v7299_v63, %v7299_v63  ;;  %v8278_v13 = vld [vmem:[#allocation34 + $0x2] ss:$0 sm:$0xff] }
0x21c3   :  { %v7242_v60 = vpop.f32.mrf.mxu0  ;;  %v7283_v3 = vpop.f32.mrf.mxu1  ;;  %v7755_v53 = vsel %vm4430_vm2, %v7742_v54, 0 }
0x21c4   :  { %v7323_v4 = vpack.c.bf16 %v7298_v45, %v7298_v45  ;;  %v7325_v5 = vpack.c.bf16 %v7300_v2, %v7300_v2  ;;  %v8279_v45 = vld [vmem:[#allocation36 + $0x2] ss:$0 sm:$0xff] }
0x21c6   :  { %7662 = vmatprep.mubr.bf16.mxu0 %v7323_v4  ;;  %7702 = vmatprep.mubr.bf16.mxu1 %v7325_v5  ;;  %v8280_v4 = vld [vmem:[#allocation39] ss:$0 sm:$0xff] }
0x21c7   :  { %7663 = vmatmul.mubr.bf16.vlgmr.msra.gmra.mxu0 %v7322_v8  ;;  %7703 = vmatmul.mubr.bf16.vlgmr.msra.gmra.mxu1 %v7324_v9  ;;  %v7799_v9 = vpop.permute.xlu0 %7798 }
0x21c8   :  { %8362 = vmatprep.mubr.msk.bf16.mxu0 %vm9157_vm0, %v9156_v0  ;;  %8361 = vmatpush3.bf16.msra.mxu0 %v7755_v53 }
0x226f   :  { %v7424_v10 = vpop.f32.mrf.mxu0  ;;  %v7464_v23 = vpop.f32.mrf.mxu1 }
0x2270   :  { %v7425_v16 = vadd.f32 %v8261_v39, %v7424_v10 }
0x2271   :  { %v7426_v11 = vpop.f32.mrf.mxu0  ;;  %v7466_v14 = vpop.f32.mrf.mxu1 }
0x2272   :  { %v7465_v56 = vadd.f32 %v7464_v23, %v7425_v16 }
0x2273   :  { %v7427_v17 = vpop.f32.mrf.mxu0  ;;  %v7467_v22 = vpop.f32.mrf.mxu1 }
0x2275   :  { %v7428_v28 = vpop.f32.mrf.mxu0  ;;  %v7468_v15 = vpop.f32.mrf.mxu1 }
0x2277   :  { %v7504_v18 = vpop.f32.mrf.mxu0  ;;  %v7544_v58 = vpop.f32.mrf.mxu1 }
0x2278   :  { %v7505_v57 = vadd.f32 %v7504_v18, %v7465_v56 }
0x2279   :  { %v7506_v6 = vpop.f32.mrf.mxu0  ;;  %v7546_v59 = vpop.f32.mrf.mxu1 }
0x227a   :  { %v7545_v61 = vadd.f32 %v7544_v58, %v7505_v57 }
0x227b   :  { %v7507_v19 = vpop.f32.mrf.mxu0  ;;  %v7547_v20 = vpop.f32.mrf.mxu1 }
0x227d   :  { %v7508_v7 = vpop.f32.mrf.mxu0  ;;  %v7548_v0 = vpop.f32.mrf.mxu1 }
0x227f   :  { %v7584_v21 = vpop.f32.mrf.mxu0  ;;  %v7624_v35 = vpop.f32.mrf.mxu1 }
0x2280   :  { %v7585_v62 = vadd.f32 %v7584_v21, %v7545_v61 }
0x2281   :  { %v7586_v25 = vpop.f32.mrf.mxu0  ;;  %v7626_v38 = vpop.f32.mrf.mxu1 }
0x2282   :  { %v7625_v31 = vadd.f32 %v7624_v35, %v7585_v62 }
0x2283   :  { %v7587_v29 = vpop.f32.mrf.mxu0  ;;  %v7627_v24 = vpop.f32.mrf.mxu1 }
0x2285   :  { %v7588_v30 = vpop.f32.mrf.mxu0  ;;  %v7628_v41 = vpop.f32.mrf.mxu1 }
0x2287   :  { %v7664_v32 = vpop.f32.mrf.mxu0  ;;  %v7704_v55 = vpop.f32.mrf.mxu1 }
0x2288   :  { %v7665_v48 = vadd.f32 %v7664_v32, %v7625_v31 }
0x2289   :  { %v7666_v37 = vpop.f32.mrf.mxu0  ;;  %v7706_v52 = vpop.f32.mrf.mxu1 }
0x228a   :  { %v7705_v40 = vadd.f32 %v7704_v55, %v7665_v48 }
0x228b   :  { %v7667_v34 = vpop.f32.mrf.mxu0  ;;  %v7707_v36 = vpop.f32.mrf.mxu1 }
0x228c   :  { %v7710_v44 = vadd.f32 %v7705_v40, %v9901_v33 }
0x228d   :  { %v7668_v47 = vpop.f32.mrf.mxu0  ;;  %v7708_v42 = vpop.f32.mrf.mxu1 }
0x228e   :  { %v7715_v46 = vsel %vm4426_vm3, %v7710_v44, 0.0 }
0x228f   :  { %7716 = vadd.xlane.f32.xlu1 %v7715_v46 }
0x2318   :  { %v7717_v50 = vpop.xlane.xlu1 %7716 }
0x2319   :  { %v7718_v49 = vmul.f32 0.125, %v7717_v50 }
0x231b   :  { %v7719_v26 = vsub.f32 %v7710_v44, %v7718_v49 }
0x231d   :  { %v7720_v51 = vmul.f32 %v7719_v26, %v7719_v26 }
0x231f   :  { %v7721_v27 = vsel %vm4426_vm3, %v7720_v51, 0.0 }
0x2320   :  { %7722 = vadd.xlane.f32.xlu1 %v7721_v27 }
0x23a9   :  { %v7723_v12 = vpop.xlane.xlu1 %7722 }
0x23aa   :  { %v7724_v43 = vmul.f32 0.125, %v7723_v12 }
0x23ac   :  { %v7725_v63 = vadd.f32 1e-05, %v7724_v43 }
0x23ae   :  { %8567 = vrsqrt.f32 %v7725_v63 }
0x23bb   :  { %v8568_v33 = vpop.eup %8567 }
0x23bc   :  { %v7727_v1 = vmul.f32 %v8568_v33, %v7719_v26 }
0x23be   :  { %v7734_v2 = vmul.f32 %v8278_v13, %v7727_v1 }
0x23c0   :  { %v7741_v60 = vadd.f32 %v8279_v45, %v7734_v2 }
0x23c2   :  { %v7743_v3 = vpack.c.bf16 %v7741_v60, %v7741_v60 }
0x23c4   :  { %8363 = vmatmul.mubr.msk.bf16.vlgmr.msra.gmra.mxu0 %vm4426_vm3, %v7743_v3 }
0x2484   :  { %v7791_v5 = vpop.f32.mrf.mxu0 }
0x2485   :  { %v7792_v8 = vadd.f32 %v8280_v4, %v7791_v5 }
0x2486   :  { %v8364_v10 = vpop.f32.mrf.mxu0 }
0x2487   :  { %v7801_v23 = vsel %vm482_vm1, %v7792_v8, %v7799_v9 }
0x2488   :  { %7803 = vst.msk [vmem:[%s9320_s14] sm:$0xff] %vm7802_vm4, %v7801_v23  ;;  %v7794_v11 = vpop.f32.mrf.mxu0 }
0x248a   :  { %v8365_v14 = vpop.f32.mrf.mxu0 }
0x248b   :  { %7808 = vsyncpa [#allocation3], 1 }
0x248c   :  { %7809 = vsyncpa [#allocation5], 1 }
0x248d   :  { %7810 = vsyncpa [#allocation8], 1 }
0x248e   :  { %7811 = vsyncpa [#allocation11], 1 }
0x248f   :  { %7812 = vsyncpa [#allocation14], 1 }
0x2490   :  { %7813 = vsyncpa [#allocation17], 1 }
0x2491   :  { %7814 = vsyncpa [#allocation20], 1 }
0x2492   :  { %7815 = vsyncpa [#allocation23], 1 }
0x2493   :  { %7816 = vsyncpa [#allocation26], 1 }
0x2494   :  { %7817 = vsyncpa [#allocation29], 1 }
0x2495   :  { %7818 = vsyncpa [#allocation32], 1 }
0x2496   :  { %7819 = vsyncpa [#allocation35], 1 }
0x2497   :  { %7820 = vsyncpa [#allocation38], 1 }

</bundles_post_ra>
